<compile_context>
chip_gen: v7x
topology: tpu7x:2x2x1
jax: 0.10.0
libtpu: 0.0.40
codegen_flags: <defaults>
</compile_context>

<pallas_src>
import functools

import jax
import jax.numpy as jnp
import numpy as np
from jax import lax
from jax.experimental import pallas as pl
from jax.experimental.pallas import tpu as pltpu

LEAK = 0.01      # LeakyReLU default negative_slope
EPS = 1e-5       # BatchNorm eps


# ----------------------------------------------------------------------- helpers
def _round_up(x, m):
    return (x + m - 1) // m * m


def _pick_row_tile(h, w, target_rows=256):
    """Image rows per grid step: th | h and (th*w) % 8 == 0 (or th == h)."""
    cap = max(1, min(h, max(1, target_rows // max(w, 1))))
    for th in range(cap, 0, -1):
        if h % th == 0 and ((th * w) % 8 == 0 or th == h):
            return th
    return h


def _pack_conv_weights(w_oihw, cout_pad, cin_pad=None):
    """(Cout,Cin,3,3) -> (9*Cin_pad, Cout_pad) bf16, rows ordered (ky, kx, cin)."""
    cout, cin, kh, kw = w_oihw.shape
    cin_pad = cin if cin_pad is None else cin_pad
    wt = jnp.transpose(w_oihw, (2, 3, 1, 0))                      # (3,3,Cin,Cout)
    wt = jnp.pad(wt, ((0, 0), (0, 0), (0, cin_pad - cin), (0, cout_pad - cout)))
    return wt.reshape(kh * kw * cin_pad, cout_pad).astype(jnp.bfloat16)


def _pad_vec(v, cp):
    return jnp.pad(v.astype(jnp.float32), (0, cp - v.shape[0]))


# ----------------------------------------------------------------------- kernels
def _conv_stats_kernel(*refs, th, width, d, cin, cp, h_img, fuse_prev_bn):
    """Pass A: (optional fused previous-BN + LeakyReLU on the input slab) ->
    im2col into a VMEM scratch -> ONE deep-K MXU matmul -> bf16 conv output tile
    + per-tile BN partial stats from the f32 accumulator.

    refs (fuse_prev_bn=True ): x, w, sc, sh, y, st, col
    refs (fuse_prev_bn=False): x, w,         y, st, col
      x    : (1, Hp, Wp, Cin)  bf16 spatially padded image for this sample
      w    : (9*Cin, Cp)       bf16 packed weights, rows ordered (ky, kx, cin)
      sc/sh: (1, Cin)          f32 previous layer's folded BN scale / shift
      y    : (1, th*W, Cp)     bf16 conv output tile (pre-BN)
      st   : (1, 1, 8, Cp)     f32 stats, row 0 = sum, row 1 = sum of squares
      col  : (th*W, 9*Cin)     bf16 VMEM im2col scratch
    """
    if fuse_prev_bn:
        x_ref, w_ref, sc_ref, sh_ref, y_ref, st_ref, col_ref = refs
    else:
        x_ref, w_ref, y_ref, st_ref, col_ref = refs

    h0 = pl.program_id(1) * th

    for ky in range(3):
        slab = x_ref[0, pl.ds(h0 + ky * d, th), :, :]             # (th, Wp, Cin) bf16
        if fuse_prev_bn:
            # conv1's BN (scale/shift) + LeakyReLU fused into conv2's input loads.
            z = slab.astype(jnp.float32) * sc_ref[0] + sh_ref[0]
            z = jnp.where(z >= 0, z, LEAK * z)
            # The reference zero-pads AFTER BN+LeakyReLU -> zero the padded border.
            rows = lax.broadcasted_iota(jnp.int32, z.shape, 0) + (h0 + ky * d)
            cols = lax.broadcasted_iota(jnp.int32, z.shape, 1)
            valid = ((rows >= d) & (rows < h_img + d)
                     & (cols >= d) & (cols < width + d))
            slab = jnp.where(valid, z, 0.0).astype(jnp.bfloat16)
        for kx in range(3):
            t = ky * 3 + kx
            xt = slab[:, kx * d:kx * d + width, :].reshape(th * width, cin)
            col_ref[:, t * cin:(t + 1) * cin] = xt

    # Single deep-K matmul: K = 9*Cin (36 for conv1, 1152 for conv2), f32 accumulate.
    acc = jnp.dot(col_ref[...], w_ref[...], preferred_element_type=jnp.float32)
    y_ref[...] = acc.astype(jnp.bfloat16)[None]

    s1 = jnp.sum(acc, axis=0, keepdims=True)                      # (1, Cp)
    s2 = jnp.sum(acc * acc, axis=0, keepdims=True)                # (1, Cp)
    st_ref[...] = jnp.concatenate(
        [s1, s2, jnp.zeros((6, cp), jnp.float32)], axis=0)[None, None]


def _bn_lrelu_kernel(y_ref, sc_ref, sh_ref, o_ref):
    """Final folded BatchNorm (scale/shift) + LeakyReLU, pure VPU."""
    z = y_ref[...].astype(jnp.float32) * sc_ref[...] + sh_ref[...]
    o_ref[...] = jnp.where(z >= 0, z, LEAK * z)


# ----------------------------------------------------------------------- pass A
def _conv_pass_a(xp, w_packed, *, th, h, w, d, cin, cp,
                 prev_scale=None, prev_shift=None):
    """xp:(N,Hp,Wp,Cin) bf16 padded -> (y:(N,H*W,Cp) bf16, stats:(N,ht,8,Cp) f32)."""
    n = xp.shape[0]
    hp, wp = h + 2 * d, w + 2 * d
    ht = h // th
    fuse = prev_scale is not None

    kern = functools.partial(_conv_stats_kernel, th=th, width=w, d=d, cin=cin,
                             cp=cp, h_img=h, fuse_prev_bn=fuse)

    in_specs = [pl.BlockSpec((1, hp, wp, cin), lambda i, j: (i, 0, 0, 0)),
                pl.BlockSpec((9 * cin, cp), lambda i, j: (0, 0))]
    args = [xp, w_packed]
    if fuse:
        in_specs += [pl.BlockSpec((1, cin), lambda i, j: (0, 0)),
                     pl.BlockSpec((1, cin), lambda i, j: (0, 0))]
        args += [prev_scale.reshape(1, cin), prev_shift.reshape(1, cin)]

    # TODO(synk): for large H*W, halo-tile the input along H (block (1, th+2d, Wp, Cin))
    # instead of keeping the whole padded image resident per sample.
    return pl.pallas_call(
        kern,
        out_shape=(jax.ShapeDtypeStruct((n, h * w, cp), jnp.bfloat16),
                   jax.ShapeDtypeStruct((n, ht, 8, cp), jnp.float32)),
        grid=(n, ht),
        in_specs=in_specs,
        out_specs=[pl.BlockSpec((1, th * w, cp), lambda i, j: (i, j, 0)),
                   pl.BlockSpec((1, 1, 8, cp), lambda i, j: (i, j, 0, 0))],
        scratch_shapes=[pltpu.VMEM((th * w, 9 * cin), jnp.bfloat16)],
        compiler_params=pltpu.CompilerParams(
            # Sample axis shards across v7x's two TensorCores; the row-tile axis
            # stays on one core so the full-image input block isn't duplicated.
            dimension_semantics=("parallel", "arbitrary"),
            vmem_limit_bytes=64 * 1024 * 1024),
    )(*args)


def _fold_bn(stats, gamma_p, beta_p, m_rows):
    """Per-tile (sum, sumsq) partials -> per-channel (scale, shift), training BN."""
    s = jnp.sum(stats, axis=(0, 1))                        # (8, Cp); rows 0,1 used
    mean = s[0] / m_rows
    var = jnp.maximum(s[1] / m_rows - mean * mean, 0.0)    # biased var, training BN
    scale = gamma_p * lax.rsqrt(var + EPS)
    shift = beta_p - mean * scale
    return scale, shift


# ----------------------------------------------------------------------- forward
@jax.jit
def down_forward(x_nchw, params):
    x = jnp.transpose(x_nchw, (0, 2, 3, 1)).astype(jnp.float32)   # NCHW -> NHWC
    n, h, w, cin = x.shape
    # MaxPool2d(2): windowed max kept as XLA glue.
    # TODO(synk): fuse the 2x2 pool and the zero-pad into conv1's pass-A loads.
    x = x.reshape(n, h // 2, 2, w // 2, 2, cin).max(axis=(2, 4))
    h, w = h // 2, w // 2

    n_out = params["w1"].shape[0]
    cp = _round_up(n_out, 128)          # lane-dense channel padding
    th = _pick_row_tile(h, w)
    ht = h // th
    m_rows = n * h * w

    # Conv biases are omitted: they cancel exactly under training-mode BatchNorm.
    # ---- conv1 (dilation 1) ----
    d1 = 1
    xp1 = jnp.pad(x, ((0, 0), (d1, d1), (d1, d1), (0, 0))).astype(jnp.bfloat16)
    w1p = _pack_conv_weights(params["w1"], cp)                     # (9*cin, cp)
    y1, st1 = _conv_pass_a(xp1, w1p, th=th, h=h, w=w, d=d1, cin=cin, cp=cp)
    scale1, shift1 = _fold_bn(st1, _pad_vec(params["g1"], cp),
                              _pad_vec(params["be1"], cp), m_rows)

    # ---- conv2 (dilation 2); BN1 + LeakyReLU fused into its input loads ----
    d2 = 2
    xp2 = jnp.pad(y1.reshape(n, h, w, cp),
                  ((0, 0), (d2, d2), (d2, d2), (0, 0)))            # bf16, pre-BN1
    w2p = _pack_conv_weights(params["w2"], cp, cin_pad=cp)         # (9*cp, cp)
    y2, st2 = _conv_pass_a(xp2, w2p, th=th, h=h, w=w, d=d2, cin=cp, cp=cp,
                           prev_scale=scale1, prev_shift=shift1)
    scale2, shift2 = _fold_bn(st2, _pad_vec(params["g2"], cp),
                              _pad_vec(params["be2"], cp), m_rows)

    # ---- final BN + LeakyReLU: the only standalone elementwise pass ----
    out = pl.pallas_call(
        _bn_lrelu_kernel,
        out_shape=jax.ShapeDtypeStruct((n, h * w, cp), jnp.float32),
        grid=(n, ht),
        in_specs=[pl.BlockSpec((1, th * w, cp), lambda i, j: (i, j, 0)),
                  pl.BlockSpec((1, 1, cp), lambda i, j: (0, 0, 0)),
                  pl.BlockSpec((1, 1, cp), lambda i, j: (0, 0, 0))],
        out_specs=pl.BlockSpec((1, th * w, cp), lambda i, j: (i, j, 0)),
        compiler_params=pltpu.CompilerParams(
            dimension_semantics=("parallel", "parallel")),
    )(y2, scale2.reshape(1, 1, cp), shift2.reshape(1, 1, cp))

    out = out.reshape(n, h, w, cp)[..., :n_out]                    # drop channel pad
    return jnp.transpose(out, (0, 3, 1, 2))                        # back to NCHW


# ----------------------------------------------------------------------- reference
def _conv_ref(x, w, b, dilation):
    out = jax.lax.conv_general_dilated(
        x, w, window_strides=(1, 1),
        padding=((dilation, dilation), (dilation, dilation)),
        rhs_dilation=(dilation, dilation),
        dimension_numbers=("NCHW", "OIHW", "NCHW"))
    return out + b[None, :, None, None]


def _bn_lrelu_ref(x, g, be):
    mean = x.mean(axis=(0, 2, 3), keepdims=True)
    var = x.var(axis=(0, 2, 3), keepdims=True)     # biased, PyTorch training BN
    y = (x - mean) / jnp.sqrt(var + EPS)
    y = y * g[None, :, None, None] + be[None, :, None, None]
    return jnp.where(y >= 0, y, LEAK * y)


def down_reference(x, p):
    N, C, H, W = x.shape
    x = x.reshape(N, C, H // 2, 2, W // 2, 2).max(axis=(3, 5))
    x = _bn_lrelu_ref(_conv_ref(x, p["w1"], p["b1"], 1), p["g1"], p["be1"])
    x = _bn_lrelu_ref(_conv_ref(x, p["w2"], p["b2"], 2), p["g2"], p["be2"])
    return x


# ----------------------------------------------------------------------- main
def init_params(key, n_in, n_out):
    ks = jax.random.split(key, 8)
    s1 = 1.0 / np.sqrt(n_in * 9)
    s2 = 1.0 / np.sqrt(n_out * 9)
    return {
        "w1": jax.random.normal(ks[0], (n_out, n_in, 3, 3), jnp.float32) * s1,
        "b1": jax.random.normal(ks[1], (n_out,), jnp.float32) * 0.1,
        "g1": 1.0 + 0.1 * jax.random.normal(ks[2], (n_out,), jnp.float32),
        "be1": 0.1 * jax.random.normal(ks[3], (n_out,), jnp.float32),
        "w2": jax.random.normal(ks[4], (n_out, n_out, 3, 3), jnp.float32) * s2,
        "b2": jax.random.normal(ks[5], (n_out,), jnp.float32) * 0.1,
        "g2": 1.0 + 0.1 * jax.random.normal(ks[6], (n_out,), jnp.float32),
        "be2": 0.1 * jax.random.normal(ks[7], (n_out,), jnp.float32),
    }


if __name__ == "__main__":
    key = jax.random.PRNGKey(0)
    k_x, k_p = jax.random.split(key)
    N, n_in, n_out, H, W = 2, 4, 8, 16, 16
    x = jax.random.normal(k_x, (N, n_in, H, W), jnp.float32)
    params = init_params(k_p, n_in, n_out)

    out = jax.block_until_ready(down_forward(x, params))
    assert out.shape == (N, n_out, H // 2, W // 2), out.shape

    ref = jax.block_until_ready(down_reference(x, params))
    np.testing.assert_allclose(np.asarray(out), np.asarray(ref), rtol=5e-2, atol=5e-2)

    print("KERNEL_OK")
</pallas_src>

<mosaic_0001>
module attributes {stable_mosaic.version = 11 : i64} {
  func.func @_conv_stats_kernel(%arg0: i32, %arg1: i32, %arg2: memref<1x10x10x4xbf16, #tpu.memory_space<vmem>>, %arg3: memref<36x128xbf16, #tpu.memory_space<vmem>>, %arg4: memref<1x64x128xbf16, #tpu.memory_space<vmem>>, %arg5: memref<1x1x8x128xf32, #tpu.memory_space<vmem>>, %arg6: memref<64x36xbf16, #tpu.memory_space<vmem>>) attributes {dimension_semantics = [#tpu.dimension_semantics<parallel>, #tpu.dimension_semantics<arbitrary>], iteration_bounds = array<i64: 2, 1>, scalar_prefetch = 0 : i64, scratch_operands = 1 : i64, tpu.core_type = #tpu.core_type<tc>, window_params = [{transform_indices = @transform_0, window_bounds = array<i64: 1, 10, 10, 4>}, {pipeline_mode = #tpu.pipeline_mode<synchronous>, transform_indices = @transform_1, window_bounds = array<i64: 36, 128>}, {transform_indices = @transform_2, window_bounds = array<i64: 1, 64, 128>}, {transform_indices = @transform_3, window_bounds = array<i64: 1, 1, 8, 128>}]} {
    %c8_i32 = arith.constant 8 : i32
    %0 = arith.muli %arg1, %c8_i32 : i32
    %c0_i32 = arith.constant 0 : i32
    %1 = arith.addi %0, %c0_i32 : i32
    %c0 = arith.constant 0 : index
    %2 = arith.index_cast %1 : i32 to index
    %c0_0 = arith.constant 0 : index
    %c0_1 = arith.constant 0 : index
    %3 = vector.load %arg2[%c0, %2, %c0_0, %c0_1] : memref<1x10x10x4xbf16, #tpu.memory_space<vmem>>, vector<1x8x10x4xbf16>
    %4 = vector.shape_cast %3 : vector<1x8x10x4xbf16> to vector<8x10x4xbf16>
    %5 = vector.extract_strided_slice %4 {offsets = [0, 0, 0], sizes = [8, 8, 4], strides = [1, 1, 1]} : vector<8x10x4xbf16> to vector<8x8x4xbf16>
    %6 = vector.shape_cast %5 : vector<8x8x4xbf16> to vector<64x4xbf16>
    %c0_2 = arith.constant 0 : index
    %c0_3 = arith.constant 0 : index
    %7 = vector.load %arg6[%c0_2, %c0_3] : memref<64x36xbf16, #tpu.memory_space<vmem>>, vector<64x4xbf16>
    tpu.vector_store %arg6[%c0_2, %c0_3], %6 {strides = array<i32>} : memref<64x36xbf16, #tpu.memory_space<vmem>>, vector<64x4xbf16>,
    %8 = vector.extract_strided_slice %4 {offsets = [0, 1, 0], sizes = [8, 8, 4], strides = [1, 1, 1]} : vector<8x10x4xbf16> to vector<8x8x4xbf16>
    %9 = vector.shape_cast %8 : vector<8x8x4xbf16> to vector<64x4xbf16>
    %c0_4 = arith.constant 0 : index
    %c4 = arith.constant 4 : index
    %10 = vector.load %arg6[%c0_4, %c4] : memref<64x36xbf16, #tpu.memory_space<vmem>>, vector<64x4xbf16>
    tpu.vector_store %arg6[%c0_4, %c4], %9 {strides = array<i32>} : memref<64x36xbf16, #tpu.memory_space<vmem>>, vector<64x4xbf16>,
    %11 = vector.extract_strided_slice %4 {offsets = [0, 2, 0], sizes = [8, 8, 4], strides = [1, 1, 1]} : vector<8x10x4xbf16> to vector<8x8x4xbf16>
    %12 = vector.shape_cast %11 : vector<8x8x4xbf16> to vector<64x4xbf16>
    %c0_5 = arith.constant 0 : index
    %c8 = arith.constant 8 : index
    %13 = vector.load %arg6[%c0_5, %c8] : memref<64x36xbf16, #tpu.memory_space<vmem>>, vector<64x4xbf16>
    tpu.vector_store %arg6[%c0_5, %c8], %12 {strides = array<i32>} : memref<64x36xbf16, #tpu.memory_space<vmem>>, vector<64x4xbf16>,
    %c1_i32 = arith.constant 1 : i32
    %14 = arith.addi %0, %c1_i32 : i32
    %c0_6 = arith.constant 0 : index
    %15 = arith.index_cast %14 : i32 to index
    %c0_7 = arith.constant 0 : index
    %c0_8 = arith.constant 0 : index
    %16 = vector.load %arg2[%c0_6, %15, %c0_7, %c0_8] : memref<1x10x10x4xbf16, #tpu.memory_space<vmem>>, vector<1x8x10x4xbf16>
    %17 = vector.shape_cast %16 : vector<1x8x10x4xbf16> to vector<8x10x4xbf16>
    %18 = vector.extract_strided_slice %17 {offsets = [0, 0, 0], sizes = [8, 8, 4], strides = [1, 1, 1]} : vector<8x10x4xbf16> to vector<8x8x4xbf16>
    %19 = vector.shape_cast %18 : vector<8x8x4xbf16> to vector<64x4xbf16>
    %c0_9 = arith.constant 0 : index
    %c12 = arith.constant 12 : index
    %20 = vector.load %arg6[%c0_9, %c12] : memref<64x36xbf16, #tpu.memory_space<vmem>>, vector<64x4xbf16>
    tpu.vector_store %arg6[%c0_9, %c12], %19 {strides = array<i32>} : memref<64x36xbf16, #tpu.memory_space<vmem>>, vector<64x4xbf16>,
    %21 = vector.extract_strided_slice %17 {offsets = [0, 1, 0], sizes = [8, 8, 4], strides = [1, 1, 1]} : vector<8x10x4xbf16> to vector<8x8x4xbf16>
    %22 = vector.shape_cast %21 : vector<8x8x4xbf16> to vector<64x4xbf16>
    %c0_10 = arith.constant 0 : index
    %c16 = arith.constant 16 : index
    %23 = vector.load %arg6[%c0_10, %c16] : memref<64x36xbf16, #tpu.memory_space<vmem>>, vector<64x4xbf16>
    tpu.vector_store %arg6[%c0_10, %c16], %22 {strides = array<i32>} : memref<64x36xbf16, #tpu.memory_space<vmem>>, vector<64x4xbf16>,
    %24 = vector.extract_strided_slice %17 {offsets = [0, 2, 0], sizes = [8, 8, 4], strides = [1, 1, 1]} : vector<8x10x4xbf16> to vector<8x8x4xbf16>
    %25 = vector.shape_cast %24 : vector<8x8x4xbf16> to vector<64x4xbf16>
    %c0_11 = arith.constant 0 : index
    %c20 = arith.constant 20 : index
    %26 = vector.load %arg6[%c0_11, %c20] : memref<64x36xbf16, #tpu.memory_space<vmem>>, vector<64x4xbf16>
    tpu.vector_store %arg6[%c0_11, %c20], %25 {strides = array<i32>} : memref<64x36xbf16, #tpu.memory_space<vmem>>, vector<64x4xbf16>,
    %c2_i32 = arith.constant 2 : i32
    %27 = arith.addi %0, %c2_i32 : i32
    %c0_12 = arith.constant 0 : index
    %28 = arith.index_cast %27 : i32 to index
    %c0_13 = arith.constant 0 : index
    %c0_14 = arith.constant 0 : index
    %29 = vector.load %arg2[%c0_12, %28, %c0_13, %c0_14] : memref<1x10x10x4xbf16, #tpu.memory_space<vmem>>, vector<1x8x10x4xbf16>
    %30 = vector.shape_cast %29 : vector<1x8x10x4xbf16> to vector<8x10x4xbf16>
    %31 = vector.extract_strided_slice %30 {offsets = [0, 0, 0], sizes = [8, 8, 4], strides = [1, 1, 1]} : vector<8x10x4xbf16> to vector<8x8x4xbf16>
    %32 = vector.shape_cast %31 : vector<8x8x4xbf16> to vector<64x4xbf16>
    %c0_15 = arith.constant 0 : index
    %c24 = arith.constant 24 : index
    %33 = vector.load %arg6[%c0_15, %c24] : memref<64x36xbf16, #tpu.memory_space<vmem>>, vector<64x4xbf16>
    tpu.vector_store %arg6[%c0_15, %c24], %32 {strides = array<i32>} : memref<64x36xbf16, #tpu.memory_space<vmem>>, vector<64x4xbf16>,
    %34 = vector.extract_strided_slice %30 {offsets = [0, 1, 0], sizes = [8, 8, 4], strides = [1, 1, 1]} : vector<8x10x4xbf16> to vector<8x8x4xbf16>
    %35 = vector.shape_cast %34 : vector<8x8x4xbf16> to vector<64x4xbf16>
    %c0_16 = arith.constant 0 : index
    %c28 = arith.constant 28 : index
    %36 = vector.load %arg6[%c0_16, %c28] : memref<64x36xbf16, #tpu.memory_space<vmem>>, vector<64x4xbf16>
    tpu.vector_store %arg6[%c0_16, %c28], %35 {strides = array<i32>} : memref<64x36xbf16, #tpu.memory_space<vmem>>, vector<64x4xbf16>,
    %37 = vector.extract_strided_slice %30 {offsets = [0, 2, 0], sizes = [8, 8, 4], strides = [1, 1, 1]} : vector<8x10x4xbf16> to vector<8x8x4xbf16>
    %38 = vector.shape_cast %37 : vector<8x8x4xbf16> to vector<64x4xbf16>
    %c0_17 = arith.constant 0 : index
    %c32 = arith.constant 32 : index
    %39 = vector.load %arg6[%c0_17, %c32] : memref<64x36xbf16, #tpu.memory_space<vmem>>, vector<64x4xbf16>
    tpu.vector_store %arg6[%c0_17, %c32], %38 {strides = array<i32>} : memref<64x36xbf16, #tpu.memory_space<vmem>>, vector<64x4xbf16>,
    %c0_18 = arith.constant 0 : index
    %c0_19 = arith.constant 0 : index
    %40 = vector.load %arg6[%c0_18, %c0_19] : memref<64x36xbf16, #tpu.memory_space<vmem>>, vector<64x36xbf16>
    %c0_20 = arith.constant 0 : index
    %c0_21 = arith.constant 0 : index
    %41 = vector.load %arg3[%c0_20, %c0_21] : memref<36x128xbf16, #tpu.memory_space<vmem>>, vector<36x128xbf16>
    %cst = arith.constant dense<0.000000e+00> : vector<64x128xf32>
    %42 = tpu.matmul %40, %41, %cst {dimension_numbers = #tpu.dot_dimension_numbers<[1], [0], [0], [1], [0, 0, 1, 1], [], []>} : vector<64x36xbf16>, vector<36x128xbf16>, vector<64x128xf32> -> vector<64x128xf32>
    %43 = arith.truncf %42 : vector<64x128xf32> to vector<64x128xbf16>
    %44 = vector.shape_cast %43 : vector<64x128xbf16> to vector<1x64x128xbf16>
    %c0_22 = arith.constant 0 : index
    %c0_23 = arith.constant 0 : index
    %c0_24 = arith.constant 0 : index
    %45 = vector.load %arg4[%c0_22, %c0_23, %c0_24] : memref<1x64x128xbf16, #tpu.memory_space<vmem>>, vector<1x64x128xbf16>
    tpu.vector_store %arg4[%c0_22, %c0_23, %c0_24], %44 {strides = array<i32>} : memref<1x64x128xbf16, #tpu.memory_space<vmem>>, vector<1x64x128xbf16>,
    %cst_25 = arith.constant dense<0.000000e+00> : vector<128xf32>
    %46 = vector.multi_reduction <add>, %42, %cst_25 [0] : vector<64x128xf32> to vector<128xf32>
    %47 = vector.shape_cast %46 : vector<128xf32> to vector<1x128xf32>
    %48 = arith.mulf %42, %42 : vector<64x128xf32>
    %cst_26 = arith.constant dense<0.000000e+00> : vector<128xf32>
    %49 = vector.multi_reduction <add>, %48, %cst_26 [0] : vector<64x128xf32> to vector<128xf32>
    %50 = vector.shape_cast %49 : vector<128xf32> to vector<1x128xf32>
    %cst_27 = arith.constant 0.000000e+00 : f32
    %51 = vector.broadcast %cst_27 : f32 to vector<6x128xf32>
    %52 = tpu.concatenate %47, %50, %51 in 0 : vector<1x128xf32>, vector<1x128xf32>, vector<6x128xf32> -> vector<8x128xf32>
    %53 = vector.shape_cast %52 : vector<8x128xf32> to vector<1x1x8x128xf32>
    %c0_28 = arith.constant 0 : index
    %c0_29 = arith.constant 0 : index
    %c0_30 = arith.constant 0 : index
    %c0_31 = arith.constant 0 : index
    %54 = vector.load %arg5[%c0_28, %c0_29, %c0_30, %c0_31] : memref<1x1x8x128xf32, #tpu.memory_space<vmem>>, vector<1x1x8x128xf32>
    tpu.vector_store %arg5[%c0_28, %c0_29, %c0_30, %c0_31], %53 {strides = array<i32>} : memref<1x1x8x128xf32, #tpu.memory_space<vmem>>, vector<1x1x8x128xf32>,
    return
  }
  func.func @transform_0(%arg0: i32, %arg1: i32) -> (i32, i32, i32, i32) {
    %c0_i32 = arith.constant 0 : i32
    %c0_i32_0 = arith.constant 0 : i32
    %c0_i32_1 = arith.constant 0 : i32
    %c0_i32_2 = arith.constant 0 : i32
    return %arg0, %c0_i32, %c0_i32_0, %c0_i32_1 : i32, i32, i32, i32
  }
  func.func @transform_1(%arg0: i32, %arg1: i32) -> (i32, i32) {
    %c0_i32 = arith.constant 0 : i32
    %c0_i32_0 = arith.constant 0 : i32
    %c0_i32_1 = arith.constant 0 : i32
    return %c0_i32, %c0_i32_0 : i32, i32
  }
  func.func @transform_2(%arg0: i32, %arg1: i32) -> (i32, i32, i32) {
    %c0_i32 = arith.constant 0 : i32
    %c0_i32_0 = arith.constant 0 : i32
    return %arg0, %arg1, %c0_i32 : i32, i32, i32
  }
  func.func @transform_3(%arg0: i32, %arg1: i32) -> (i32, i32, i32, i32) {
    %c0_i32 = arith.constant 0 : i32
    %c0_i32_0 = arith.constant 0 : i32
    %c0_i32_1 = arith.constant 0 : i32
    return %arg0, %arg1, %c0_i32, %c0_i32_0 : i32, i32, i32, i32
  }
}

module attributes {stable_mosaic.version = 11 : i64} {
  func.func @_conv_stats_kernel(%arg0: i32, %arg1: i32, %arg2: memref<1x12x12x128xbf16, #tpu.memory_space<vmem>>, %arg3: memref<1152x128xbf16, #tpu.memory_space<vmem>>, %arg4: memref<1x128xf32, #tpu.memory_space<vmem>>, %arg5: memref<1x128xf32, #tpu.memory_space<vmem>>, %arg6: memref<1x64x128xbf16, #tpu.memory_space<vmem>>, %arg7: memref<1x1x8x128xf32, #tpu.memory_space<vmem>>, %arg8: memref<64x1152xbf16, #tpu.memory_space<vmem>>) attributes {dimension_semantics = [#tpu.dimension_semantics<parallel>, #tpu.dimension_semantics<arbitrary>], iteration_bounds = array<i64: 2, 1>, scalar_prefetch = 0 : i64, scratch_operands = 1 : i64, tpu.core_type = #tpu.core_type<tc>, window_params = [{transform_indices = @transform_0, window_bounds = array<i64: 1, 12, 12, 128>}, {pipeline_mode = #tpu.pipeline_mode<synchronous>, transform_indices = @transform_1, window_bounds = array<i64: 1152, 128>}, {pipeline_mode = #tpu.pipeline_mode<synchronous>, transform_indices = @transform_2, window_bounds = array<i64: 1, 128>}, {pipeline_mode = #tpu.pipeline_mode<synchronous>, transform_indices = @transform_3, window_bounds = array<i64: 1, 128>}, {transform_indices = @transform_4, window_bounds = array<i64: 1, 64, 128>}, {transform_indices = @transform_5, window_bounds = array<i64: 1, 1, 8, 128>}]} {
    %c8_i32 = arith.constant 8 : i32
    %0 = arith.muli %arg1, %c8_i32 : i32
    %c0_i32 = arith.constant 0 : i32
    %1 = arith.addi %0, %c0_i32 : i32
    %c0 = arith.constant 0 : index
    %2 = arith.index_cast %1 : i32 to index
    %c0_0 = arith.constant 0 : index
    %c0_1 = arith.constant 0 : index
    %3 = vector.load %arg2[%c0, %2, %c0_0, %c0_1] : memref<1x12x12x128xbf16, #tpu.memory_space<vmem>>, vector<1x8x12x128xbf16>
    %4 = vector.shape_cast %3 : vector<1x8x12x128xbf16> to vector<8x12x128xbf16>
    %5 = arith.extf %4 : vector<8x12x128xbf16> to vector<8x12x128xf32>
    %c0_2 = arith.constant 0 : index
    %c0_3 = arith.constant 0 : index
    %6 = vector.load %arg4[%c0_2, %c0_3] : memref<1x128xf32, #tpu.memory_space<vmem>>, vector<1x128xf32>
    %7 = vector.shape_cast %6 : vector<1x128xf32> to vector<128xf32>
    %8 = vector.shape_cast %7 : vector<128xf32> to vector<1x1x128xf32>
    %9 = vector.broadcast %8 : vector<1x1x128xf32> to vector<8x12x128xf32>
    %10 = arith.mulf %5, %9 : vector<8x12x128xf32>
    %c0_4 = arith.constant 0 : index
    %c0_5 = arith.constant 0 : index
    %11 = vector.load %arg5[%c0_4, %c0_5] : memref<1x128xf32, #tpu.memory_space<vmem>>, vector<1x128xf32>
    %12 = vector.shape_cast %11 : vector<1x128xf32> to vector<128xf32>
    %13 = vector.shape_cast %12 : vector<128xf32> to vector<1x1x128xf32>
    %14 = vector.broadcast %13 : vector<1x1x128xf32> to vector<8x12x128xf32>
    %15 = arith.addf %10, %14 : vector<8x12x128xf32>
    %cst = arith.constant 0.000000e+00 : f32
    %16 = vector.broadcast %cst : f32 to vector<8x12x128xf32>
    %17 = arith.cmpf oge, %15, %16 : vector<8x12x128xf32>
    %cst_6 = arith.constant 0.00999999977 : f32
    %18 = vector.broadcast %cst_6 : f32 to vector<8x12x128xf32>
    %19 = arith.mulf %18, %15 : vector<8x12x128xf32>
    %20 = arith.select %17, %15, %19 : vector<8x12x128xi1>, vector<8x12x128xf32>
    %21 = tpu.iota {dimensions = array<i32: 0>} : vector<8x12x128xi32>
    %c0_i32_7 = arith.constant 0 : i32
    %22 = arith.addi %0, %c0_i32_7 : i32
    %23 = vector.broadcast %22 : i32 to vector<8x12x128xi32>
    %24 = arith.addi %21, %23 : vector<8x12x128xi32>
    %25 = tpu.iota {dimensions = array<i32: 1>} : vector<8x12x128xi32>
    %c2_i32 = arith.constant 2 : i32
    %26 = vector.broadcast %c2_i32 : i32 to vector<8x12x128xi32>
    %27 = arith.cmpi sge, %24, %26 : vector<8x12x128xi32>
    %c10_i32 = arith.constant 10 : i32
    %28 = vector.broadcast %c10_i32 : i32 to vector<8x12x128xi32>
    %29 = arith.cmpi slt, %24, %28 : vector<8x12x128xi32>
    %30 = arith.andi %27, %29 : vector<8x12x128xi1>
    %c2_i32_8 = arith.constant 2 : i32
    %31 = vector.broadcast %c2_i32_8 : i32 to vector<8x12x128xi32>
    %32 = arith.cmpi sge, %25, %31 : vector<8x12x128xi32>
    %33 = arith.andi %30, %32 : vector<8x12x128xi1>
    %c10_i32_9 = arith.constant 10 : i32
    %34 = vector.broadcast %c10_i32_9 : i32 to vector<8x12x128xi32>
    %35 = arith.cmpi slt, %25, %34 : vector<8x12x128xi32>
    %36 = arith.andi %33, %35 : vector<8x12x128xi1>
    %cst_10 = arith.constant 0.000000e+00 : f32
    %37 = vector.broadcast %cst_10 : f32 to vector<8x12x128xf32>
    %38 = arith.select %36, %20, %37 : vector<8x12x128xi1>, vector<8x12x128xf32>
    %39 = arith.truncf %38 : vector<8x12x128xf32> to vector<8x12x128xbf16>
    %40 = vector.extract_strided_slice %39 {offsets = [0, 0, 0], sizes = [8, 8, 128], strides = [1, 1, 1]} : vector<8x12x128xbf16> to vector<8x8x128xbf16>
    %41 = vector.shape_cast %40 : vector<8x8x128xbf16> to vector<64x128xbf16>
    %c0_11 = arith.constant 0 : index
    %c0_12 = arith.constant 0 : index
    %42 = vector.load %arg8[%c0_11, %c0_12] : memref<64x1152xbf16, #tpu.memory_space<vmem>>, vector<64x128xbf16>
    tpu.vector_store %arg8[%c0_11, %c0_12], %41 {strides = array<i32>} : memref<64x1152xbf16, #tpu.memory_space<vmem>>, vector<64x128xbf16>,
    %43 = vector.extract_strided_slice %39 {offsets = [0, 2, 0], sizes = [8, 8, 128], strides = [1, 1, 1]} : vector<8x12x128xbf16> to vector<8x8x128xbf16>
    %44 = vector.shape_cast %43 : vector<8x8x128xbf16> to vector<64x128xbf16>
    %c0_13 = arith.constant 0 : index
    %c128 = arith.constant 128 : index
    %45 = vector.load %arg8[%c0_13, %c128] : memref<64x1152xbf16, #tpu.memory_space<vmem>>, vector<64x128xbf16>
    tpu.vector_store %arg8[%c0_13, %c128], %44 {strides = array<i32>} : memref<64x1152xbf16, #tpu.memory_space<vmem>>, vector<64x128xbf16>,
    %46 = vector.extract_strided_slice %39 {offsets = [0, 4, 0], sizes = [8, 8, 128], strides = [1, 1, 1]} : vector<8x12x128xbf16> to vector<8x8x128xbf16>
    %47 = vector.shape_cast %46 : vector<8x8x128xbf16> to vector<64x128xbf16>
    %c0_14 = arith.constant 0 : index
    %c256 = arith.constant 256 : index
    %48 = vector.load %arg8[%c0_14, %c256] : memref<64x1152xbf16, #tpu.memory_space<vmem>>, vector<64x128xbf16>
    tpu.vector_store %arg8[%c0_14, %c256], %47 {strides = array<i32>} : memref<64x1152xbf16, #tpu.memory_space<vmem>>, vector<64x128xbf16>,
    %c2_i32_15 = arith.constant 2 : i32
    %49 = arith.addi %0, %c2_i32_15 : i32
    %c0_16 = arith.constant 0 : index
    %50 = arith.index_cast %49 : i32 to index
    %c0_17 = arith.constant 0 : index
    %c0_18 = arith.constant 0 : index
    %51 = vector.load %arg2[%c0_16, %50, %c0_17, %c0_18] : memref<1x12x12x128xbf16, #tpu.memory_space<vmem>>, vector<1x8x12x128xbf16>
    %52 = vector.shape_cast %51 : vector<1x8x12x128xbf16> to vector<8x12x128xbf16>
    %53 = arith.extf %52 : vector<8x12x128xbf16> to vector<8x12x128xf32>
    %c0_19 = arith.constant 0 : index
    %c0_20 = arith.constant 0 : index
    %54 = vector.load %arg4[%c0_19, %c0_20] : memref<1x128xf32, #tpu.memory_space<vmem>>, vector<1x128xf32>
    %55 = vector.shape_cast %54 : vector<1x128xf32> to vector<128xf32>
    %56 = vector.shape_cast %55 : vector<128xf32> to vector<1x1x128xf32>
    %57 = vector.broadcast %56 : vector<1x1x128xf32> to vector<8x12x128xf32>
    %58 = arith.mulf %53, %57 : vector<8x12x128xf32>
    %c0_21 = arith.constant 0 : index
    %c0_22 = arith.constant 0 : index
    %59 = vector.load %arg5[%c0_21, %c0_22] : memref<1x128xf32, #tpu.memory_space<vmem>>, vector<1x128xf32>
    %60 = vector.shape_cast %59 : vector<1x128xf32> to vector<128xf32>
    %61 = vector.shape_cast %60 : vector<128xf32> to vector<1x1x128xf32>
    %62 = vector.broadcast %61 : vector<1x1x128xf32> to vector<8x12x128xf32>
    %63 = arith.addf %58, %62 : vector<8x12x128xf32>
    %cst_23 = arith.constant 0.000000e+00 : f32
    %64 = vector.broadcast %cst_23 : f32 to vector<8x12x128xf32>
    %65 = arith.cmpf oge, %63, %64 : vector<8x12x128xf32>
    %cst_24 = arith.constant 0.00999999977 : f32
    %66 = vector.broadcast %cst_24 : f32 to vector<8x12x128xf32>
    %67 = arith.mulf %66, %63 : vector<8x12x128xf32>
    %68 = arith.select %65, %63, %67 : vector<8x12x128xi1>, vector<8x12x128xf32>
    %69 = tpu.iota {dimensions = array<i32: 0>} : vector<8x12x128xi32>
    %c2_i32_25 = arith.constant 2 : i32
    %70 = arith.addi %0, %c2_i32_25 : i32
    %71 = vector.broadcast %70 : i32 to vector<8x12x128xi32>
    %72 = arith.addi %69, %71 : vector<8x12x128xi32>
    %73 = tpu.iota {dimensions = array<i32: 1>} : vector<8x12x128xi32>
    %c2_i32_26 = arith.constant 2 : i32
    %74 = vector.broadcast %c2_i32_26 : i32 to vector<8x12x128xi32>
    %75 = arith.cmpi sge, %72, %74 : vector<8x12x128xi32>
    %c10_i32_27 = arith.constant 10 : i32
    %76 = vector.broadcast %c10_i32_27 : i32 to vector<8x12x128xi32>
    %77 = arith.cmpi slt, %72, %76 : vector<8x12x128xi32>
    %78 = arith.andi %75, %77 : vector<8x12x128xi1>
    %c2_i32_28 = arith.constant 2 : i32
    %79 = vector.broadcast %c2_i32_28 : i32 to vector<8x12x128xi32>
    %80 = arith.cmpi sge, %73, %79 : vector<8x12x128xi32>
    %81 = arith.andi %78, %80 : vector<8x12x128xi1>
    %c10_i32_29 = arith.constant 10 : i32
    %82 = vector.broadcast %c10_i32_29 : i32 to vector<8x12x128xi32>
    %83 = arith.cmpi slt, %73, %82 : vector<8x12x128xi32>
    %84 = arith.andi %81, %83 : vector<8x12x128xi1>
    %cst_30 = arith.constant 0.000000e+00 : f32
    %85 = vector.broadcast %cst_30 : f32 to vector<8x12x128xf32>
    %86 = arith.select %84, %68, %85 : vector<8x12x128xi1>, vector<8x12x128xf32>
    %87 = arith.truncf %86 : vector<8x12x128xf32> to vector<8x12x128xbf16>
    %88 = vector.extract_strided_slice %87 {offsets = [0, 0, 0], sizes = [8, 8, 128], strides = [1, 1, 1]} : vector<8x12x128xbf16> to vector<8x8x128xbf16>
    %89 = vector.shape_cast %88 : vector<8x8x128xbf16> to vector<64x128xbf16>
    %c0_31 = arith.constant 0 : index
    %c384 = arith.constant 384 : index
    %90 = vector.load %arg8[%c0_31, %c384] : memref<64x1152xbf16, #tpu.memory_space<vmem>>, vector<64x128xbf16>
    tpu.vector_store %arg8[%c0_31, %c384], %89 {strides = array<i32>} : memref<64x1152xbf16, #tpu.memory_space<vmem>>, vector<64x128xbf16>,
    %91 = vector.extract_strided_slice %87 {offsets = [0, 2, 0], sizes = [8, 8, 128], strides = [1, 1, 1]} : vector<8x12x128xbf16> to vector<8x8x128xbf16>
    %92 = vector.shape_cast %91 : vector<8x8x128xbf16> to vector<64x128xbf16>
    %c0_32 = arith.constant 0 : index
    %c512 = arith.constant 512 : index
    %93 = vector.load %arg8[%c0_32, %c512] : memref<64x1152xbf16, #tpu.memory_space<vmem>>, vector<64x128xbf16>
    tpu.vector_store %arg8[%c0_32, %c512], %92 {strides = array<i32>} : memref<64x1152xbf16, #tpu.memory_space<vmem>>, vector<64x128xbf16>,
    %94 = vector.extract_strided_slice %87 {offsets = [0, 4, 0], sizes = [8, 8, 128], strides = [1, 1, 1]} : vector<8x12x128xbf16> to vector<8x8x128xbf16>
    %95 = vector.shape_cast %94 : vector<8x8x128xbf16> to vector<64x128xbf16>
    %c0_33 = arith.constant 0 : index
    %c640 = arith.constant 640 : index
    %96 = vector.load %arg8[%c0_33, %c640] : memref<64x1152xbf16, #tpu.memory_space<vmem>>, vector<64x128xbf16>
    tpu.vector_store %arg8[%c0_33, %c640], %95 {strides = array<i32>} : memref<64x1152xbf16, #tpu.memory_space<vmem>>, vector<64x128xbf16>,
    %c4_i32 = arith.constant 4 : i32
    %97 = arith.addi %0, %c4_i32 : i32
    %c0_34 = arith.constant 0 : index
    %98 = arith.index_cast %97 : i32 to index
    %c0_35 = arith.constant 0 : index
    %c0_36 = arith.constant 0 : index
    %99 = vector.load %arg2[%c0_34, %98, %c0_35, %c0_36] : memref<1x12x12x128xbf16, #tpu.memory_space<vmem>>, vector<1x8x12x128xbf16>
    %100 = vector.shape_cast %99 : vector<1x8x12x128xbf16> to vector<8x12x128xbf16>
    %101 = arith.extf %100 : vector<8x12x128xbf16> to vector<8x12x128xf32>
    %c0_37 = arith.constant 0 : index
    %c0_38 = arith.constant 0 : index
    %102 = vector.load %arg4[%c0_37, %c0_38] : memref<1x128xf32, #tpu.memory_space<vmem>>, vector<1x128xf32>
    %103 = vector.shape_cast %102 : vector<1x128xf32> to vector<128xf32>
    %104 = vector.shape_cast %103 : vector<128xf32> to vector<1x1x128xf32>
    %105 = vector.broadcast %104 : vector<1x1x128xf32> to vector<8x12x128xf32>
    %106 = arith.mulf %101, %105 : vector<8x12x128xf32>
    %c0_39 = arith.constant 0 : index
    %c0_40 = arith.constant 0 : index
    %107 = vector.load %arg5[%c0_39, %c0_40] : memref<1x128xf32, #tpu.memory_space<vmem>>, vector<1x128xf32>
    %108 = vector.shape_cast %107 : vector<1x128xf32> to vector<128xf32>
    %109 = vector.shape_cast %108 : vector<128xf32> to vector<1x1x128xf32>
    %110 = vector.broadcast %109 : vector<1x1x128xf32> to vector<8x12x128xf32>
    %111 = arith.addf %106, %110 : vector<8x12x128xf32>
    %cst_41 = arith.constant 0.000000e+00 : f32
    %112 = vector.broadcast %cst_41 : f32 to vector<8x12x128xf32>
    %113 = arith.cmpf oge, %111, %112 : vector<8x12x128xf32>
    %cst_42 = arith.constant 0.00999999977 : f32
    %114 = vector.broadcast %cst_42 : f32 to vector<8x12x128xf32>
    %115 = arith.mulf %114, %111 : vector<8x12x128xf32>
    %116 = arith.select %113, %111, %115 : vector<8x12x128xi1>, vector<8x12x128xf32>
    %117 = tpu.iota {dimensions = array<i32: 0>} : vector<8x12x128xi32>
    %c4_i32_43 = arith.constant 4 : i32
    %118 = arith.addi %0, %c4_i32_43 : i32
    %119 = vector.broadcast %118 : i32 to vector<8x12x128xi32>
    %120 = arith.addi %117, %119 : vector<8x12x128xi32>
    %121 = tpu.iota {dimensions = array<i32: 1>} : vector<8x12x128xi32>
    %c2_i32_44 = arith.constant 2 : i32
    %122 = vector.broadcast %c2_i32_44 : i32 to vector<8x12x128xi32>
    %123 = arith.cmpi sge, %120, %122 : vector<8x12x128xi32>
    %c10_i32_45 = arith.constant 10 : i32
    %124 = vector.broadcast %c10_i32_45 : i32 to vector<8x12x128xi32>
    %125 = arith.cmpi slt, %120, %124 : vector<8x12x128xi32>
    %126 = arith.andi %123, %125 : vector<8x12x128xi1>
    %c2_i32_46 = arith.constant 2 : i32
    %127 = vector.broadcast %c2_i32_46 : i32 to vector<8x12x128xi32>
    %128 = arith.cmpi sge, %121, %127 : vector<8x12x128xi32>
    %129 = arith.andi %126, %128 : vector<8x12x128xi1>
    %c10_i32_47 = arith.constant 10 : i32
    %130 = vector.broadcast %c10_i32_47 : i32 to vector<8x12x128xi32>
    %131 = arith.cmpi slt, %121, %130 : vector<8x12x128xi32>
    %132 = arith.andi %129, %131 : vector<8x12x128xi1>
    %cst_48 = arith.constant 0.000000e+00 : f32
    %133 = vector.broadcast %cst_48 : f32 to vector<8x12x128xf32>
    %134 = arith.select %132, %116, %133 : vector<8x12x128xi1>, vector<8x12x128xf32>
    %135 = arith.truncf %134 : vector<8x12x128xf32> to vector<8x12x128xbf16>
    %136 = vector.extract_strided_slice %135 {offsets = [0, 0, 0], sizes = [8, 8, 128], strides = [1, 1, 1]} : vector<8x12x128xbf16> to vector<8x8x128xbf16>
    %137 = vector.shape_cast %136 : vector<8x8x128xbf16> to vector<64x128xbf16>
    %c0_49 = arith.constant 0 : index
    %c768 = arith.constant 768 : index
    %138 = vector.load %arg8[%c0_49, %c768] : memref<64x1152xbf16, #tpu.memory_space<vmem>>, vector<64x128xbf16>
    tpu.vector_store %arg8[%c0_49, %c768], %137 {strides = array<i32>} : memref<64x1152xbf16, #tpu.memory_space<vmem>>, vector<64x128xbf16>,
    %139 = vector.extract_strided_slice %135 {offsets = [0, 2, 0], sizes = [8, 8, 128], strides = [1, 1, 1]} : vector<8x12x128xbf16> to vector<8x8x128xbf16>
    %140 = vector.shape_cast %139 : vector<8x8x128xbf16> to vector<64x128xbf16>
    %c0_50 = arith.constant 0 : index
    %c896 = arith.constant 896 : index
    %141 = vector.load %arg8[%c0_50, %c896] : memref<64x1152xbf16, #tpu.memory_space<vmem>>, vector<64x128xbf16>
    tpu.vector_store %arg8[%c0_50, %c896], %140 {strides = array<i32>} : memref<64x1152xbf16, #tpu.memory_space<vmem>>, vector<64x128xbf16>,
    %142 = vector.extract_strided_slice %135 {offsets = [0, 4, 0], sizes = [8, 8, 128], strides = [1, 1, 1]} : vector<8x12x128xbf16> to vector<8x8x128xbf16>
    %143 = vector.shape_cast %142 : vector<8x8x128xbf16> to vector<64x128xbf16>
    %c0_51 = arith.constant 0 : index
    %c1024 = arith.constant 1024 : index
    %144 = vector.load %arg8[%c0_51, %c1024] : memref<64x1152xbf16, #tpu.memory_space<vmem>>, vector<64x128xbf16>
    tpu.vector_store %arg8[%c0_51, %c1024], %143 {strides = array<i32>} : memref<64x1152xbf16, #tpu.memory_space<vmem>>, vector<64x128xbf16>,
    %c0_52 = arith.constant 0 : index
    %c0_53 = arith.constant 0 : index
    %145 = vector.load %arg8[%c0_52, %c0_53] : memref<64x1152xbf16, #tpu.memory_space<vmem>>, vector<64x1152xbf16>
    %c0_54 = arith.constant 0 : index
    %c0_55 = arith.constant 0 : index
    %146 = vector.load %arg3[%c0_54, %c0_55] : memref<1152x128xbf16, #tpu.memory_space<vmem>>, vector<1152x128xbf16>
    %cst_56 = arith.constant dense<0.000000e+00> : vector<64x128xf32>
    %147 = tpu.matmul %145, %146, %cst_56 {dimension_numbers = #tpu.dot_dimension_numbers<[1], [0], [0], [1], [0, 0, 1, 1], [], []>} : vector<64x1152xbf16>, vector<1152x128xbf16>, vector<64x128xf32> -> vector<64x128xf32>
    %148 = arith.truncf %147 : vector<64x128xf32> to vector<64x128xbf16>
    %149 = vector.shape_cast %148 : vector<64x128xbf16> to vector<1x64x128xbf16>
    %c0_57 = arith.constant 0 : index
    %c0_58 = arith.constant 0 : index
    %c0_59 = arith.constant 0 : index
    %150 = vector.load %arg6[%c0_57, %c0_58, %c0_59] : memref<1x64x128xbf16, #tpu.memory_space<vmem>>, vector<1x64x128xbf16>
    tpu.vector_store %arg6[%c0_57, %c0_58, %c0_59], %149 {strides = array<i32>} : memref<1x64x128xbf16, #tpu.memory_space<vmem>>, vector<1x64x128xbf16>,
    %cst_60 = arith.constant dense<0.000000e+00> : vector<128xf32>
    %151 = vector.multi_reduction <add>, %147, %cst_60 [0] : vector<64x128xf32> to vector<128xf32>
    %152 = vector.shape_cast %151 : vector<128xf32> to vector<1x128xf32>
    %153 = arith.mulf %147, %147 : vector<64x128xf32>
    %cst_61 = arith.constant dense<0.000000e+00> : vector<128xf32>
    %154 = vector.multi_reduction <add>, %153, %cst_61 [0] : vector<64x128xf32> to vector<128xf32>
    %155 = vector.shape_cast %154 : vector<128xf32> to vector<1x128xf32>
    %cst_62 = arith.constant 0.000000e+00 : f32
    %156 = vector.broadcast %cst_62 : f32 to vector<6x128xf32>
    %157 = tpu.concatenate %152, %155, %156 in 0 : vector<1x128xf32>, vector<1x128xf32>, vector<6x128xf32> -> vector<8x128xf32>
    %158 = vector.shape_cast %157 : vector<8x128xf32> to vector<1x1x8x128xf32>
    %c0_63 = arith.constant 0 : index
    %c0_64 = arith.constant 0 : index
    %c0_65 = arith.constant 0 : index
    %c0_66 = arith.constant 0 : index
    %159 = vector.load %arg7[%c0_63, %c0_64, %c0_65, %c0_66] : memref<1x1x8x128xf32, #tpu.memory_space<vmem>>, vector<1x1x8x128xf32>
    tpu.vector_store %arg7[%c0_63, %c0_64, %c0_65, %c0_66], %158 {strides = array<i32>} : memref<1x1x8x128xf32, #tpu.memory_space<vmem>>, vector<1x1x8x128xf32>,
    return
  }
  func.func @transform_0(%arg0: i32, %arg1: i32) -> (i32, i32, i32, i32) {
    %c0_i32 = arith.constant 0 : i32
    %c0_i32_0 = arith.constant 0 : i32
    %c0_i32_1 = arith.constant 0 : i32
    %c0_i32_2 = arith.constant 0 : i32
    return %arg0, %c0_i32, %c0_i32_0, %c0_i32_1 : i32, i32, i32, i32
  }
  func.func @transform_1(%arg0: i32, %arg1: i32) -> (i32, i32) {
    %c0_i32 = arith.constant 0 : i32
    %c0_i32_0 = arith.constant 0 : i32
    %c0_i32_1 = arith.constant 0 : i32
    return %c0_i32, %c0_i32_0 : i32, i32
  }
  func.func @transform_2(%arg0: i32, %arg1: i32) -> (i32, i32) {
    %c0_i32 = arith.constant 0 : i32
    %c0_i32_0 = arith.constant 0 : i32
    %c0_i32_1 = arith.constant 0 : i32
    return %c0_i32, %c0_i32_0 : i32, i32
  }
  func.func @transform_3(%arg0: i32, %arg1: i32) -> (i32, i32) {
    %c0_i32 = arith.constant 0 : i32
    %c0_i32_0 = arith.constant 0 : i32
    %c0_i32_1 = arith.constant 0 : i32
    return %c0_i32, %c0_i32_0 : i32, i32
  }
  func.func @transform_4(%arg0: i32, %arg1: i32) -> (i32, i32, i32) {
    %c0_i32 = arith.constant 0 : i32
    %c0_i32_0 = arith.constant 0 : i32
    return %arg0, %arg1, %c0_i32 : i32, i32, i32
  }
  func.func @transform_5(%arg0: i32, %arg1: i32) -> (i32, i32, i32, i32) {
    %c0_i32 = arith.constant 0 : i32
    %c0_i32_0 = arith.constant 0 : i32
    %c0_i32_1 = arith.constant 0 : i32
    return %arg0, %arg1, %c0_i32, %c0_i32_0 : i32, i32, i32, i32
  }
}

module attributes {stable_mosaic.version = 11 : i64} {
  func.func @_bn_lrelu_kernel(%arg0: i32, %arg1: i32, %arg2: memref<1x64x128xbf16, #tpu.memory_space<vmem>>, %arg3: memref<1x1x128xf32, #tpu.memory_space<vmem>>, %arg4: memref<1x1x128xf32, #tpu.memory_space<vmem>>, %arg5: memref<1x64x128xf32, #tpu.memory_space<vmem>>) attributes {dimension_semantics = [#tpu.dimension_semantics<parallel>, #tpu.dimension_semantics<parallel>], iteration_bounds = array<i64: 2, 1>, scalar_prefetch = 0 : i64, scratch_operands = 0 : i64, tpu.core_type = #tpu.core_type<tc>, window_params = [{transform_indices = @transform_0, window_bounds = array<i64: 1, 64, 128>}, {pipeline_mode = #tpu.pipeline_mode<synchronous>, transform_indices = @transform_1, window_bounds = array<i64: 1, 1, 128>}, {pipeline_mode = #tpu.pipeline_mode<synchronous>, transform_indices = @transform_2, window_bounds = array<i64: 1, 1, 128>}, {transform_indices = @transform_3, window_bounds = array<i64: 1, 64, 128>}]} {
    %c0 = arith.constant 0 : index
    %c0_0 = arith.constant 0 : index
    %c0_1 = arith.constant 0 : index
    %0 = vector.load %arg2[%c0, %c0_0, %c0_1] : memref<1x64x128xbf16, #tpu.memory_space<vmem>>, vector<1x64x128xbf16>
    %1 = arith.extf %0 : vector<1x64x128xbf16> to vector<1x64x128xf32>
    %c0_2 = arith.constant 0 : index
    %c0_3 = arith.constant 0 : index
    %c0_4 = arith.constant 0 : index
    %2 = vector.load %arg3[%c0_2, %c0_3, %c0_4] : memref<1x1x128xf32, #tpu.memory_space<vmem>>, vector<1x1x128xf32>
    %3 = vector.broadcast %2 : vector<1x1x128xf32> to vector<1x64x128xf32>
    %4 = arith.mulf %1, %3 : vector<1x64x128xf32>
    %c0_5 = arith.constant 0 : index
    %c0_6 = arith.constant 0 : index
    %c0_7 = arith.constant 0 : index
    %5 = vector.load %arg4[%c0_5, %c0_6, %c0_7] : memref<1x1x128xf32, #tpu.memory_space<vmem>>, vector<1x1x128xf32>
    %6 = vector.broadcast %5 : vector<1x1x128xf32> to vector<1x64x128xf32>
    %7 = arith.addf %4, %6 : vector<1x64x128xf32>
    %cst = arith.constant 0.000000e+00 : f32
    %8 = vector.broadcast %cst : f32 to vector<1x64x128xf32>
    %9 = arith.cmpf oge, %7, %8 : vector<1x64x128xf32>
    %cst_8 = arith.constant 0.00999999977 : f32
    %10 = vector.broadcast %cst_8 : f32 to vector<1x64x128xf32>
    %11 = arith.mulf %10, %7 : vector<1x64x128xf32>
    %12 = arith.select %9, %7, %11 : vector<1x64x128xi1>, vector<1x64x128xf32>
    %c0_9 = arith.constant 0 : index
    %c0_10 = arith.constant 0 : index
    %c0_11 = arith.constant 0 : index
    %13 = vector.load %arg5[%c0_9, %c0_10, %c0_11] : memref<1x64x128xf32, #tpu.memory_space<vmem>>, vector<1x64x128xf32>
    tpu.vector_store %arg5[%c0_9, %c0_10, %c0_11], %12 {strides = array<i32>} : memref<1x64x128xf32, #tpu.memory_space<vmem>>, vector<1x64x128xf32>,
    return
  }
  func.func @transform_0(%arg0: i32, %arg1: i32) -> (i32, i32, i32) {
    %c0_i32 = arith.constant 0 : i32
    %c0_i32_0 = arith.constant 0 : i32
    return %arg0, %arg1, %c0_i32 : i32, i32, i32
  }
  func.func @transform_1(%arg0: i32, %arg1: i32) -> (i32, i32, i32) {
    %c0_i32 = arith.constant 0 : i32
    %c0_i32_0 = arith.constant 0 : i32
    %c0_i32_1 = arith.constant 0 : i32
    %c0_i32_2 = arith.constant 0 : i32
    return %c0_i32, %c0_i32_0, %c0_i32_1 : i32, i32, i32
  }
  func.func @transform_2(%arg0: i32, %arg1: i32) -> (i32, i32, i32) {
    %c0_i32 = arith.constant 0 : i32
    %c0_i32_0 = arith.constant 0 : i32
    %c0_i32_1 = arith.constant 0 : i32
    %c0_i32_2 = arith.constant 0 : i32
    return %c0_i32, %c0_i32_0, %c0_i32_1 : i32, i32, i32
  }
  func.func @transform_3(%arg0: i32, %arg1: i32) -> (i32, i32, i32) {
    %c0_i32 = arith.constant 0 : i32
    %c0_i32_0 = arith.constant 0 : i32
    return %arg0, %arg1, %c0_i32 : i32, i32, i32
  }
}

</mosaic_0001>

<bundles_post_ra>
// kernel: down_forward.5
= control target key start
LH: loop header
LB: loop body
LE: loop exit
PB: predicated region body
PF: predicated region fallthrough
CT: control target
= control target key end

     0   :  { %8 = vsyncpa [#allocation3], 0  ;;  %s733_s0 = inlined_call_operand.hbm [shape: bf16[2,64,128], index: 0, kind: input, shape index: {}]   ;;  %s734_s1 = inlined_call_operand.vmem [shape: f32[1,1,128], index: 1, kind: input, shape index: {}]   ;;  %s735_s2 = inlined_call_operand.vmem [shape: f32[1,1,128], index: 2, kind: input, shape index: {}]   ;;  %s736_s3 = inlined_call_operand.vmem [shape: f32[2,64,128], index: 3, kind: output, shape index: {}]  }
   0x1   :  { %10 = vsyncpa [#allocation3 + $0x1], 0  ;;  %s590_s12 = smov 0   ;;  %s592_s13 = smov 0  }
   0x2   :  { %s594_s14 = smov 0   ;;  %s596_s15 = smov 0  }
   0x3   :  { %s598_s16 = smov 0   ;;  %s600_s17 = smov 0  }
   0x4 LB: > { %s392_s18 = sadd.s32 4294967295, %s565_s17   ;;  %s28_s19 = sadd.s32 1, %s561_s16  ;;  %s565_s17 = sphi %s600_s17, %s16_s17   ;;  %s561_s16 = sphi %s598_s16, %s744_s16   ;;  %s557_s15 = sphi %s596_s15, %s743_s15   ;;  %s553_s14 = sphi %s594_s14, %s742_s14   ;;  %s549_s13 = sphi %s592_s13, %s741_s13   ;;  %s545_s12 = sphi %s590_s12, %s740_s12  }
   0x5   : > { %p30_p0 = scmp.ge.s32.totalorder %s28_s19, 2  ;;  %s37_s20 = sadd.s32 1, %s553_s14 }
   0x6   : > { %p44_p1 = scmp.ne.s32.totalorder %s553_s14, %s549_s13  ;;  %p45_p2 = scmp.eq.s32.totalorder %s565_s17, 0 }
   0x7   : > { %s746_s19 = smov (%p30_p0, %s28_s19), 0  ;;  %p50_p4 = scmp.ne.s32.totalorder %s549_s13, %s545_s12 }
   0x8   : > { %p626_p3 = por %p45_p2, %p44_p1  ;;  %s32_s22 = ssub.s32 %s561_s16, %s746_s19 }
   0x9   : > { %p51_p5 = scmp.eq.s32.totalorder %s392_s18, 0  ;;  %p35_p6 = scmp.eq.s32.totalorder %s32_s22, 0 }
   0xa   : > { %p434_p8 = scmp.lt.s32.totalorder %s565_s17, 2  ;;  %s150_s25 = sand.u32 1, %s553_s14  }
   0xb   : > { %p633_p7 = por %p51_p5, %p50_p4  ;;  %s407_s26 = sshll.u32 %s561_s16, 9 }
   0xc   : > { %s639_s24 = scalar_select %p35_p6, %s553_s14, %s37_s20  }
   0xd   : > { %s396_s27 = sshll.u32 %s150_s25, 5  ;;  %s646_s30 = scalar_lea.hbm %s733_s0, %s407_s26 }
   0xe   : > { %s154_s4 = scalar_lea.vmem [#allocation2], %s396_s27  ;;  %p650_p9 = pnand %p434_p8, %p626_p3 }
   0xf   : > { %s163_s5 = sshll.u32 %s154_s4, 4  ;;  %s656_s7 = scalar_lea.sflag [#allocation3], %s150_s25  ;;  %s654_s5 = int_to_ptr.vmem [resolvable:$true] %s163_s5 }
  0x10   : > { %s485_s8 = scalar_lea.hbm %s646_s30, 512  ;;  %p487_p11 = pneg %p650_p9 }
  0x11   : > { %p486_p10 = scmp.ne.s32.totalorder %s646_s30, %s485_s8  ;;  %s490_s11 = scalar_lea.hbm %s733_s0, 1024 }
  0x12   : > { %p491_p0 = scmp.lt.u32.totalorder %s646_s30, %s733_s0  ;;  %p492_p1 = scmp.lt.u32.totalorder %s490_s11, %s485_s8 }
  0x13   : > { %p488_p12 = pnand %p487_p11, %p486_p10  ;;  %p494_p3 = scmp.lt.u32.totalorder %s485_s8, %s646_s30 }
  0x14   : > { %p493_p2 = por %p492_p1, %p491_p0 }
  0x15   : > { %p489_p13 = pneg %p488_p12 }
  0x16   : > { %p495_p4 = por %p494_p3, %p493_p2 }
  0x18   : > { %p496_p5 = pnand %p495_p4, %p489_p13 }
  0x1a   : > { %499 = shalt.err (!%p496_p5)
}
  0x1b   : > { %s500_s20 = scalar_lea.vmem %s654_s5, 512  ;;  %s567_s21 = smov [#allocation2]  }
  0x1c   : > { %p501_p6 = scmp.ne.s32.totalorder %s654_s5, %s500_s20  ;;  %s505_s22 = sshll.u32 %s567_s21, 4  ;;  %s506_s22 = int_to_ptr.vmem [resolvable:$false] %s505_s22 }
  0x1d   : > { %s507_s25 = scalar_lea.vmem %s506_s22, 1024  ;;  %p508_p12 = scmp.lt.s32.totalorder %s654_s5, %s506_s22 }
  0x1e   : > { %p503_p8 = pnand %p501_p6, %p487_p11  ;;  %p509_p0 = scmp.lt.s32.totalorder %s507_s25, %s500_s20 }
  0x20   : > { %p504_p10 = pneg %p503_p8  ;;  %p510_p1 = por %p509_p0, %p508_p12 }
  0x22   : > { %p511_p2 = pnand %p510_p1, %p504_p10 }
  0x24   : > { %514 = shalt.err (!%p511_p2)
}
  0x25   : > { %s568_s26 = smov 64   ;;  %s569_s27 = smov 4  }
  0x26   : > { %433 = dma.hbm_to_vmem [thread:$0]  (!%p650_p9), %s646_s30, 512, %s654_s5, %s656_s7, %s568_s26, %s568_s26, %s569_s27  }
  0x27   : > { %p399_p11 = scmp.ge.s32.totalorder %s565_s17, 1  ;;  %p171_p13 = scmp.lt.s32.totalorder %s565_s17, 3 }
  0x29   : > { %p172_p3 = pnand %p399_p11, %p171_p13 }
  0x2a   : > { %s177_s28 = sand.u32 (!%p172_p3), 1, %s549_s13  }
  0x2b   : > { %175 = sbr.rel (%p172_p3) target bundleno = 67 (0x43), region = 32  ;;  %s400_s29 = sshll.u32 (!%p172_p3), %s177_s28, 5 }
  0x2c   : > { %s178_s4 = scalar_lea.sflag (!%p172_p3), [#allocation3], %s177_s28  ;;  %s181_s8 = scalar_lea.vmem (!%p172_p3), [#allocation2], %s400_s29 }
  0x32   : > { %540 = dma.done.wait (%p633_p7), %s178_s4, 512  }
  0x33   : > { %542 = vsyncadd (%p633_p7), %s178_s4, 4294966784  ;;  %p210_p4 = scmp.lt.s32.totalorder %s557_s15, 1  ;;  %v410_v0 = vld [vmem:[%s181_s8] sm:$0xff]   ;;  %v425_v4 = vld [vmem:[%s181_s8 + $0x8] sm:$0xff]  }
  0x34   : > { %v403_v1 = vld [vmem:[%s734_s1] ss:$0 sm:$0xff]  ;;  %v411_v2 = vunpack.c.l.bf16 %v410_v0  ;;  %v412_v3 = vunpack.c.h.bf16 %v410_v0  ;;  %v426_v5 = vld [vmem:[%s181_s8 + $0x10] sm:$0xff]   ;;  %v427_v6 = vld [vmem:[%s181_s8 + $0x18] sm:$0xff]   ;;  %v415_v8 = vunpack.c.l.bf16 %v425_v4  ;;  %v416_v9 = vunpack.c.h.bf16 %v425_v4 }
  0x35   : > { %s748_s15 = smov (!%p210_p4, %s557_s15), 1  ;;  %v404_v7 = vld [vmem:[%s735_s2] ss:$0 sm:$0xff]  ;;  %v419_v10 = vunpack.c.l.bf16 %v426_v5  ;;  %v420_v11 = vunpack.c.h.bf16 %v426_v5  ;;  %v423_v14 = vunpack.c.l.bf16 %v427_v6  ;;  %v424_v15 = vunpack.c.h.bf16 %v427_v6 }
  0x36   : > { %v242_v12 = vmul.f32 %v411_v2, %v403_v1  ;;  %v243_v13 = vmul.f32 %v412_v3, %v403_v1  ;;  %s408_s23 = sshll.u32 %s748_s15, 6  ;;  %v244_v16 = vmul.f32 %v415_v8, %v403_v1  ;;  %v245_v17 = vmul.f32 %v416_v9, %v403_v1 }
  0x37   : > { %v246_v18 = vmul.f32 %v419_v10, %v403_v1  ;;  %v247_v19 = vmul.f32 %v420_v11, %v403_v1  ;;  %v248_v22 = vmul.f32 %v423_v14, %v403_v1  ;;  %v249_v23 = vmul.f32 %v424_v15, %v403_v1  ;;  %s705_s11 = scalar_lea.vmem %s736_s3, %s408_s23 }
  0x38   : > { %v257_v20 = vadd.f32 %v404_v7, %v242_v12  ;;  %v258_v21 = vadd.f32 %v404_v7, %v243_v13  ;;  %v259_v24 = vadd.f32 %v404_v7, %v244_v16  ;;  %v260_v25 = vadd.f32 %v404_v7, %v245_v17 }
  0x39   : > { %v261_v26 = vadd.f32 %v404_v7, %v246_v18  ;;  %v262_v27 = vadd.f32 %v404_v7, %v247_v19  ;;  %v263_v39 = vadd.f32 %v404_v7, %v248_v22  ;;  %v264_v40 = vadd.f32 %v404_v7, %v249_v23 }
  0x3a   : > { %vm265_vm0 = vcmp.ge.f32.partialorder %v257_v20, 0.0  ;;  %v273_v28 = vmul.f32 0.01, %v257_v20  ;;  %vm266_vm1 = vcmp.ge.f32.partialorder %v258_v21, 0.0  ;;  %v274_v29 = vmul.f32 0.01, %v258_v21 }
  0x3b   : > { %vm267_vm2 = vcmp.ge.f32.partialorder %v259_v24, 0.0  ;;  %v275_v30 = vmul.f32 0.01, %v259_v24  ;;  %vm268_vm3 = vcmp.ge.f32.partialorder %v260_v25, 0.0  ;;  %v276_v31 = vmul.f32 0.01, %v260_v25 }
  0x3c   : > { %v281_v32 = vsel %vm265_vm0, %v257_v20, %v273_v28  ;;  %v282_v33 = vsel %vm266_vm1, %v258_v21, %v274_v29  ;;  %vm269_vm4 = vcmp.ge.f32.partialorder %v261_v26, 0.0  ;;  %v277_v34 = vmul.f32 0.01, %v261_v26 }
  0x3d   : > { %289 = vst [vmem:[%s705_s11] sm:$0xff] %v281_v32  ;;  %290 = vst [vmem:[%s705_s11 + $0x8] sm:$0xff] %v282_v33  ;;  %v283_v35 = vsel %vm267_vm2, %v259_v24, %v275_v30  ;;  %v284_v36 = vsel %vm268_vm3, %v260_v25, %v276_v31  ;;  %vm270_vm5 = vcmp.ge.f32.partialorder %v262_v27, 0.0  ;;  %v278_v37 = vmul.f32 0.01, %v262_v27 }
  0x3e   : > { %291 = vst [vmem:[%s705_s11 + $0x10] sm:$0xff] %v283_v35  ;;  %292 = vst [vmem:[%s705_s11 + $0x18] sm:$0xff] %v284_v36  ;;  %v285_v38 = vsel %vm269_vm4, %v261_v26, %v277_v34  ;;  %vm271_vm6 = vcmp.ge.f32.partialorder %v263_v39, 0.0  ;;  %v279_v42 = vmul.f32 0.01, %v263_v39  ;;  %vm272_vm7 = vcmp.ge.f32.partialorder %v264_v40, 0.0 }
  0x3f   : > { %293 = vst [vmem:[%s705_s11 + $0x20] sm:$0xff] %v285_v38  ;;  %v286_v41 = vsel %vm270_vm5, %v262_v27, %v278_v37  ;;  %v280_v43 = vmul.f32 0.01, %v264_v40 }
  0x40   : > { %294 = vst [vmem:[%s705_s11 + $0x28] sm:$0xff] %v286_v41  ;;  %v287_v44 = vsel %vm271_vm6, %v263_v39, %v279_v42 }
  0x41   : > { %v288_v45 = vsel %vm272_vm7, %v264_v40, %v280_v43  ;;  %295 = vst [vmem:[%s705_s11 + $0x30] sm:$0xff] %v287_v44 }
  0x42   : > { %296 = vst [vmem:[%s705_s11 + $0x38] sm:$0xff] %v288_v45 }
  0x43 PF: > { %s16_s17 = sadd.s32 1, %s565_s17   ;;  %s740_s12 = smov %s549_s13 }
  0x44   : > { %p13_p7 = scmp.ge.s32.totalorder %s16_s17, 4   ;;  %s741_s13 = smov %s553_s14 }
  0x45   : > { %s742_s14 = smov %s639_s24  ;;  %s743_s15 = smov %s561_s16 }
  0x46   : > { %s744_s16 = smov %s746_s19  ;;  %15 = sbr.rel (!%p13_p7) target bundleno = 4 (0x4), region = 72 }
  0x4d   :  { %327 = vsyncpa [#allocation3], 1 }
  0x4e   :  { %329 = vsyncpa [#allocation3 + $0x1], 1 }

// kernel: down_forward.3
= control target key start
LH: loop header
LB: loop body
LE: loop exit
PB: predicated region body
PF: predicated region fallthrough
CT: control target
= control target key end

     0   :  { %9 = vsyncpa [#allocation4], 0  ;;  %s2568_s0 = inlined_call_operand.hbm [shape: bf16[2,10,10,4], index: 0, kind: input, shape index: {}]   ;;  %s2569_s1 = inlined_call_operand.hbm [shape: bf16[36,128], index: 1, kind: input, shape index: {}]   ;;  %s2570_s2 = inlined_call_operand.hbm [shape: bf16[2,64,128], index: 2, kind: output, shape index: {0}]   ;;  %s2571_s3 = inlined_call_operand.hbm [shape: f32[2,1,8,128], index: 3, kind: output, shape index: {1}]  }
   0x1   :  { %11 = vsyncpa [#allocation4 + $0x1], 0 }
   0x2   :  { %12 = vsyncpa [#allocation7], 0 }
   0x3   :  { %13 = vsyncpa [#allocation5], 0 }
   0x4   :  { %15 = vsyncpa [#allocation5 + $0x1], 0 }
   0x5   :  { %16 = vsyncpa [#allocation10], 0 }
   0x6   :  { %18 = vsyncpa [#allocation10 + $0x1], 0  ;;  %s1890_s12 = smov 0   ;;  %s1892_s13 = smov 0  }
   0x7   :  { %s1894_s14 = smov 0   ;;  %s1896_s15 = smov 0  }
   0x8   :  { %s1898_s16 = smov 0   ;;  %s1900_s17 = smov 0  }
   0x9 LB: > { %s1388_s18 = sadd.s32 4294967295, %s1853_s17   ;;  %s1389_s19 = sadd.s32 4294967294, %s1853_s17   ;;  %s1853_s17 = sphi %s1900_s17, %s24_s17   ;;  %s1849_s16 = sphi %s1898_s16, %s2598_s16   ;;  %s1845_s15 = sphi %s1896_s15, %s2597_s15   ;;  %s1841_s14 = sphi %s1894_s14, %s2596_s14   ;;  %s1837_s13 = sphi %s1892_s13, %s2595_s13   ;;  %s1833_s12 = sphi %s1890_s12, %s2594_s12  }
   0xa   : > { %p56_p0 = scmp.ne.s32.totalorder %s1837_s13, %s1833_s12  ;;  %p1924_p1 = scmp.eq.s32.totalorder %s1388_s18, 0 }
   0xb   : > { %p1928_p2 = scmp.eq.s32.totalorder %s1388_s18, 1  ;;  %p109_p3 = scmp.eq.s32.totalorder %s1389_s19, 1 }
   0xc   : > { %s2576_s20 = scalar_select %p1924_p1, 1, 0 }
   0xd   : > { %s2577_s21 = scalar_select %p1928_p2, 1, 0 }
   0xe   : > { %p1934_p4 = por %p1924_p1, %p56_p0  ;;  %p1390_p5 = scmp.ge.s32.totalorder %s1853_s17, 1 }
   0xf   : > { %p1939_p6 = por %p109_p3, %p56_p0  ;;  %p144_p7 = scmp.lt.s32.totalorder %s1853_s17, 3 }
  0x10   : > { %s2578_s22 = scalar_select %p1934_p4, 1, 0 }
  0x11   : > { %s2579_s23 = scalar_select %p1939_p6, 1, 0 }
  0x12   : > { %p1944_p8 = pnand %p1390_p5, %p144_p7  ;;  %s1855_s25 = smov [#allocation6]  }
  0x13   : > { %s156_s26 = sshll.u32 %s1855_s25, 4  ;;  %s36_s28 = sadd.s32 1, %s1849_s16  ;;  %s157_s26 = int_to_ptr.vmem [resolvable:$true] %s156_s26 }
  0x14   : > { %s2580_s24 = scalar_select %p1944_p8, 1, 0 }
  0x15   : > { %p1586_p9 = pneg %p1944_p8  ;;  %s1677_s4 = scalar_lea.hbm %s2569_s1, 320 }
  0x16   : > { %p1678_p12 = scmp.ne.s32.totalorder %s2569_s1, %s1677_s4  ;;  %p1684_p5 = scmp.lt.u32.totalorder %s1677_s4, %s2569_s1 }
  0x17   : > { %p1953_p11 = pnand %p1586_p9, %p1924_p1 }
  0x19   : > { %p1679_p13 = pneg %p1953_p11 }
  0x1b   : > { %p1680_p0 = pnand %p1679_p13, %p1678_p12 }
  0x1d   : > { %p1681_p3 = pneg %p1680_p0 }
  0x1f   : > { %p1686_p7 = pnand %p1684_p5, %p1681_p3 }
  0x21   : > { %1689 = shalt.err (!%p1686_p7)
}
  0x22   : > { %s1690_s9 = scalar_lea.vmem %s157_s26, 320  ;;  %p1698_p1 = scmp.lt.s32.totalorder %s157_s26, %s157_s26 }
  0x23   : > { %p1691_p9 = scmp.ne.s32.totalorder %s157_s26, %s1690_s9  ;;  %p1699_p4 = scmp.lt.s32.totalorder %s1690_s9, %s1690_s9 }
  0x25   : > { %p1693_p10 = pnand %p1691_p9, %p1679_p13  ;;  %p1700_p8 = por %p1699_p4, %p1698_p1 }
  0x27   : > { %p1694_p6 = pneg %p1693_p10 }
  0x29   : > { %p1701_p2 = pnand %p1700_p8, %p1694_p6 }
  0x2b   : > { %1704 = shalt.err (!%p1701_p2)
}
  0x2c   : > { %s1856_s10 = smov 64   ;;  %s1857_s11 = smov 4  }
  0x2d   : > { %1589 = dma.hbm_to_vmem [thread:$0]  (!%p1953_p11), %s2569_s1, 320, %s157_s26, [#allocation7], %s1856_s10, %s1856_s10, %s1857_s11  }
  0x2e   : > { %p38_p1 = scmp.ge.s32.totalorder %s36_s28, 2  ;;  %s43_s25 = sadd.s32 1, %s1841_s14 }
  0x2f   : > { %p50_p2 = scmp.ne.s32.totalorder %s1841_s14, %s1837_s13  ;;  %p51_p4 = scmp.eq.s32.totalorder %s1853_s17, 0 }
  0x30   : > { %s2600_s28 = smov (%p38_p1, %s36_s28), 0  ;;  %p2582_p8 = scmp.ne.s32.totalorder %s2577_s21, 0 }
  0x31   : > { %p52_p6 = por %p51_p4, %p50_p2  ;;  %s40_s27 = ssub.s32 %s1849_s16, %s2600_s28 }
  0x32   : > { %p1985_p10 = por %p2582_p8, %p50_p2  ;;  %p1602_p12 = scmp.lt.s32.totalorder %s1853_s17, 2 }
  0x33   : > { %p41_p13 = scmp.eq.s32.totalorder %s40_s27, 0  ;;  %s170_s30 = sand.u32 1, %s1841_s14  }
  0x34   : > { %s1573_s4 = smul.u32 80, %s170_s30  ;;  %p1997_p11 = pnand %p1602_p12, %p52_p6 }
  0x35   : > { %s1994_s5 = scalar_select %p41_p13, %s1841_s14, %s43_s25  }
  0x36   : > { %s1574_s26 = smul.u32 1280, %s1849_s16  ;;  %s174_s6 = scalar_lea.vmem [#allocation3], %s1573_s4 }
  0x37   : > { %s181_s7 = sshll.u32 %s174_s6, 4  ;;  %s2008_s19 = scalar_lea.sflag [#allocation4], %s170_s30  ;;  %s2006_s7 = int_to_ptr.vmem [resolvable:$true] %s181_s7 }
  0x38   : > { %s2004_s18 = scalar_lea.hbm %s2568_s0, %s1574_s26  ;;  %p1707_p3 = pneg %p1997_p11 }
  0x39   : > { %s1705_s25 = scalar_lea.hbm %s2004_s18, 1280  ;;  %s1710_s26 = scalar_lea.hbm %s2568_s0, 2560 }
  0x3a   : > { %p1706_p0 = scmp.ne.s32.totalorder %s2004_s18, %s1705_s25  ;;  %p1711_p9 = scmp.lt.u32.totalorder %s2004_s18, %s2568_s0 }
  0x3b   : > { %p1712_p1 = scmp.lt.u32.totalorder %s1710_s26, %s1705_s25  ;;  %p1714_p4 = scmp.lt.u32.totalorder %s1705_s25, %s2004_s18 }
  0x3c   : > { %p1708_p5 = pnand %p1707_p3, %p1706_p0 }
  0x3d   : > { %p1713_p2 = por %p1712_p1, %p1711_p9 }
  0x3e   : > { %p1709_p7 = pneg %p1708_p5 }
  0x3f   : > { %p1715_p6 = por %p1714_p4, %p1713_p2 }
  0x41   : > { %p1716_p8 = pnand %p1715_p6, %p1709_p7 }
  0x43   : > { %1719 = shalt.err (!%p1716_p8)
}
  0x44   : > { %s1720_s30 = scalar_lea.vmem %s2006_s7, 1280  ;;  %s1858_s21 = smov [#allocation3]  }
  0x45   : > { %p1721_p12 = scmp.ne.s32.totalorder %s2006_s7, %s1720_s30  ;;  %s1725_s27 = sshll.u32 %s1858_s21, 4  ;;  %s1726_s27 = int_to_ptr.vmem [resolvable:$false] %s1725_s27 }
  0x46   : > { %s1727_s4 = scalar_lea.vmem %s1726_s27, 2560  ;;  %p1728_p5 = scmp.lt.s32.totalorder %s2006_s7, %s1726_s27 }
  0x47   : > { %p1723_p13 = pnand %p1721_p12, %p1707_p3  ;;  %p1729_p9 = scmp.lt.s32.totalorder %s1727_s4, %s1720_s30 }
  0x49   : > { %p1724_p0 = pneg %p1723_p13  ;;  %p1730_p1 = por %p1729_p9, %p1728_p5 }
  0x4b   : > { %p1731_p2 = pnand %p1730_p1, %p1724_p0 }
  0x4d   : > { %1734 = shalt.err (!%p1731_p2)
}
  0x4e   : > { %1593 = dma.hbm_to_vmem [thread:$0]  (!%p1997_p11), %s2004_s18, 1280, %s2006_s7, %s2008_s19, %s1856_s10, %s1856_s10, %s1857_s11  }
  0x4f   : > { %p2585_p3 = scmp.ne.s32.totalorder %s2580_s24, 0 }
  0x50   : > { %s2042_s25 = sand.u32 (!%p2585_p3), 1, %s1837_s13   ;;  %p2586_p7 = scmp.ne.s32.totalorder (!%p2585_p3), %s2578_s22, 0 }
  0x51   : > { %193 = sbr.rel (%p2585_p3) target bundleno = 564 (0x234), region = 28  ;;  %s196_s6 = scalar_lea.sflag (!%p2585_p3), [#allocation4], %s2042_s25 }
  0x52   : > { %s1575_s26 = smul.u32 (!%p2585_p3), 80, %s2042_s25 }
  0x54   : > { %s2046_s9 = scalar_lea.vmem (!%p2585_p3), [#allocation3], %s1575_s26 }
  0x58   : > { %1816 = dma.done.wait (%p2586_p7), %s196_s6, 1280  }
  0x59   : > { %1818 = vsyncadd (%p2586_p7), %s196_s6, 4294966016  ;;  %p2587_p11 = scmp.ne.s32.totalorder %s2576_s20, 0 }
  0x5b   : > { %1820 = dma.done.wait (%p2587_p11), [#allocation7], 320  }
  0x5c   : > { %1822 = vsyncadd (%p2587_p11), [#allocation7], 4294966976  ;;  %vm434_vm0 = vcmask 1042432   ;;  %vm435_vm1 = vcmask 1046532   ;;  %v2057_v0 = vld [vmem:[%s2046_s9 + $0x18] sm:$0xf] }
  0x5d   : > { %v2060_v1 = vld [vmem:[%s2046_s9 + $0x20] sm:$0xf]  ;;  %v1418_v2 = vld [vmem:[%s2046_s9 + $0x8] sm:$0xf]  ;;  %v584_v4 = vshrl.u32 %v2057_v0, 16  ;;  %v587_v5 = vshll.u32 %v2057_v0, 16  ;;  %vm2093_vm2 = vmor %vm434_vm0, %vm435_vm1 }
  0x5e   : > { %v1435_v3 = vcombine.low %v2057_v0, %v2060_v1  ;;  %v598_v6 = vshrl.u32 %v2060_v1, 16  ;;  %v1420_v7 = vld [vmem:[%s2046_s9 + $0x10] sm:$0xf]  ;;  %v601_v8 = vshll.u32 %v2060_v1, 16  ;;  %v556_v10 = vshrl.u32 %v1418_v2, 16  ;;  %s1859_s20 = smov 12  }
  0x5f   : > { %v1434_v9 = vcombine.low %v1418_v2, %v1420_v7  ;;  %v559_v11 = vshll.u32 %v1418_v2, 16  ;;  %v2071_v12 = vld [vmem:[%s2046_s9] sm:$0xf]  ;;  %v2073_v13 = vrot.slane %v584_v4, 4  ;;  %v2075_v14 = vrot.slane %v587_v5, 5  ;;  %s1860_s22 = smov 8  }
  0x60   : > { %v2077_v15 = vrot.slane %v598_v6, 4  ;;  %540 = vrot.lane.b32.xlu1 %v1435_v3, %s1859_s20  ;;  %v570_v16 = vshrl.u32 %v1420_v7, 16  ;;  %v238_v17 = vld [vmem:[%s2046_s9 + $0x4] sm:$0x1]  ;;  %v2081_v18 = vrot.slane %v601_v8, 5  ;;  %v2083_v19 = vrot.slane %v556_v10, 4 }
  0x61   : > { %v2085_v20 = vrot.slane %v559_v11, 5  ;;  %v573_v21 = vshll.u32 %v1420_v7, 16  ;;  %538 = vrot.lane.b32.xlu0 %v1434_v9, %s1859_s20  ;;  %v2089_v22 = vld [vmem:[%s2046_s9 + $0x8] sm:$0xf]  ;;  %vm282_vm3 = vsmask.f32 3328  ;;  %v590_v33 = vor.u32 %v2075_v14, %v2073_v13 }
  0x62   : > { %vm283_vm4 = vsmask.f32 7440  ;;  %v2097_v24 = vrot.slane %v570_v16, 4  ;;  %v240_v25 = vld [vmem:[%s2046_s9 + $0xc] sm:$0x1]  ;;  %v1406_v26 = vrot.slane %v2071_v12, 9  ;;  %v604_v34 = vor.u32 %v2081_v18, %v2077_v15 }
  0x63   : > { %v439_v27 = vrot.slane %v238_v17, 5  ;;  %v1407_v28 = vrot.slane %v2089_v22, 9  ;;  %v2102_v29 = vrot.slane %v573_v21, 5  ;;  %v443_v30 = vrot.slane %v240_v25, 5  ;;  %v2105_v31 = vld [vmem:[%s2046_s9 + $0xc] sm:$0x1]  ;;  %vm2152_vm5 = vmor %vm282_vm3, %vm283_vm4 }
  0x64   : > { %v2108_v32 = vld [vmem:[%s2046_s9 + $0x14] sm:$0x1]  ;;  %v1442_v36 = vrot.slane %v1418_v2, 9  ;;  %v706_v37 = vrot.slane %v2105_v31, 5  ;;  %v1443_v38 = vrot.slane %v1420_v7, 9  ;;  %v562_v45 = vor.u32 %v2085_v20, %v2083_v19  ;;  %s1861_s24 = smov 20  }
  0x65   : > { %v440_v35 = vsel %vm2093_vm2, %v1406_v26, %v439_v27  ;;  %v2118_v39 = vld [vmem:[%s2046_s9 + $0x10] sm:$0xf]  ;;  %v444_v40 = vsel %vm2093_vm2, %v1407_v28, %v443_v30  ;;  %v710_v41 = vrot.slane %v2108_v32, 5  ;;  %v242_v42 = vld [vmem:[%s2046_s9 + $0x14] sm:$0x1]  ;;  %v286_v53 = vshrl.u32 %v2071_v12, 16 }
  0x66   : > { %v2125_v43 = vld [vmem:[%s2046_s9 + $0x18] sm:$0xf]  ;;  %v1408_v44 = vrot.slane %v2118_v39, 9  ;;  %v1414_v46 = vcombine.low %v440_v35, %v444_v40  ;;  %v707_v47 = vsel %vm2093_vm2, %v1442_v36, %v706_v37  ;;  %v244_v48 = vld [vmem:[%s2046_s9 + $0x1c] sm:$0x1]  ;;  %v447_v49 = vrot.slane %v242_v42, 5 }
  0x67   : > { %v1409_v50 = vrot.slane %v2125_v43, 9  ;;  %v711_v51 = vsel %vm2093_vm2, %v1443_v38, %v710_v41  ;;  %v451_v52 = vrot.slane %v244_v48, 5  ;;  %v289_v54 = vshll.u32 %v2071_v12, 16  ;;  %v1423_v59 = vld [vmem:[%s2046_s9 + $0x1c] sm:$0x1]  ;;  %s1862_s10 = smov 4  }
  0x68   : > { %481 = vrot.lane.b32.xlu1 %v1414_v46, %s1860_s22  ;;  %v1450_v55 = vcombine.low %v707_v47, %v711_v51  ;;  %v448_v56 = vsel %vm2093_vm2, %v1408_v44, %v447_v49  ;;  %v295_v57 = vshll.u32 %v238_v17, 16  ;;  %v300_v58 = vshrl.u32 %v2089_v22, 16  ;;  %v1425_v2 = vld [vmem:[%s2046_s9 + $0x24] sm:$0x1]  ;;  %v2185_v18 = vld [vmem:[%s2046_s9 + $0x10] sm:$0xf] }
  0x69   : > { %v452_v60 = vsel %vm2093_vm2, %v1409_v50, %v451_v52  ;;  %v288_v61 = vrot.slane %v286_v53, 4  ;;  %v291_v62 = vrot.slane %v289_v54, 5  ;;  %v303_v63 = vshll.u32 %v2089_v22, 16  ;;  %s1863_s11 = smov 16   ;;  %s1864_s7 = smov 24  }
  0x6a   : > { %748 = vrot.lane.b32.xlu0 %v1450_v55, %s1861_s24  ;;  %v1415_v3 = vcombine.low %v448_v56, %v452_v60  ;;  %v297_v4 = vrot.slane %v295_v57, 5  ;;  %v302_v5 = vrot.slane %v300_v58, 4  ;;  %v309_v6 = vshll.u32 %v240_v25, 16  ;;  %s1865_s8 = smov 28   ;;  %s1866_s18 = smov 32  }
  0x6b   : > { %v292_v7 = vor.u32 %v291_v62, %v288_v61  ;;  %v305_v8 = vrot.slane %v303_v63, 5  ;;  %v1444_v9 = vrot.slane %v2057_v0, 9  ;;  %v714_v10 = vrot.slane %v1423_v59, 5  ;;  %v2197_v61 = vld [vmem:[%s2046_s9 + $0x20] sm:$0xf]  ;;  %s1396_s19 = sshll.u32 %s2042_s25, 5 }
  0x6c   : > { %483 = vrot.lane.b32.xlu1 %v1415_v3, %s1860_s22  ;;  %v311_v16 = vrot.slane %v309_v6, 5  ;;  %v1445_v17 = vrot.slane %v2060_v1, 9  ;;  %v718_v21 = vrot.slane %v1425_v2, 5  ;;  %v314_v26 = vshrl.u32 %v2118_v39, 16  ;;  %s223_s30 = scalar_lea.vmem [#allocation8], %s1396_s19  ;;  %s1520_s27 = sshll.u32 %s1845_s15, 9 }
  0x6d   : > { %v293_v25 = vrot.slane %v292_v7, 4  ;;  %v306_v27 = vor.u32 %v305_v8, %v302_v5  ;;  %v715_v0 = vsel %vm2093_vm2, %v1444_v9, %v714_v10  ;;  %v317_v28 = vshll.u32 %v2118_v39, 16  ;;  %v1455_v9 = vld [vmem:[%s2046_s9 + $0x14] sm:$0x1]  ;;  %s1237_s21 = sshll.u32 %s223_s30, 4  ;;  %s2486_s6 = scalar_lea.hbm %s2570_s2, %s1520_s27  ;;  %s2481_s21 = int_to_ptr.vmem [resolvable:$true] %s1237_s21 }
  0x6e   : > { %v719_v30 = vsel %vm2093_vm2, %v1445_v17, %v718_v21  ;;  %v316_v35 = vrot.slane %v314_v26, 4  ;;  %v323_v36 = vshll.u32 %v242_v42, 16  ;;  %v328_v37 = vshrl.u32 %v2125_v43, 16  ;;  %v1457_v26 = vld [vmem:[%s2046_s9 + $0x1c] sm:$0x1] }
  0x6f   : > { %v298_v1 = vsel %vm2152_vm5, %v293_v25, %v297_v4  ;;  %v307_v38 = vrot.slane %v306_v27, 4  ;;  %v1451_v40 = vcombine.low %v715_v0, %v719_v30  ;;  %v319_v41 = vrot.slane %v317_v28, 5  ;;  %v2205_v4 = vld [vmem:[%s2046_s9 + $0x28] sm:$0xf]  ;;  %v2224_v30 = vld [vmem:[%s2046_s9 + $0x24] sm:$0x1] }
  0x70   : > { %v325_v44 = vrot.slane %v323_v36, 5  ;;  %v330_v46 = vrot.slane %v328_v37, 4  ;;  %v331_v47 = vshll.u32 %v2125_v43, 16  ;;  %v337_v49 = vshll.u32 %v244_v48, 16 }
  0x71   : > { %v312_v50 = vsel %vm2152_vm5, %v307_v38, %v311_v16  ;;  %750 = vrot.lane.b32.xlu1 %v1451_v40, %s1861_s24  ;;  %v320_v51 = vor.u32 %v319_v41, %v316_v35  ;;  %v591_v42 = vrot.slane %v590_v33, 4  ;;  %v593_v52 = vshll.u32 %v1423_v59, 16  ;;  %v2228_v41 = vld [vmem:[%s2046_s9 + $0x2c] sm:$0x1] }
  0x72   : > { %v1402_v53 = vcombine.low %v298_v1, %v312_v50  ;;  %v333_v54 = vrot.slane %v331_v47, 5  ;;  %v339_v55 = vrot.slane %v337_v49, 5  ;;  %v605_v48 = vrot.slane %v604_v34, 4  ;;  %v2188_v34 = vld [vmem:[%s2046_s9 + $0x18] sm:$0xf] }
  0x73   : > { %v321_v56 = vrot.slane %v320_v51, 4  ;;  %v595_v57 = vrot.slane %v593_v52, 5  ;;  %v607_v58 = vshll.u32 %v1425_v2, 16  ;;  %v563_v60 = vrot.slane %v562_v45, 4 }
  0x74   : > { %409 = vrot.lane.b32.xlu0 %v1402_v53, %s1862_s10  ;;  %v334_v13 = vor.u32 %v333_v54, %v330_v46  ;;  %v565_v14 = vshll.u32 %v2105_v31, 16  ;;  %v576_v33 = vor.u32 %v2102_v29, %v2097_v24  ;;  %v579_v15 = vshll.u32 %v2108_v32, 16 }
  0x75   : > { %v326_v19 = vsel %vm2152_vm5, %v321_v56, %v325_v44  ;;  %v596_v20 = vsel %vm2152_vm5, %v591_v42, %v595_v57  ;;  %v609_v45 = vrot.slane %v607_v58, 5  ;;  %v1470_v31 = vcombine.low %v2185_v18, %v2188_v34 }
  0x76   : > { %v335_v59 = vrot.slane %v334_v13, 4  ;;  %v567_v24 = vrot.slane %v565_v14, 5  ;;  %v577_v29 = vrot.slane %v576_v33, 4  ;;  %v581_v32 = vrot.slane %v579_v15, 5  ;;  %v2242_v13 = vld [vmem:[%s2046_s9 + $0x28] sm:$0xf] }
  0x77   : > { %v610_v62 = vsel %vm2152_vm5, %v605_v48, %v609_v45  ;;  %v823_v63 = vshrl.u32 %v2185_v18, 16  ;;  %v826_v2 = vshll.u32 %v2185_v18, 16  ;;  %v837_v3 = vshrl.u32 %v2188_v34, 16 }
  0x78   : > { %v340_v5 = vsel %vm2152_vm5, %v335_v59, %v339_v55  ;;  %v1439_v6 = vcombine.low %v596_v20, %v610_v62  ;;  %v568_v7 = vsel %vm2152_vm5, %v563_v60, %v567_v24  ;;  %v582_v8 = vsel %vm2152_vm5, %v577_v29, %v581_v32  ;;  %v2233_v55 = vld [vmem:[%s2046_s9 + $0x20] sm:$0xf]  ;;  %v2239_v60 = vld [vmem:[%s2046_s9 + $0x24] sm:$0x1] }
  0x79   : > { %v1403_v10 = vcombine.low %v326_v19, %v340_v5  ;;  %v1438_v16 = vcombine.low %v568_v7, %v582_v8  ;;  %v840_v17 = vshll.u32 %v2188_v34, 16  ;;  %v1471_v21 = vcombine.low %v2197_v61, %v2205_v4  ;;  %v1674_v20 = vld [vmem:[#allocation6] sm:$0xff]  }
  0x7a   : > { %681 = vrot.lane.b32.xlu1 %v1439_v6, %s1863_s11  ;;  %v851_v25 = vshrl.u32 %v2197_v61, 16  ;;  %v854_v27 = vshll.u32 %v2197_v61, 16  ;;  %v865_v0 = vshrl.u32 %v2205_v4, 16  ;;  %v868_v28 = vshll.u32 %v2205_v4, 16  ;;  %1551 = vmatprep.subr.bf16.mxu0 %v1674_v20  ;;  %v2260_v6 = vld [vmem:[%s2046_s9 + $0x2c] sm:$0x1] }
  0x7b   : > { %411 = vrot.lane.b32.xlu0 %v1403_v10, %s1862_s10  ;;  %v825_v35 = vrot.slane %v823_v63, 4  ;;  %v828_v36 = vrot.slane %v826_v2, 5  ;;  %v832_v37 = vshll.u32 %v1455_v9, 16  ;;  %v839_v1 = vrot.slane %v837_v3, 4  ;;  %1565 = vmatprep.subr.bf16.mxu1 %v1674_v20 }
  0x7c   : > { %v842_v38 = vrot.slane %v840_v17, 5  ;;  %v846_v40 = vshll.u32 %v1457_v26, 16  ;;  %v853_v44 = vrot.slane %v851_v25, 4  ;;  %v856_v46 = vrot.slane %v854_v27, 5  ;;  %1552 = vmatpush3.bf16.msra.mxu0 %v1674_v20  ;;  %1568 = vmatpush3.bf16.msra.mxu1 %v1674_v20  ;;  %v2270_v25 = vld [vmem:[%s2046_s9 + $0x30] sm:$0xf] }
  0x7d   : > { %v829_v47 = vor.u32 %v828_v36, %v825_v35  ;;  %v834_v49 = vrot.slane %v832_v37, 5  ;;  %v860_v50 = vshll.u32 %v2224_v30, 16  ;;  %v867_v51 = vrot.slane %v865_v0, 4  ;;  %v250_v36 = vld [vmem:[%s2046_s9 + $0x34] sm:$0x1] }
  0x7e   : > { %807 = vrot.lane.b32.xlu1 %v1471_v21, %s1864_s7  ;;  %v843_v42 = vor.u32 %v842_v38, %v839_v1  ;;  %v848_v52 = vrot.slane %v846_v40, 5  ;;  %v857_v53 = vor.u32 %v856_v46, %v853_v44  ;;  %v870_v54 = vrot.slane %v868_v28, 5  ;;  %v2280_v44 = vld [vmem:[%s2046_s9 + $0x38] sm:$0xf] }
  0x7f   : > { %679 = vrot.lane.b32.xlu0 %v1438_v16, %s1863_s11  ;;  %v830_v48 = vrot.slane %v829_v47, 4  ;;  %v862_v56 = vrot.slane %v860_v50, 5  ;;  %v874_v57 = vshll.u32 %v2228_v41, 16  ;;  %v1478_v58 = vrot.slane %v2185_v18, 9 }
  0x80   : > { %v844_v14 = vrot.slane %v843_v42, 4  ;;  %v858_v33 = vrot.slane %v857_v53, 4  ;;  %v871_v15 = vor.u32 %v870_v54, %v867_v51  ;;  %v973_v19 = vrot.slane %v1455_v9, 5  ;;  %v1675_v9 = vld [vmem:[#allocation6 + $0x8] sm:$0xff]  }
  0x81   : > { %v835_v45 = vsel %vm2152_vm5, %v830_v48, %v834_v49  ;;  %v876_v59 = vrot.slane %v874_v57, 5  ;;  %v1479_v24 = vrot.slane %v2188_v34, 9  ;;  %v977_v29 = vrot.slane %v1457_v26, 5  ;;  %1553 = vmatprep.subr.bf16.mxu0 %v1675_v9  ;;  %1566 = vmatprep.subr.bf16.mxu1 %v1675_v9 }
  0x82   : > { %v849_v32 = vsel %vm2152_vm5, %v844_v14, %v848_v52  ;;  %v863_v62 = vsel %vm2152_vm5, %v858_v33, %v862_v56  ;;  %v872_v63 = vrot.slane %v871_v15, 4  ;;  %v974_v2 = vsel %vm2093_vm2, %v1478_v58, %v973_v19  ;;  %1554 = vmatpush3.bf16.msra.mxu0 %v1675_v9  ;;  %1569 = vmatpush3.bf16.msra.mxu1 %v1675_v9  ;;  %v252_v52 = vld [vmem:[%s2046_s9 + $0x3c] sm:$0x1] }
  0x83   : > { %805 = vrot.lane.b32.xlu0 %v1470_v31, %s1864_s7  ;;  %v1474_v3 = vcombine.low %v835_v45, %v849_v32  ;;  %v978_v5 = vsel %vm2093_vm2, %v1479_v24, %v977_v29  ;;  %v342_v7 = vshrl.u32 %v2233_v55, 16  ;;  %v345_v8 = vshll.u32 %v2233_v55, 16 }
  0x84   : > { %v877_v10 = vsel %vm2152_vm5, %v872_v63, %v876_v59  ;;  %v1486_v16 = vcombine.low %v974_v2, %v978_v5  ;;  %v351_v18 = vshll.u32 %v2239_v60, 16  ;;  %v356_v34 = vshrl.u32 %v2242_v13, 16  ;;  %v2301_v2 = vld [vmem:[%s2046_s9 + $0x28] sm:$0xf] }
  0x85   : > { %v1475_v31 = vcombine.low %v863_v62, %v877_v10  ;;  %v344_v17 = vrot.slane %v342_v7, 4  ;;  %v347_v21 = vrot.slane %v345_v8, 5  ;;  %v359_v26 = vshll.u32 %v2242_v13, 16 }
  0x86   : > { %v353_v27 = vrot.slane %v351_v18, 5  ;;  %v358_v0 = vrot.slane %v356_v34, 4  ;;  %v365_v28 = vshll.u32 %v2260_v6, 16  ;;  %v1480_v35 = vrot.slane %v2197_v61, 9  ;;  %v2313_v18 = vld [vmem:[%s2046_s9 + $0x30] sm:$0xf] }
  0x87   : > { %946 = vrot.lane.b32.xlu0 %v1474_v3, %s1865_s8  ;;  %948 = vrot.lane.b32.xlu1 %v1475_v31, %s1865_s8  ;;  %v348_v37 = vor.u32 %v347_v21, %v344_v17  ;;  %v361_v1 = vrot.slane %v359_v26, 5  ;;  %v981_v38 = vrot.slane %v2224_v30, 5  ;;  %v1481_v40 = vrot.slane %v2205_v4, 9  ;;  %v2323_v21 = vld [vmem:[%s2046_s9 + $0x38] sm:$0xf] }
  0x88   : > { %v367_v46 = vrot.slane %v365_v28, 5  ;;  %v985_v47 = vrot.slane %v2228_v41, 5  ;;  %v370_v61 = vshrl.u32 %v2270_v25, 16  ;;  %v373_v49 = vshll.u32 %v2270_v25, 16  ;;  %v2326_v26 = vld [vmem:[%s2046_s9 + $0x40] sm:$0xf] }
  0x89   : > { %v349_v50 = vrot.slane %v348_v37, 4  ;;  %v362_v51 = vor.u32 %v361_v1, %v358_v0  ;;  %v982_v42 = vsel %vm2093_vm2, %v1480_v35, %v981_v38  ;;  %v379_v30 = vshll.u32 %v250_v36, 16 }
  0x8a   : > { %v986_v4 = vsel %vm2093_vm2, %v1481_v40, %v985_v47  ;;  %v372_v53 = vrot.slane %v370_v61, 4  ;;  %v375_v54 = vrot.slane %v373_v49, 5  ;;  %v384_v41 = vshrl.u32 %v2280_v44, 16  ;;  %v1427_v40 = vld [vmem:[%s2046_s9 + $0x2c] sm:$0x1] }
  0x8b   : > { %1015 = vrot.lane.b32.xlu0 %v1486_v16, %s1866_s18  ;;  %v354_v48 = vsel %vm2152_vm5, %v349_v50, %v353_v27  ;;  %v363_v56 = vrot.slane %v362_v51, 4  ;;  %v1487_v57 = vcombine.low %v982_v42, %v986_v4  ;;  %v381_v58 = vrot.slane %v379_v30, 5  ;;  %v1431_v51 = vld [vmem:[%s2046_s9 + $0x3c] sm:$0x1] }
  0x8c   : > { %v376_v14 = vor.u32 %v375_v54, %v372_v53  ;;  %v386_v33 = vrot.slane %v384_v41, 4  ;;  %v387_v15 = vshll.u32 %v2280_v44, 16  ;;  %v393_v19 = vshll.u32 %v252_v52, 16 }
  0x8d   : > { %v368_v20 = vsel %vm2152_vm5, %v363_v56, %v367_v46  ;;  %v1410_v45 = vrot.slane %v2233_v55, 9  ;;  %v455_v59 = vrot.slane %v2239_v60, 5  ;;  %v1411_v24 = vrot.slane %v2242_v13, 9  ;;  %v1429_v46 = vld [vmem:[%s2046_s9 + $0x34] sm:$0x1] }
  0x8e   : > { %v1404_v29 = vcombine.low %v354_v48, %v368_v20  ;;  %v377_v32 = vrot.slane %v376_v14, 4  ;;  %v389_v62 = vrot.slane %v387_v15, 5  ;;  %v395_v63 = vrot.slane %v393_v19, 5 }
  0x8f   : > { %1017 = vrot.lane.b32.xlu0 %v1487_v57, %s1866_s18  ;;  %v456_v3 = vsel %vm2093_vm2, %v1410_v45, %v455_v59  ;;  %v459_v5 = vrot.slane %v2260_v6, 5  ;;  %v1412_v60 = vrot.slane %v2270_v25, 9  ;;  %v463_v7 = vrot.slane %v250_v36, 5  ;;  %v1433_v57 = vld [vmem:[%s2046_s9 + $0x44] sm:$0x1] }
  0x90   : > { %413 = vrot.lane.b32.xlu1 %v1404_v29, %s1862_s10  ;;  %v382_v8 = vsel %vm2152_vm5, %v377_v32, %v381_v58  ;;  %v390_v9 = vor.u32 %v389_v62, %v386_v33  ;;  %v1413_v10 = vrot.slane %v2280_v44, 9  ;;  %v467_v16 = vrot.slane %v252_v52, 5 }
  0x91   : > { %v460_v34 = vsel %vm2093_vm2, %v1411_v24, %v459_v5  ;;  %v464_v6 = vsel %vm2093_vm2, %v1412_v60, %v463_v7  ;;  %v1436_v31 = vcombine.low %v2301_v2, %v2313_v18  ;;  %v612_v17 = vshrl.u32 %v2301_v2, 16 }
  0x92   : > { %v391_v27 = vrot.slane %v390_v9, 4  ;;  %v1416_v0 = vcombine.low %v456_v3, %v460_v34  ;;  %v468_v28 = vsel %vm2093_vm2, %v1413_v10, %v467_v16  ;;  %v615_v35 = vshll.u32 %v2301_v2, 16 }
  0x93   : > { %v1417_v36 = vcombine.low %v464_v6, %v468_v28  ;;  %v626_v37 = vshrl.u32 %v2313_v18, 16  ;;  %v629_v1 = vshll.u32 %v2313_v18, 16  ;;  %v1437_v38 = vcombine.low %v2323_v21, %v2326_v26 }
  0x94   : > { %v396_v47 = vsel %vm2152_vm5, %v391_v27, %v395_v63  ;;  %485 = vrot.lane.b32.xlu0 %v1416_v0, %s1860_s22  ;;  %v640_v61 = vshrl.u32 %v2323_v21, 16  ;;  %v643_v49 = vshll.u32 %v2323_v21, 16  ;;  %v654_v50 = vshrl.u32 %v2326_v26, 16 }
  0x95   : > { %v1405_v42 = vcombine.low %v382_v8, %v396_v47  ;;  %v657_v52 = vshll.u32 %v2326_v26, 16  ;;  %v614_v30 = vrot.slane %v612_v17, 4  ;;  %v617_v4 = vrot.slane %v615_v35, 5  ;;  %v2377_v47 = vld [vmem:[%s2046_s9 + $0x40] sm:$0xf] }
  0x96   : > { %v621_v53 = vshll.u32 %v1427_v40, 16  ;;  %v628_v54 = vrot.slane %v626_v37, 4  ;;  %v631_v41 = vrot.slane %v629_v1, 5  ;;  %v635_v48 = vshll.u32 %v1429_v46, 16  ;;  %v2367_v37 = vld [vmem:[%s2046_s9 + $0x38] sm:$0xf] }
  0x97   : > { %415 = vrot.lane.b32.xlu1 %v1405_v42, %s1862_s10  ;;  %v618_v56 = vor.u32 %v617_v4, %v614_v30  ;;  %v642_v58 = vrot.slane %v640_v61, 4  ;;  %v645_v14 = vrot.slane %v643_v49, 5  ;;  %v649_v33 = vshll.u32 %v1431_v51, 16 }
  0x98   : > { %542 = vrot.lane.b32.xlu0 %v1436_v31, %s1859_s20  ;;  %v623_v15 = vrot.slane %v621_v53, 5  ;;  %v632_v19 = vor.u32 %v631_v41, %v628_v54  ;;  %v637_v20 = vrot.slane %v635_v48, 5  ;;  %v656_v45 = vrot.slane %v654_v50, 4  ;;  %v1465_v53 = vld [vmem:[%s2046_s9 + $0x3c] sm:$0x1] }
  0x99   : > { %v619_v59 = vrot.slane %v618_v56, 4  ;;  %v646_v24 = vor.u32 %v645_v14, %v642_v58  ;;  %v651_v29 = vrot.slane %v649_v33, 5  ;;  %v659_v32 = vrot.slane %v657_v52, 5 }
  0x9a   : > { %v633_v62 = vrot.slane %v632_v19, 4  ;;  %v663_v63 = vshll.u32 %v1433_v57, 16  ;;  %v1446_v3 = vrot.slane %v2301_v2, 9  ;;  %v722_v5 = vrot.slane %v1427_v40, 5  ;;  %v2358_v2 = vld [vmem:[%s2046_s9 + $0x30] sm:$0xf] }
  0x9b   : > { %487 = vrot.lane.b32.xlu1 %v1417_v36, %s1860_s22  ;;  %v624_v60 = vsel %vm2152_vm5, %v619_v59, %v623_v15  ;;  %v647_v7 = vrot.slane %v646_v24, 4  ;;  %v660_v8 = vor.u32 %v659_v32, %v656_v45  ;;  %v1447_v9 = vrot.slane %v2313_v18, 9  ;;  %v1469_v45 = vld [vmem:[%s2046_s9 + $0x4c] sm:$0x1]  ;;  %s1867_s22 = smov [#allocation8]  }
  0x9c   : > { %v638_v10 = vsel %vm2152_vm5, %v633_v62, %v637_v20  ;;  %v665_v16 = vrot.slane %v663_v63, 5  ;;  %v723_v34 = vsel %vm2093_vm2, %v1446_v3, %v722_v5  ;;  %v726_v6 = vrot.slane %v1429_v46, 5 }
  0x9d   : > { %v1440_v31 = vcombine.low %v624_v60, %v638_v10  ;;  %v652_v17 = vsel %vm2152_vm5, %v647_v7, %v651_v29  ;;  %v661_v27 = vrot.slane %v660_v8, 4  ;;  %v1448_v0 = vrot.slane %v2323_v21, 9 }
  0x9e   : > { %v727_v18 = vsel %vm2093_vm2, %v1447_v9, %v726_v6  ;;  %v730_v28 = vrot.slane %v1431_v51, 5  ;;  %v1449_v35 = vrot.slane %v2326_v26, 9  ;;  %v734_v36 = vrot.slane %v1433_v57, 5  ;;  %v2380_v26 = vld [vmem:[%s2046_s9 + $0x48] sm:$0xf] }
  0x9f   : > { %544 = vrot.lane.b32.xlu1 %v1437_v38, %s1859_s20  ;;  %683 = vrot.lane.b32.xlu0 %v1440_v31, %s1863_s11  ;;  %v666_v1 = vsel %vm2152_vm5, %v661_v27, %v665_v16  ;;  %v1452_v40 = vcombine.low %v723_v34, %v727_v18  ;;  %v1472_v21 = vcombine.low %v2358_v2, %v2367_v37  ;;  %v879_v46 = vshrl.u32 %v2358_v2, 16  ;;  %v1463_v51 = vld [vmem:[%s2046_s9 + $0x34] sm:$0x1]  ;;  %v1467_v57 = vld [vmem:[%s2046_s9 + $0x44] sm:$0x1]  ;;  %s1217_s9 = scalar_lea.sflag [#allocation5], %s2042_s25 }
  0xa0   : > { %v1441_v61 = vcombine.low %v652_v17, %v666_v1  ;;  %v731_v38 = vsel %vm2093_vm2, %v1448_v0, %v730_v28  ;;  %v735_v49 = vsel %vm2093_vm2, %v1449_v35, %v734_v36  ;;  %v882_v50 = vshll.u32 %v2358_v2, 16  ;;  %s1735_s20 = scalar_lea.vmem %s2481_s21, 512 }
  0xa1   : > { %v1453_v42 = vcombine.low %v731_v38, %v735_v49  ;;  %v893_v52 = vshrl.u32 %v2367_v37, 16  ;;  %v896_v30 = vshll.u32 %v2367_v37, 16  ;;  %v1473_v4 = vcombine.low %v2377_v47, %v2380_v26  ;;  %p1736_p4 = scmp.ne.s32.totalorder %s2481_s21, %s1735_s20 }
  0xa2   : > { %v907_v54 = vshrl.u32 %v2377_v47, 16  ;;  %v910_v41 = vshll.u32 %v2377_v47, 16  ;;  %v921_v48 = vshrl.u32 %v2380_v26, 16  ;;  %v924_v56 = vshll.u32 %v2380_v26, 16 }
  0xa3   : > { %685 = vrot.lane.b32.xlu1 %v1441_v61, %s1863_s11  ;;  %752 = vrot.lane.b32.xlu0 %v1452_v40, %s1861_s24  ;;  %v881_v58 = vrot.slane %v879_v46, 4  ;;  %v884_v14 = vrot.slane %v882_v50, 5  ;;  %v888_v33 = vshll.u32 %v1463_v51, 16  ;;  %v895_v15 = vrot.slane %v893_v52, 4  ;;  %p1737_p6 = pnand %p1736_p4, %p1985_p10 }
  0xa4   : > { %v898_v19 = vrot.slane %v896_v30, 5  ;;  %v902_v20 = vshll.u32 %v1465_v53, 16  ;;  %v909_v59 = vrot.slane %v907_v54, 4  ;;  %v912_v24 = vrot.slane %v910_v41, 5 }
  0xa5   : > { %v885_v29 = vor.u32 %v884_v14, %v881_v58  ;;  %v890_v32 = vrot.slane %v888_v33, 5  ;;  %v916_v62 = vshll.u32 %v1467_v57, 16  ;;  %v923_v63 = vrot.slane %v921_v48, 4  ;;  %v1676_v30 = vld [vmem:[#allocation6 + $0x10] ss:$0 sps:$4 sm:$0x33]   ;;  %p1738_p8 = pneg %p1737_p6 }
  0xa6   : > { %v899_v3 = vor.u32 %v898_v19, %v895_v15  ;;  %v904_v5 = vrot.slane %v902_v20, 5  ;;  %v913_v60 = vor.u32 %v912_v24, %v909_v59  ;;  %v926_v7 = vrot.slane %v924_v56, 5 }
  0xa7   : > { %754 = vrot.lane.b32.xlu1 %v1453_v42, %s1861_s24  ;;  %809 = vrot.lane.b32.xlu0 %v1472_v21, %s1864_s7  ;;  %v886_v8 = vrot.slane %v885_v29, 4  ;;  %v918_v9 = vrot.slane %v916_v62, 5  ;;  %v930_v10 = vshll.u32 %v1469_v45, 16  ;;  %v1482_v16 = vrot.slane %v2358_v2, 9  ;;  %s1739_s24 = sshll.u32 %s1867_s22, 4  ;;  %s1740_s24 = int_to_ptr.vmem [resolvable:$false] %s1739_s24 }
  0xa8   : > { %v900_v34 = vrot.slane %v899_v3, 4  ;;  %v914_v6 = vrot.slane %v913_v60, 4  ;;  %v927_v31 = vor.u32 %v926_v7, %v923_v63  ;;  %v989_v17 = vrot.slane %v1463_v51, 5  ;;  %s1741_s11 = scalar_lea.vmem %s1740_s24, 1024  ;;  %p1742_p12 = scmp.lt.s32.totalorder %s2481_s21, %s1740_s24 }
  0xa9   : > { %v891_v27 = vsel %vm2152_vm5, %v886_v8, %v890_v32  ;;  %v932_v0 = vrot.slane %v930_v10, 5  ;;  %v1483_v18 = vrot.slane %v2367_v37, 9  ;;  %v993_v28 = vrot.slane %v1465_v53, 5  ;;  %p1743_p13 = scmp.lt.s32.totalorder %s1741_s11, %s1735_s20 }
  0xaa   : > { %v905_v35 = vsel %vm2152_vm5, %v900_v34, %v904_v5  ;;  %v919_v36 = vsel %vm2152_vm5, %v914_v6, %v918_v9  ;;  %v928_v1 = vrot.slane %v927_v31, 4  ;;  %v990_v2 = vsel %vm2093_vm2, %v1482_v16, %v989_v17 }
  0xab   : > { %811 = vrot.lane.b32.xlu1 %v1473_v4, %s1864_s7  ;;  %v1476_v40 = vcombine.low %v891_v27, %v905_v35  ;;  %v994_v21 = vsel %vm2093_vm2, %v1483_v18, %v993_v28  ;;  %v1484_v46 = vrot.slane %v2377_v47, 9  ;;  %v997_v37 = vrot.slane %v1467_v57, 5  ;;  %p1744_p0 = por %p1743_p13, %p1742_p12 }
  0xac   : > { %v933_v61 = vsel %vm2152_vm5, %v928_v1, %v932_v0  ;;  %v1485_v38 = vrot.slane %v2380_v26, 9  ;;  %v1001_v49 = vrot.slane %v1469_v45, 5  ;;  %v1488_v51 = vcombine.low %v990_v2, %v994_v21 }
  0xad   : > { %950 = vrot.lane.b32.xlu0 %v1476_v40, %s1865_s8  ;;  %v1477_v50 = vcombine.low %v919_v36, %v933_v61  ;;  %v998_v42 = vsel %vm2093_vm2, %v1484_v46, %v997_v37  ;;  %vm277_vm6 = vcmask 31744   ;;  %v1398_v47 = vcombine.low %v2071_v12, %v2089_v22  ;;  %p1745_p5 = pnand %p1744_p0, %p1738_p8 }
  0xae   : > { %v1002_v52 = vsel %vm2093_vm2, %v1485_v38, %v1001_v49  ;;  %v1399_v11 = vcombine.low %v2118_v39, %v2125_v43  ;;  %v1400_v4 = vcombine.low %v2233_v55, %v2242_v13  ;;  %v1401_v23 = vcombine.low %v2270_v25, %v2280_v44 }
  0xaf   : > { %952 = vrot.lane.b32.xlu1 %v1477_v50, %s1865_s8  ;;  %v1489_v26 = vcombine.low %v998_v42, %v1002_v52  ;;  %278 = vst.msk [vmem:[#allocation2] sm:$0xff] %vm277_vm6, %v1398_v47  ;;  %vm1069_vm7 = vcmask 1041408   ;;  %vm421_vm8 = vcmask 64544   ;;  %vm493_vm9 = vcmask 97344  }
  0xb0   : > { %279 = vst.msk [vmem:[#allocation2 + $0x8] sm:$0xff] %vm277_vm6, %v1399_v11  ;;  %280 = vst.msk [vmem:[#allocation2 + $0x10] sm:$0xff] %vm277_vm6, %v1400_v4  ;;  %1571 = vmatprep.subr.msk.bf16.mxu0 %vm1069_vm7, %v1676_v30  ;;  %v1071_v12 = vsel %vm1069_vm7, %v1676_v30, 0  ;;  %1572 = vmatprep.subr.msk.bf16.mxu1 %vm1069_vm7, %v1676_v30  ;;  %vm550_vm10 = vcmask 130144   ;;  %vm691_vm11 = vcmask 162944   ;;  %vm760_vm12 = vcmask 195744  }
  0xb1   : > { %1019 = vrot.lane.b32.xlu0 %v1488_v51, %s1866_s18  ;;  %281 = vst.msk [vmem:[#allocation2 + $0x18] sm:$0xff] %vm277_vm6, %v1401_v23  ;;  %1556 = vmatpush3.bf16.msra.mxu0 %v1071_v12  ;;  %vm817_vm13 = vcmask 228544   ;;  %vm958_vm14 = vcmask 261344   ;;  %vm1027_vm15 = vcmask 294144   ;;  %vm1056_vm0 = vcmask 293888  }
  0xb2   : > { %1570 = vmatpush3.bf16.msra.mxu1 %v1071_v12 }
  0xb3   : > { %1021 = vrot.lane.b32.xlu1 %v1489_v26, %s1866_s18 }
  0xd2   : > { %v541_v22 = vpop.permute.xlu1 %540 }
  0xd3   : > { %v539_v39 = vpop.permute.xlu0 %538 }
  0xda   : > { %v482_v43 = vpop.permute.xlu1 %481 }
  0xdc   : > { %v749_v55 = vpop.permute.xlu0 %748 }
  0xde   : > { %v484_v13 = vpop.permute.xlu1 %483 }
  0xe3   : > { %v751_v44 = vpop.permute.xlu1 %750 }
  0xe6   : > { %v410_v25 = vpop.permute.xlu0 %409 }
  0xe7   : > { %422 = vst.msk [vmem:[#allocation2] sm:$0xff] %vm421_vm8, %v410_v25 }
  0xe8   : > { %494 = vst.msk [vmem:[#allocation2] sm:$0xff] %vm493_vm9, %v482_v43 }
  0xe9   : > { %551 = vst.msk [vmem:[#allocation2] sm:$0xff] %vm550_vm10, %v539_v39 }
  0xec   : > { %v682_v53 = vpop.permute.xlu1 %681 }
  0xed   : > { %v412_v54 = vpop.permute.xlu0 %411 }
  0xee   : > { %423 = vst.msk [vmem:[#allocation2 + $0x8] sm:$0xff] %vm421_vm8, %v412_v54 }
  0xef   : > { %495 = vst.msk [vmem:[#allocation2 + $0x8] sm:$0xff] %vm493_vm9, %v484_v13 }
  0xf0   : > { %552 = vst.msk [vmem:[#allocation2 + $0x8] sm:$0xff] %vm550_vm10, %v541_v22  ;;  %v808_v41 = vpop.permute.xlu1 %807 }
  0xf1   : > { %693 = vst.msk [vmem:[#allocation2 + $0x8] sm:$0xff] %vm691_vm11, %v682_v53  ;;  %v680_v48 = vpop.permute.xlu0 %679 }
  0xf2   : > { %692 = vst.msk [vmem:[#allocation2] sm:$0xff] %vm691_vm11, %v680_v48 }
  0xf3   : > { %762 = vst.msk [vmem:[#allocation2 + $0x8] sm:$0xff] %vm760_vm12, %v751_v44  ;;  %761 = vst.msk [vmem:[#allocation2] sm:$0xff] %vm760_vm12, %v749_v55 }
  0xf4   : > { %819 = vst.msk [vmem:[#allocation2 + $0x8] sm:$0xff] %vm817_vm13, %v808_v41 }
  0xf5   : > { %v806_v56 = vpop.permute.xlu0 %805 }
  0xf6   : > { %818 = vst.msk [vmem:[#allocation2] sm:$0xff] %vm817_vm13, %v806_v56 }
  0xf9   : > { %v947_v57 = vpop.permute.xlu0 %946  ;;  %v949_v58 = vpop.permute.xlu1 %948 }
  0xfa   : > { %959 = vst.msk [vmem:[#allocation2] sm:$0xff] %vm958_vm14, %v947_v57  ;;  %960 = vst.msk [vmem:[#allocation2 + $0x8] sm:$0xff] %vm958_vm14, %v949_v58 }
  0xfd   : > { %v1016_v14 = vpop.permute.xlu0 %1015 }
  0xfe   : > { %1028 = vst.msk [vmem:[#allocation2] sm:$0xff] %vm1027_vm15, %v1016_v14 }
 0x101   : > { %v1018_v33 = vpop.permute.xlu0 %1017 }
 0x102   : > { %v414_v15 = vpop.permute.xlu1 %413  ;;  %1029 = vst.msk [vmem:[#allocation2 + $0x8] sm:$0xff] %vm1027_vm15, %v1018_v33 }
 0x103   : > { %424 = vst.msk [vmem:[#allocation2 + $0x10] sm:$0xff] %vm421_vm8, %v414_v15 }
 0x105   : > { %v1032_v19 = vld [vmem:[#allocation2] sm:$0xff] }
 0x106   : > { %v486_v20 = vpop.permute.xlu0 %485  ;;  %1557 = vmatprep.mubr.msk.bf16.mxu0 %vm1056_vm0, %v1032_v19 }
 0x107   : > { %496 = vst.msk [vmem:[#allocation2 + $0x10] sm:$0xff] %vm493_vm9, %v486_v20 }
 0x109   : > { %v416_v45 = vpop.permute.xlu1 %415  ;;  %v1033_v59 = vld [vmem:[#allocation2 + $0x8] sm:$0xff] }
 0x10a   : > { %425 = vst.msk [vmem:[#allocation2 + $0x18] sm:$0xff] %vm421_vm8, %v416_v45  ;;  %v543_v24 = vpop.permute.xlu0 %542  ;;  %1558 = vmatmul.mubr.msk.bf16.vlgmr.msra.gmra.mrb[0].mxu0 %vm1056_vm0, %v1033_v59 }
 0x10b   : > { %553 = vst.msk [vmem:[#allocation2 + $0x10] sm:$0xff] %vm550_vm10, %v543_v24 }
 0x10d   : > { %v488_v29 = vpop.permute.xlu1 %487 }
 0x10e   : > { %497 = vst.msk [vmem:[#allocation2 + $0x18] sm:$0xff] %vm493_vm9, %v488_v29 }
 0x111   : > { %v545_v32 = vpop.permute.xlu1 %544  ;;  %v684_v62 = vpop.permute.xlu0 %683 }
 0x112   : > { %554 = vst.msk [vmem:[#allocation2 + $0x18] sm:$0xff] %vm550_vm10, %v545_v32 }
 0x113   : > { %694 = vst.msk [vmem:[#allocation2 + $0x10] sm:$0xff] %vm691_vm11, %v684_v62 }
 0x115   : > { %v686_v63 = vpop.permute.xlu1 %685  ;;  %v753_v3 = vpop.permute.xlu0 %752 }
 0x116   : > { %695 = vst.msk [vmem:[#allocation2 + $0x18] sm:$0xff] %vm691_vm11, %v686_v63 }
 0x117   : > { %763 = vst.msk [vmem:[#allocation2 + $0x10] sm:$0xff] %vm760_vm12, %v753_v3 }
 0x119   : > { %v755_v5 = vpop.permute.xlu1 %754  ;;  %v810_v60 = vpop.permute.xlu0 %809 }
 0x11a   : > { %764 = vst.msk [vmem:[#allocation2 + $0x18] sm:$0xff] %vm760_vm12, %v755_v5 }
 0x11b   : > { %820 = vst.msk [vmem:[#allocation2 + $0x10] sm:$0xff] %vm817_vm13, %v810_v60 }
 0x11d   : > { %v812_v7 = vpop.permute.xlu1 %811 }
 0x11e   : > { %821 = vst.msk [vmem:[#allocation2 + $0x18] sm:$0xff] %vm817_vm13, %v812_v7 }
 0x11f   : > { %v951_v8 = vpop.permute.xlu0 %950 }
 0x120   : > { %961 = vst.msk [vmem:[#allocation2 + $0x10] sm:$0xff] %vm958_vm14, %v951_v8 }
 0x121   : > { %v953_v9 = vpop.permute.xlu1 %952 }
 0x122   : > { %962 = vst.msk [vmem:[#allocation2 + $0x18] sm:$0xff] %vm958_vm14, %v953_v9 }
 0x123   : > { %v1020_v10 = vpop.permute.xlu0 %1019 }
 0x124   : > { %1030 = vst.msk [vmem:[#allocation2 + $0x10] sm:$0xff] %vm1027_vm15, %v1020_v10 }
 0x125   : > { %v1022_v16 = vpop.permute.xlu1 %1021 }
 0x126   : > { %1031 = vst.msk [vmem:[#allocation2 + $0x18] sm:$0xff] %vm1027_vm15, %v1022_v16 }
 0x12b   : > { %v1034_v34 = vld [vmem:[#allocation2 + $0x10] sm:$0xff] }
 0x12c   : > { %1561 = vmatprep.mubr.msk.bf16.mxu1 %vm1056_vm0, %v1034_v34 }
 0x12d   : > { %v1035_v6 = vld [vmem:[#allocation2 + $0x18] sm:$0xff] }
 0x12e   : > { %1562 = vmatmul.mubr.msk.bf16.vlgmr.msra.gmra.mrb[0].mxu1 %vm1056_vm0, %v1035_v6 }
 0x1dd   : > { %v1559_v31 = vpop.f32.mrb[0].mxu0 }
 0x1de   : > { %v1107_v17 = vpop.f32.mrb[1].mxu0  ;;  %v1193_v2 = vmul.f32 %v1559_v31, %v1559_v31 }
 0x1df   : > { %v1560_v27 = vpop.f32.mrb[2].mxu0  ;;  %v1191_v28 = vmul.f32 %v1107_v17, %v1107_v17 }
 0x1e0   : > { %v1529_v0 = vpack.c.bf16 %v1560_v27, %v1559_v31  ;;  %v1110_v18 = vpop.f32.mrb[3].mxu0  ;;  %v1194_v46 = vmul.f32 %v1560_v27, %v1560_v27 }
 0x1e1   : > { %v1524_v35 = vpack.c.bf16 %v1110_v18, %v1107_v17  ;;  %v1178_v36 = vadd.f32 %v1110_v18, %v1107_v17  ;;  %v1192_v1 = vmul.f32 %v1110_v18, %v1110_v18 }
 0x1e2   : > { %1541 = vst [vmem:[%s223_s30 + $0x8] sm:$0xff] %v1529_v0  }
 0x1e3   : > { %1525 = vst [vmem:[%s223_s30] sm:$0xff] %v1524_v35   ;;  %v1179_v40 = vadd.f32 %v1559_v31, %v1178_v36  ;;  %v1199_v21 = vadd.f32 %v1192_v1, %v1191_v28 }
 0x1e5   : > { %v1200_v37 = vadd.f32 %v1199_v21, %v1193_v2  ;;  %v1180_v61 = vadd.f32 %v1560_v27, %v1179_v40 }
 0x1e7   : > { %v1201_v38 = vadd.f32 %v1200_v37, %v1194_v46 }
 0x201   : > { %v1563_v49 = vpop.f32.mrb[0].mxu1 }
 0x202   : > { %v1123_v50 = vpop.f32.mrb[1].mxu1  ;;  %v1197_v12 = vmul.f32 %v1563_v49, %v1563_v49 }
 0x203   : > { %v1181_v51 = vadd.f32 %v1180_v61, %v1123_v50  ;;  %v1195_v42 = vmul.f32 %v1123_v50, %v1123_v50  ;;  %v1564_v52 = vpop.f32.mrb[2].mxu1 }
 0x204   : > { %v1539_v47 = vpack.c.bf16 %v1564_v52, %v1563_v49  ;;  %v1126_v11 = vpop.f32.mrb[3].mxu1 }
 0x205   : > { %v1202_v30 = vadd.f32 %v1201_v38, %v1195_v42  ;;  %v1534_v26 = vpack.c.bf16 %v1126_v11, %v1123_v50  ;;  %v1182_v4 = vadd.f32 %v1181_v51, %v1126_v11  ;;  %v1196_v23 = vmul.f32 %v1126_v11, %v1126_v11 }
 0x206   : > { %1543 = vst [vmem:[%s223_s30 + $0x18] sm:$0xff] %v1539_v47  }
 0x207   : > { %1542 = vst [vmem:[%s223_s30 + $0x10] sm:$0xff] %v1534_v26   ;;  %v1183_v22 = vadd.f32 %v1563_v49, %v1182_v4  ;;  %v1203_v39 = vadd.f32 %v1202_v30, %v1196_v23 }
 0x208   : > { %1748 = shalt.err (!%p1745_p5)
}
 0x209   : > { %s1749_s7 = scalar_lea.hbm %s2486_s6, 512  ;;  %s1753_s19 = scalar_lea.hbm %s2570_s2, 1024 }
 0x20a   : > { %p1750_p9 = scmp.ne.s32.totalorder %s2486_s6, %s1749_s7  ;;  %p1754_p3 = scmp.lt.u32.totalorder %s2486_s6, %s2570_s2 }
 0x20b   : > { %p1755_p7 = scmp.lt.u32.totalorder %s1753_s19, %s1749_s7  ;;  %p1757_p4 = scmp.lt.u32.totalorder %s1749_s7, %s2486_s6 }
 0x20c   : > { %p1751_p1 = pnand %p1750_p9, %p1985_p10 }
 0x20d   : > { %p1756_p11 = por %p1755_p7, %p1754_p3 }
 0x20e   : > { %p1752_p2 = pneg %p1751_p1 }
 0x20f   : > { %p1758_p6 = por %p1757_p4, %p1756_p11 }
 0x211   : > { %p1759_p8 = pnand %p1758_p6, %p1752_p2 }
 0x213   : > { %1762 = shalt.err (!%p1759_p8)
}
 0x214   : > { %s1868_s4 = smov 64   ;;  %v1198_v43 = vmul.f32 %v1564_v52, %v1564_v52  ;;  %v1184_v55 = vadd.f32 %v1564_v52, %v1183_v22  ;;  %v1204_v13 = vadd.f32 %v1203_v39, %v1197_v12  ;;  %s1397_s26 = sshll.u32 %s2042_s25, 3  ;;  %vm1212_vm1 = vcmask 1040384  }
 0x215   : > { %1582 = dma.vmem_to_hbm [thread:$0]  (%p1985_p10), %s2481_s21, 512, %s2486_s6, %s1217_s9, %s1868_s4, %s1868_s4, %s1862_s10  }
 0x216   : > { %v1185_v25 = vrot.slane %v1184_v55, 4  ;;  %v1205_v44 = vadd.f32 %v1204_v13, %v1198_v43  ;;  %s1509_s10 = sshll.u32 %s1845_s15, 7  ;;  %s230_s21 = scalar_lea.vmem [#allocation9], %s1397_s26 }
 0x217   : > { %s1254_s6 = sshll.u32 %s230_s21, 4  ;;  %s2518_s22 = scalar_lea.hbm %s2571_s3, %s1509_s10  ;;  %s2520_s6 = int_to_ptr.vmem [resolvable:$true] %s1254_s6 }
 0x218   : > { %v1186_v53 = vadd.f32 %v1185_v25, %v1184_v55  ;;  %v1206_v54 = vrot.slane %v1205_v44, 4  ;;  %s1222_s24 = scalar_lea.sflag [#allocation10], %s2042_s25  ;;  %s1763_s15 = scalar_lea.vmem %s2520_s6, 128 }
 0x219   : > { %p1764_p12 = scmp.ne.s32.totalorder %s2520_s6, %s1763_s15  ;;  %s1869_s11 = smov [#allocation9]  }
 0x21a   : > { %v1187_v41 = vrot.slane %v1186_v53, 2  ;;  %v1207_v48 = vadd.f32 %v1206_v54, %v1205_v44  ;;  %s1767_s7 = sshll.u32 %s1869_s11, 4  ;;  %s1768_s7 = int_to_ptr.vmem [resolvable:$false] %s1767_s7 }
 0x21b   : > { %p1765_p13 = pnand %p1764_p12, %p1985_p10  ;;  %s1769_s8 = scalar_lea.vmem %s1768_s7, 256 }
 0x21c   : > { %v1188_v56 = vadd.f32 %v1187_v41, %v1186_v53  ;;  %v1208_v57 = vrot.slane %v1207_v48, 2  ;;  %p1770_p5 = scmp.lt.s32.totalorder %s2520_s6, %s1768_s7  ;;  %p1771_p9 = scmp.lt.s32.totalorder %s1769_s8, %s1763_s15 }
 0x21d   : > { %p1766_p0 = pneg %p1765_p13 }
 0x21e   : > { %v1189_v58 = vrot.slane %v1188_v56, 1  ;;  %v1209_v14 = vadd.f32 %v1208_v57, %v1207_v48  ;;  %p1772_p1 = por %p1771_p9, %p1770_p5 }
 0x220   : > { %v1210_v33 = vrot.slane %v1209_v14, 1  ;;  %v1190_v15 = vadd.f32 %v1189_v58, %v1188_v56  ;;  %p1773_p2 = pnand %p1772_p1, %p1766_p0 }
 0x222   : > { %v1211_v19 = vadd.f32 %v1210_v33, %v1209_v14 }
 0x224   : > { %v1213_v20 = vsel %vm1212_vm1, %v1190_v15, %v1211_v19 }
 0x225   : > { %v1214_v45 = vsel %vm1069_vm7, %v1213_v20, 0.0 }
 0x226   : > { %1215 = vst [vmem:[%s230_s21] sm:$0xff] %v1214_v45 }
 0x227   : > { %1776 = shalt.err (!%p1773_p2)
}
 0x228   : > { %s1777_s25 = scalar_lea.hbm %s2518_s22, 128  ;;  %s1781_s30 = scalar_lea.hbm %s2571_s3, 256 }
 0x229   : > { %p1778_p3 = scmp.ne.s32.totalorder %s2518_s22, %s1777_s25  ;;  %p1782_p4 = scmp.lt.u32.totalorder %s2518_s22, %s2571_s3 }
 0x22a   : > { %p1783_p6 = scmp.lt.u32.totalorder %s1781_s30, %s1777_s25  ;;  %p1785_p12 = scmp.lt.u32.totalorder %s1777_s25, %s2518_s22 }
 0x22b   : > { %p1779_p7 = pnand %p1778_p3, %p1985_p10 }
 0x22c   : > { %p1784_p8 = por %p1783_p6, %p1782_p4 }
 0x22d   : > { %p1780_p11 = pneg %p1779_p7 }
 0x22e   : > { %p1786_p13 = por %p1785_p12, %p1784_p8 }
 0x230   : > { %p1787_p0 = pnand %p1786_p13, %p1780_p11 }
 0x232   : > { %1790 = shalt.err (!%p1787_p0)
}
 0x233   : > { %1583 = dma.vmem_to_hbm [thread:$0]  (%p1985_p10), %s2520_s6, 128, %s2518_s22, %s1222_s24  }
 0x234 PF: > { %s1266_s26 = sand.u32 1, %s1833_s12   ;;  %p2592_p5 = scmp.ne.s32.totalorder %s2579_s23, 0 }
 0x235   : > { %p2593_p9 = scmp.ge.s32.totalorder %s1853_s17, 2  ;;  %s1267_s10 = scalar_lea.sflag [#allocation5], %s1266_s26 }
 0x237   : > { %p1595_p1 = pnand %p2593_p9, %p2592_p5 }
 0x239   : > { %1824 = dma.done.wait (!%p1595_p1), %s1267_s10, 512  }
 0x23a   : > { %1826 = vsyncadd (!%p1595_p1), %s1267_s10, 4294966784  ;;  %s1276_s21 = scalar_lea.sflag [#allocation10], %s1266_s26 }
 0x23b   : > { %1828 = dma.done.wait (!%p1595_p1), %s1276_s21, 128  }
 0x23c   : > { %1830 = vsyncadd (!%p1595_p1), %s1276_s21, 4294967168  ;;  %s24_s17 = sadd.s32 1, %s1853_s17   ;;  %s2594_s12 = smov %s1837_s13 }
 0x23d   : > { %p21_p2 = scmp.ge.s32.totalorder %s24_s17, 4   ;;  %s2595_s13 = smov %s1841_s14 }
 0x23e   : > { %s2596_s14 = smov %s1994_s5  ;;  %s2597_s15 = smov %s1849_s16 }
 0x23f   : > { %s2598_s16 = smov %s2600_s28  ;;  %23 = sbr.rel (!%p21_p2) target bundleno = 9 (0x9), region = 97 }
 0x246   :  { %1281 = vsyncpa [#allocation4], 1 }
 0x247   :  { %1283 = vsyncpa [#allocation4 + $0x1], 1 }
 0x248   :  { %1284 = vsyncpa [#allocation7], 1 }
 0x249   :  { %1285 = vsyncpa [#allocation5], 1 }
 0x24a   :  { %1287 = vsyncpa [#allocation5 + $0x1], 1 }
 0x24b   :  { %1288 = vsyncpa [#allocation10], 1 }
 0x24c   :  { %1290 = vsyncpa [#allocation10 + $0x1], 1 }

// kernel: down_forward.4
= control target key start
LH: loop header
LB: loop body
LE: loop exit
PB: predicated region body
PF: predicated region fallthrough
CT: control target
= control target key end

     0   :  { %11 = vsyncpa [#allocation4], 0  ;;  %s4612_s0 = inlined_call_operand.hbm [shape: bf16[2,12,12,128], index: 0, kind: input, shape index: {}]   ;;  %s4613_s1 = inlined_call_operand.hbm [shape: bf16[1152,128], index: 1, kind: input, shape index: {}]   ;;  %s4614_s2 = inlined_call_operand.hbm [shape: f32[1,128], index: 2, kind: input, shape index: {}]   ;;  %s4615_s3 = inlined_call_operand.hbm [shape: f32[1,128], index: 3, kind: input, shape index: {}]   ;;  %s4616_s4 = inlined_call_operand.hbm [shape: bf16[2,64,128], index: 4, kind: output, shape index: {0}]   ;;  %s4617_s5 = inlined_call_operand.hbm [shape: f32[2,1,8,128], index: 5, kind: output, shape index: {1}]  }
   0x1   :  { %13 = vsyncpa [#allocation4 + $0x1], 0 }
   0x2   :  { %14 = vsyncpa [#allocation7], 0 }
   0x3   :  { %15 = vsyncpa [#allocation10], 0 }
   0x4   :  { %16 = vsyncpa [#allocation5], 0 }
   0x5   :  { %18 = vsyncpa [#allocation5 + $0x1], 0 }
   0x6   :  { %19 = vsyncpa [#allocation13], 0 }
   0x7   :  { %21 = vsyncpa [#allocation13 + $0x1], 0  ;;  %s3708_s18 = smov 0   ;;  %s3710_s19 = smov 0  }
   0x8   :  { %s3712_s20 = smov 0   ;;  %s3714_s21 = smov 0  }
   0x9   :  { %s3716_s22 = smov 0   ;;  %s3718_s23 = smov 0  }
   0xa LB: > { %4625 = sst [smem:[#allocation19_spill]] %s3645_s18  ;;  %s2654_s24 = sadd.s32 4294967295, %s3665_s23   ;;  %s3665_s23 = sphi %s3718_s23, %s27_s23   ;;  %s3661_s22 = sphi %s3716_s22, %s4655_s22   ;;  %s3657_s21 = sphi %s3714_s21, %s4654_s21   ;;  %s3653_s20 = sphi %s3712_s20, %s4653_s20   ;;  %s3649_s19 = sphi %s3710_s19, %s4652_s19   ;;  %s3645_s18 = sphi %s3708_s18, %s4651_s18  }
   0xb   : > { %s2655_s25 = sadd.s32 4294967294, %s3665_s23   ;;  %p59_p0 = scmp.ne.s32.totalorder %s3649_s19, %s3645_s18 }
   0xc   : > { %p3742_p1 = scmp.eq.s32.totalorder %s2654_s24, 0  ;;  %p3746_p2 = scmp.eq.s32.totalorder %s2654_s24, 1 }
   0xd   : > { %p154_p3 = scmp.eq.s32.totalorder %s2655_s25, 1  ;;  %p2656_p5 = scmp.ge.s32.totalorder %s3665_s23, 1 }
   0xe   : > { %s4626_s26 = scalar_select %p3742_p1, 1, 0 }
   0xf   : > { %s4627_s27 = scalar_select %p3746_p2, 1, 0 }
  0x10   : > { %p3752_p4 = por %p3742_p1, %p59_p0  ;;  %p3757_p6 = por %p154_p3, %p59_p0 }
  0x11   : > { %p189_p7 = scmp.lt.s32.totalorder %s3665_s23, 3  ;;  %s3667_s6 = smov [#allocation6]  }
  0x12   : > { %s4628_s28 = scalar_select %p3752_p4, 1, 0 }
  0x13   : > { %s4629_s29 = scalar_select %p3757_p6, 1, 0 }
  0x14   : > { %p3762_p8 = pnand %p2656_p5, %p189_p7  ;;  %s201_s7 = sshll.u32 %s3667_s6, 4  ;;  %s3766_s7 = int_to_ptr.vmem [resolvable:$true] %s201_s7 }
  0x15   : > { %4630 = sst [smem:[#allocation20_spill]] %s4629_s29  ;;  %s3668_s9 = smov [#allocation8]  }
  0x16   : > { %s4631_s30 = scalar_select %p3762_p8, 1, 0 }
  0x17   : > { %p3270_p9 = pneg %p3762_p8  ;;  %s215_s10 = sshll.u32 %s3668_s9, 4  ;;  %s3777_s10 = int_to_ptr.vmem [resolvable:$true] %s215_s10 }
  0x18   : > { %s3669_s11 = smov [#allocation9]   ;;  %s3429_s15 = scalar_lea.hbm %s4613_s1, 9216 }
  0x19   : > { %p3773_p11 = pnand %p3270_p9, %p3742_p1  ;;  %s3779_s12 = sshll.u32 %s3669_s11, 4  ;;  %s227_s12 = int_to_ptr.vmem [resolvable:$true] %s3779_s12 }
  0x1a   : > { %p3430_p12 = scmp.ne.s32.totalorder %s4613_s1, %s3429_s15  ;;  %p3436_p5 = scmp.lt.u32.totalorder %s3429_s15, %s4613_s1 }
  0x1b   : > { %p3789_p13 = pneg %p3773_p11 }
  0x1d   : > { %p3432_p0 = pnand %p3789_p13, %p3430_p12 }
  0x1f   : > { %p3433_p3 = pneg %p3432_p0 }
  0x21   : > { %p3438_p7 = pnand %p3436_p5, %p3433_p3 }
  0x23   : > { %3441 = shalt.err (!%p3438_p7)
}
  0x24   : > { %s3442_s9 = scalar_lea.vmem %s3766_s7, 9216  ;;  %p3450_p1 = scmp.lt.s32.totalorder %s3766_s7, %s3766_s7 }
  0x25   : > { %p3443_p9 = scmp.ne.s32.totalorder %s3766_s7, %s3442_s9  ;;  %p3451_p4 = scmp.lt.s32.totalorder %s3442_s9, %s3442_s9 }
  0x27   : > { %p3445_p10 = pnand %p3443_p9, %p3789_p13  ;;  %p3452_p12 = por %p3451_p4, %p3450_p1 }
  0x29   : > { %p3446_p6 = pneg %p3445_p10 }
  0x2b   : > { %p3453_p0 = pnand %p3452_p12, %p3446_p6 }
  0x2d   : > { %3456 = shalt.err (!%p3453_p0)
}
  0x2e   : > { %s4624_s11 = smov 64   ;;  %s3671_s13 = smov 4  }
  0x2f   : > { %3273 = dma.hbm_to_vmem [thread:$0]  (!%p3773_p11), %s4613_s1, 9216, %s3766_s7, [#allocation7], %s4624_s11, %s4624_s11, %s3671_s13  }
  0x30   : > { %s3457_s25 = scalar_lea.hbm %s4614_s2, 16 }
  0x31   : > { %p3458_p1 = scmp.ne.s32.totalorder %s4614_s2, %s3457_s25  ;;  %p3464_p10 = scmp.lt.u32.totalorder %s3457_s25, %s4614_s2 }
  0x33   : > { %p3460_p4 = pnand %p3458_p1, %p3789_p13 }
  0x35   : > { %p3461_p6 = pneg %p3460_p4 }
  0x37   : > { %p3466_p3 = pnand %p3464_p10, %p3461_p6 }
  0x39   : > { %3469 = shalt.err (!%p3466_p3)
}
  0x3a   : > { %s3470_s7 = scalar_lea.vmem %s3777_s10, 16  ;;  %s3477_s14 = scalar_lea.vmem %s3777_s10, 32 }
  0x3b   : > { %p3471_p5 = scmp.ne.s32.totalorder %s3777_s10, %s3470_s7  ;;  %p3478_p12 = scmp.lt.s32.totalorder %s3777_s10, %s3777_s10 }
  0x3c   : > { %p3479_p0 = scmp.lt.s32.totalorder %s3477_s14, %s3470_s7 }
  0x3d   : > { %p3473_p7 = pnand %p3471_p5, %p3789_p13 }
  0x3e   : > { %p3480_p1 = por %p3479_p0, %p3478_p12 }
  0x3f   : > { %p3474_p9 = pneg %p3473_p7 }
  0x41   : > { %p3481_p4 = pnand %p3480_p1, %p3474_p9 }
  0x43   : > { %3484 = shalt.err (!%p3481_p4)
}
  0x44   : > { %3276 = dma.hbm_to_vmem [thread:$0]  (!%p3773_p11), %s4614_s2, 16, %s3777_s10, [#allocation7]  }
  0x45   : > { %s3485_s17 = scalar_lea.hbm %s4615_s3, 16 }
  0x46   : > { %p3486_p6 = scmp.ne.s32.totalorder %s4615_s3, %s3485_s17  ;;  %p3492_p5 = scmp.lt.u32.totalorder %s3485_s17, %s4615_s3 }
  0x48   : > { %p3488_p10 = pnand %p3486_p6, %p3789_p13 }
  0x4a   : > { %p3489_p3 = pneg %p3488_p10 }
  0x4c   : > { %p3494_p7 = pnand %p3492_p5, %p3489_p3 }
  0x4e   : > { %3497 = shalt.err (!%p3494_p7)
}
  0x4f   : > { %s3498_s14 = scalar_lea.vmem %s227_s12, 16  ;;  %s3505_s10 = scalar_lea.vmem %s227_s12, 32 }
  0x50   : > { %p3499_p9 = scmp.ne.s32.totalorder %s227_s12, %s3498_s14  ;;  %p3506_p1 = scmp.lt.s32.totalorder %s227_s12, %s227_s12 }
  0x51   : > { %p3507_p4 = scmp.lt.s32.totalorder %s3505_s10, %s3498_s14 }
  0x52   : > { %p3501_p12 = pnand %p3499_p9, %p3789_p13 }
  0x53   : > { %p3508_p8 = por %p3507_p4, %p3506_p1 }
  0x54   : > { %p3502_p0 = pneg %p3501_p12 }
  0x56   : > { %p3509_p2 = pnand %p3508_p8, %p3502_p0 }
  0x58   : > { %3512 = shalt.err (!%p3509_p2)
}
  0x59   : > { %3279 = dma.hbm_to_vmem [thread:$0]  (!%p3773_p11), %s4615_s3, 16, %s227_s12, [#allocation10]  }
  0x5a   : > { %s46_s24 = sadd.s32 1, %s3653_s20  ;;  %s39_s15 = sadd.s32 1, %s3661_s22 }
  0x5b   : > { %p53_p2 = scmp.ne.s32.totalorder %s3653_s20, %s3649_s19  ;;  %p41_p8 = scmp.ge.s32.totalorder %s39_s15, 2 }
  0x5c   : > { %p54_p13 = scmp.eq.s32.totalorder %s3665_s23, 0  ;;  %p4634_p6 = scmp.ne.s32.totalorder %s4627_s27, 0 }
  0x5d   : > { %p3294_p3 = scmp.lt.s32.totalorder %s3665_s23, 2  ;;  %s4657_s15 = smov (%p41_p8, %s39_s15), 0 }
  0x5e   : > { %p3863_p10 = por %p4634_p6, %p53_p2  ;;  %p55_p5 = por %p54_p13, %p53_p2 }
  0x5f   : > { %s237_s16 = sand.u32 1, %s3653_s20   ;;  %s43_s17 = ssub.s32 %s3661_s22, %s4657_s15 }
  0x60   : > { %p44_p7 = scmp.eq.s32.totalorder %s43_s17, 0  ;;  %s3249_s12 = smul.u32 96, %s237_s16 }
  0x61   : > { %s3250_s25 = smul.u32 1536, %s3661_s22  ;;  %p3874_p11 = pnand %p3294_p3, %p55_p5 }
  0x62   : > { %s3879_s27 = scalar_select %p44_p7, %s3653_s20, %s46_s24  }
  0x63   : > { %s3884_s14 = scalar_lea.hbm %s4612_s0, %s3250_s25  ;;  %s241_s10 = scalar_lea.vmem [#allocation3], %s3249_s12 }
  0x64   : > { %s248_s18 = sshll.u32 %s241_s10, 4  ;;  %s3888_s29 = scalar_lea.sflag [#allocation4], %s237_s16  ;;  %s3886_s18 = int_to_ptr.vmem [resolvable:$true] %s248_s18 }
  0x65   : > { %s3513_s17 = scalar_lea.hbm %s3884_s14, 1536  ;;  %p3515_p12 = pneg %p3874_p11 }
  0x66   : > { %p3514_p9 = scmp.ne.s32.totalorder %s3884_s14, %s3513_s17  ;;  %s3518_s9 = scalar_lea.hbm %s4612_s0, 3072 }
  0x67   : > { %p3519_p4 = scmp.lt.u32.totalorder %s3884_s14, %s4612_s0  ;;  %p3520_p2 = scmp.lt.u32.totalorder %s3518_s9, %s3513_s17 }
  0x68   : > { %p3516_p0 = pnand %p3515_p12, %p3514_p9  ;;  %p3522_p13 = scmp.lt.u32.totalorder %s3513_s17, %s3884_s14 }
  0x69   : > { %p3521_p8 = por %p3520_p2, %p3519_p4 }
  0x6a   : > { %p3517_p1 = pneg %p3516_p0 }
  0x6b   : > { %p3523_p6 = por %p3522_p13, %p3521_p8 }
  0x6d   : > { %p3524_p3 = pnand %p3523_p6, %p3517_p1 }
  0x6f   : > { %3527 = shalt.err (!%p3524_p3)
}
  0x70   : > { %s3528_s16 = scalar_lea.vmem %s3886_s18, 1536  ;;  %s3672_s12 = smov [#allocation3]  }
  0x71   : > { %p3529_p5 = scmp.ne.s32.totalorder %s3886_s18, %s3528_s16  ;;  %s3533_s10 = sshll.u32 %s3672_s12, 4  ;;  %s3534_s10 = int_to_ptr.vmem [resolvable:$false] %s3533_s10 }
  0x72   : > { %s3535_s11 = scalar_lea.vmem %s3534_s10, 3072  ;;  %p3536_p0 = scmp.lt.s32.totalorder %s3886_s18, %s3534_s10 }
  0x73   : > { %p3531_p7 = pnand %p3529_p5, %p3515_p12  ;;  %p3537_p4 = scmp.lt.s32.totalorder %s3535_s11, %s3528_s16 }
  0x75   : > { %p3532_p9 = pneg %p3531_p7  ;;  %p3538_p2 = por %p3537_p4, %p3536_p0 }
  0x77   : > { %p3539_p8 = pnand %p3538_p2, %p3532_p9 }
  0x79   : > { %3542 = shalt.err (!%p3539_p8)
}
  0x7a   : > { %s4637_s17 = smov 64   ;;  %p4638_p12 = scmp.ne.s32.totalorder %s4631_s30, 0 }
  0x7b   : > { %3283 = dma.hbm_to_vmem [thread:$0]  (!%p3874_p11), %s3884_s14, 1536, %s3886_s18, %s3888_s29, %s4637_s17, %s4637_s17, %s3671_s13  }
  0x7c   : > { %260 = sbr.rel (%p4638_p12) target bundleno = 557 (0x22d), region = 36  ;;  %s3922_s24 = sand.u32 (!%p4638_p12), 1, %s3649_s19  }
  0x7d   : > { %s3251_s25 = smul.u32 (!%p4638_p12), 96, %s3922_s24  ;;  %s263_s9 = scalar_lea.sflag (!%p4638_p12), [#allocation4], %s3922_s24 }
  0x7e   : > { %p4639_p1 = scmp.ne.s32.totalorder (!%p4638_p12), %s4628_s28, 0 }
  0x7f   : > { %s3926_s7 = scalar_lea.vmem (!%p4638_p12), [#allocation3], %s3251_s25 }
  0x83   : > { %3624 = dma.done.wait (%p4639_p1), %s263_s9, 1536  }
  0x84   : > { %3626 = vsyncadd (%p4639_p1), %s263_s9, 4294965760  ;;  %p4640_p11 = scmp.ne.s32.totalorder %s4626_s26, 0 }
  0x86   : > { %3628 = dma.done.wait (%p4640_p11), [#allocation7], 9232  }
  0x87   : > { %3630 = vsyncadd (%p4640_p11), [#allocation7], 4294958064 }
  0x88   : > { %3632 = dma.done.wait (%p4640_p11), [#allocation10], 16  }
  0x89   : > { %3634 = vsyncadd (%p4640_p11), [#allocation10], 4294967280  ;;  %vm589_vm0 = vcmask 1042432   ;;  %vm590_vm1 = vcmask 1046532   ;;  %v3673_v0 = vmov 0.0|0.0   ;;  %v3355_v8 = vld [vmem:[#allocation6 + $0x40] sm:$0xff]   ;;  %v450_v35 = vlaneseq }
  0x8a   : > { %v3940_v1 = vcombine.low %v3673_v0, %v3673_v0  ;;  %v3942_v2 = vcombine.high %v3673_v0, %v3673_v0  ;;  %vm3944_vm2 = vmor %vm589_vm0, %vm590_vm1  ;;  %v3356_v9 = vld [vmem:[#allocation6 + $0xc0] sm:$0xff]   ;;  %3037 = vmatprep.subr.bf16.mxu0 %v3355_v8  ;;  %v3359_v12 = vld [vmem:[#allocation6 + $0x48] sm:$0xff]   ;;  %vm644_vm3 = vcmask 1041408   ;;  %vm645_vm4 = vcmask 1045508   ;;  %s2666_s26 = sshll.u32 %s3922_s24, 5  ;;  %s2983_s13 = sshll.u32 %s3657_s21, 9 }
  0x8b   : > { %v3357_v10 = vld [vmem:[#allocation6] sm:$0xff]   ;;  %3077 = vmatprep.subr.bf16.mxu1 %v3356_v9  ;;  %v3360_v13 = vld [vmem:[#allocation6 + $0xc8] sm:$0xff]   ;;  %v3363_v16 = vld [vmem:[#allocation6 + $0x50] sm:$0xff]   ;;  %v3960_v41 = vshrl.u32 %v450_v35, 7  ;;  %s302_s28 = scalar_lea.vmem [#allocation11], %s2666_s26  ;;  %s4522_s18 = scalar_lea.hbm %s4616_s4, %s2983_s13 }
  0x8c   : > { %v2690_v4 = vrot.slane %v3940_v1, 9  ;;  %v594_v5 = vrot.slane %v3942_v2, 5  ;;  %v3358_v11 = vld [vmem:[#allocation6 + $0x80] sm:$0xff]   ;;  %3038 = vmatpush3.bf16.msra.mxu0 %v3357_v10  ;;  %v3361_v14 = vld [vmem:[#allocation6 + $0x8] sm:$0xff]   ;;  %v3364_v17 = vld [vmem:[#allocation6 + $0xd0] sm:$0xff]   ;;  %v2702_v43 = vrot.slane %v3940_v1, 10 }
  0x8d   : > { %3078 = vmatpush3.bf16.msra.mxu1 %v3358_v11  ;;  %3039 = vmatprep.subr.bf16.mxu0 %v3359_v12  ;;  %v3362_v15 = vld [vmem:[#allocation6 + $0x88] sm:$0xff]   ;;  %v3365_v18 = vld [vmem:[#allocation6 + $0x10] sm:$0xff]   ;;  %v3367_v20 = vld [vmem:[#allocation6 + $0x58] sm:$0xff]   ;;  %v649_v53 = vrot.slane %v3942_v2, 6  ;;  %v3977_v60 = vadd.s32 8, %v3960_v41  ;;  %vm477_vm6 = vcmp.ge.s32.totalorder %v3960_v41, 2 }
  0x8e   : > { %v595_v6 = vsel %vm3944_vm2, %v2690_v4, %v594_v5  ;;  %3079 = vmatprep.subr.bf16.mxu1 %v3360_v13  ;;  %v3366_v19 = vld [vmem:[#allocation6 + $0x90] sm:$0xff]   ;;  %v3368_v21 = vld [vmem:[#allocation6 + $0xd8] sm:$0xff]   ;;  %v3371_v24 = vld [vmem:[#allocation6 + $0x60] sm:$0xff]   ;;  %s2484_s30 = sshll.u32 %s302_s28, 4  ;;  %s2464_s29 = scalar_lea.sflag [#allocation5], %s3922_s24  ;;  %s4514_s30 = int_to_ptr.vmem [resolvable:$true] %s2484_s30 }
  0x8f   : > { %v3952_v7 = vcombine.low %v595_v6, %v595_v6  ;;  %v3369_v22 = vld [vmem:[#allocation6 + $0x18] sm:$0xff]   ;;  %v3372_v25 = vld [vmem:[#allocation6 + $0xe0] sm:$0xff]   ;;  %v3375_v28 = vld [vmem:[#allocation6 + $0x68] sm:$0xff]   ;;  %vm496_vm11 = vcmp.lt.s32.totalorder %v3977_v60, 10  ;;  %s3543_s16 = scalar_lea.vmem %s4514_s30, 512  ;;  %s3674_s12 = smov [#allocation11]  }
  0x90   : > { %3040 = vmatpush3.bf16.msra.mxu0 %v3361_v14  ;;  %v3370_v23 = vld [vmem:[#allocation6 + $0x98] sm:$0xff]   ;;  %v3373_v26 = vld [vmem:[#allocation6 + $0x20] sm:$0xff]   ;;  %v3376_v29 = vld [vmem:[#allocation6 + $0xe8] sm:$0xff]   ;;  %p3544_p13 = scmp.ne.s32.totalorder %s4514_s30, %s3543_s16  ;;  %s3547_s10 = sshll.u32 %s3674_s12, 4  ;;  %s3548_s10 = int_to_ptr.vmem [resolvable:$false] %s3547_s10 }
  0x91   : > { %2091 = vmatprep.mubr.bf16.mxu0 %v3952_v7  ;;  %3080 = vmatpush3.bf16.msra.mxu1 %v3362_v15  ;;  %v3374_v27 = vld [vmem:[#allocation6 + $0xa0] sm:$0xff]   ;;  %v3377_v30 = vld [vmem:[#allocation6 + $0x28] sm:$0xff]   ;;  %v3379_v32 = vld [vmem:[#allocation6 + $0x70] sm:$0xff]   ;;  %s3549_s11 = scalar_lea.vmem %s3548_s10, 1024  ;;  %p3550_p5 = scmp.lt.s32.totalorder %s4514_s30, %s3548_s10 }
  0x92   : > { %3041 = vmatprep.subr.bf16.mxu0 %v3363_v16  ;;  %3081 = vmatprep.subr.bf16.mxu1 %v3364_v17  ;;  %v3378_v31 = vld [vmem:[#allocation6 + $0xa8] sm:$0xff]   ;;  %v3380_v33 = vld [vmem:[#allocation6 + $0xf0] sm:$0xff]   ;;  %vm3956_vm5 = vmor %vm644_vm3, %vm645_vm4  ;;  %p3545_p6 = pnand %p3544_p13, %p3863_p10  ;;  %p3551_p7 = scmp.lt.s32.totalorder %s3549_s11, %s3543_s16 }
  0x93   : > { %v3381_v34 = vld [vmem:[#allocation6 + $0x30] sm:$0xff]   ;;  %v3383_v38 = vld [vmem:[#allocation6 + $0x78] sm:$0xff]   ;;  %v3966_v51 = vld [vmem:[#allocation8] ss:$0 sm:$0xff]  ;;  %v650_v4 = vsel %vm3956_vm5, %v2702_v43, %v649_v53 }
  0x94   : > { %3042 = vmatpush3.bf16.msra.mxu0 %v3365_v18  ;;  %v3382_v36 = vld [vmem:[#allocation6 + $0xb0] sm:$0xff]   ;;  %v3384_v39 = vld [vmem:[#allocation6 + $0xf8] sm:$0xff]   ;;  %v3968_v52 = vld [vmem:[#allocation9] ss:$0 sm:$0xff]  ;;  %v3987_v15 = vcombine.low %v650_v4, %v650_v4  ;;  %p3546_p3 = pneg %p3545_p6  ;;  %p3552_p9 = por %p3551_p7, %p3550_p5 }
  0x95   : > { %3082 = vmatpush3.bf16.msra.mxu1 %v3366_v19  ;;  %3043 = vmatprep.subr.bf16.mxu0 %v3367_v20  ;;  %v3385_v40 = vld [vmem:[#allocation6 + $0x38] sm:$0xff]   ;;  %v2715_v45 = vld [vmem:[%s3926_s7 + $0x14] sm:$0x3]  ;;  %v3387_v54 = vld [vmem:[#allocation6 + $0x140] sm:$0xff]  }
  0x96   : > { %3083 = vmatprep.subr.bf16.mxu1 %v3368_v21  ;;  %v3386_v42 = vld [vmem:[#allocation6 + $0xb8] sm:$0xff]   ;;  %v720_v48 = vunpack.c.l.bf16 %v2715_v45  ;;  %v3388_v59 = vld [vmem:[#allocation6 + $0x1c0] sm:$0xff]   ;;  %v3391_v5 = vld [vmem:[#allocation6 + $0x148] sm:$0xff]   ;;  %p3553_p0 = pnand %p3552_p9, %p3546_p3 }
  0x97   : > { %v2714_v44 = vld [vmem:[%s3926_s7 + $0x10] ss:$8 sps:$4 sm:$0xff]   ;;  %v2717_v46 = vld [vmem:[%s3926_s7 + $0x1c] sm:$0x3]  ;;  %v3389_v61 = vld [vmem:[#allocation6 + $0x100] sm:$0xff]  }
  0x98   : > { %3044 = vmatpush3.bf16.msra.mxu0 %v3369_v22  ;;  %v719_v47 = vunpack.c.l.bf16 %v2714_v44  ;;  %v721_v49 = vunpack.c.h.bf16 %v2714_v44  ;;  %v722_v50 = vunpack.c.l.bf16 %v2717_v46  ;;  %v743_v56 = vmul.f32 %v3966_v51, %v720_v48  ;;  %v3393_v11 = vld [vmem:[#allocation6 + $0x108] sm:$0xff]   ;;  %vm3998_vm12 = vmpackc.low %vm477_vm6, %vm477_vm6  ;;  %v3390_v21 = vld [vmem:[#allocation6 + $0x180] sm:$0xff]  }
  0x99   : > { %3084 = vmatpush3.bf16.msra.mxu1 %v3370_v23  ;;  %3045 = vmatprep.subr.bf16.mxu0 %v3371_v24  ;;  %v320_v22 = vld [vmem:[%s3926_s7 + $0x10] ss:$8 sps:$4 sm:$0xff]   ;;  %v3394_v43 = vld [vmem:[#allocation6 + $0x188] sm:$0xff]  }
  0x9a   : > { %3085 = vmatprep.subr.bf16.mxu1 %v3372_v25  ;;  %v742_v55 = vmul.f32 %v3966_v51, %v719_v47  ;;  %v744_v57 = vmul.f32 %v3966_v51, %v721_v49  ;;  %v745_v58 = vmul.f32 %v3966_v51, %v722_v50  ;;  %v766_v63 = vadd.f32 %v3968_v52, %v743_v56  ;;  %v3397_v46 = vld [vmem:[#allocation6 + $0x110] sm:$0xff]  }
  0x9b   : > { %v338_v44 = vunpack.c.h.bf16 %v320_v22  ;;  %v3396_v56 = vld [vmem:[#allocation6 + $0x1d0] sm:$0xff]  }
  0x9c   : > { %3046 = vmatpush3.bf16.msra.mxu0 %v3373_v26  ;;  %v765_v62 = vadd.f32 %v3968_v52, %v742_v55  ;;  %v767_v0 = vadd.f32 %v3968_v52, %v744_v57  ;;  %v768_v2 = vadd.f32 %v3968_v52, %v745_v58  ;;  %vm782_vm8 = vcmp.ge.f32.partialorder %v766_v63, 0.0  ;;  %v3398_v4 = vld [vmem:[#allocation6 + $0x190] sm:$0xff]  }
  0x9d   : > { %3086 = vmatpush3.bf16.msra.mxu1 %v3374_v27  ;;  %3047 = vmatprep.subr.bf16.mxu0 %v3375_v28  ;;  %v798_v8 = vmul.f32 0.01, %v766_v63  ;;  %v321_v27 = vld [vmem:[%s3926_s7 + $0x14] sm:$0x3]  ;;  %v323_v28 = vld [vmem:[%s3926_s7 + $0x1c] sm:$0x3]  ;;  %v361_v53 = vmul.f32 %v3966_v51, %v338_v44 }
  0x9e   : > { %3087 = vmatprep.subr.bf16.mxu1 %v3376_v29  ;;  %vm781_vm7 = vcmp.ge.f32.partialorder %v765_v62, 0.0  ;;  %vm783_vm9 = vcmp.ge.f32.partialorder %v767_v0, 0.0  ;;  %vm784_vm10 = vcmp.ge.f32.partialorder %v768_v2, 0.0  ;;  %v797_v6 = vmul.f32 0.01, %v765_v62  ;;  %v3395_v29 = vld [vmem:[#allocation6 + $0x150] sm:$0xff]  }
  0x9f   : > { %v799_v9 = vmul.f32 0.01, %v767_v0  ;;  %v800_v10 = vmul.f32 0.01, %v768_v2  ;;  %v814_v13 = vsel %vm782_vm8, %v766_v63, %v798_v8  ;;  %v339_v45 = vunpack.c.l.bf16 %v323_v28  ;;  %v324_v44 = vld [vmem:[%s3926_s7 + $0x20] ss:$8 sps:$4 sm:$0xff]  }
  0xa0   : > { %3048 = vmatpush3.bf16.msra.mxu0 %v3377_v30  ;;  %v813_v12 = vsel %vm781_vm7, %v765_v62, %v797_v6  ;;  %v894_v18 = vsel %vm496_vm11, %v814_v13, 0.0  ;;  %v3399_v62 = vld [vmem:[#allocation6 + $0x158] sm:$0xff]   ;;  %v384_v63 = vadd.f32 %v3968_v52, %v361_v53  ;;  %v327_v53 = vld [vmem:[%s3926_s7 + $0x2c] sm:$0x3] }
  0xa1   : > { %3088 = vmatpush3.bf16.msra.mxu1 %v3378_v31  ;;  %3049 = vmatprep.subr.bf16.mxu0 %v3379_v32  ;;  %v815_v14 = vsel %vm783_vm9, %v767_v0, %v799_v9  ;;  %v816_v16 = vsel %vm784_vm10, %v768_v2, %v800_v10  ;;  %v893_v17 = vsel %vm477_vm6, %v813_v12, 0.0  ;;  %v4007_v25 = vpack.c.bf16 %v894_v18, %v894_v18  ;;  %v3400_v9 = vld [vmem:[#allocation6 + $0x1d8] sm:$0xff]  }
  0xa2   : > { %3089 = vmatprep.subr.bf16.mxu1 %v3380_v33  ;;  %v895_v19 = vsel %vm477_vm6, %v815_v14, 0.0  ;;  %v896_v23 = vsel %vm496_vm11, %v816_v16, 0.0  ;;  %v4005_v24 = vpack.c.bf16 %v893_v17, %v893_v17  ;;  %v3017_v31 = vpack.c.bf16 %v815_v14, %v813_v12  ;;  %v3401_v17 = vld [vmem:[#allocation6 + $0x118] sm:$0xff]  }
  0xa3   : > { %v4009_v26 = vpack.c.bf16 %v895_v19, %v895_v19  ;;  %v4013_v30 = vpack.c.bf16 %v896_v23, %v896_v23  ;;  %v336_v32 = vunpack.c.l.bf16 %v320_v22  ;;  %v337_v33 = vunpack.c.l.bf16 %v321_v27  ;;  %v3403_v23 = vld [vmem:[#allocation6 + $0x160] sm:$0xff]  }
  0xa4   : > { %3050 = vmatpush3.bf16.msra.mxu0 %v3381_v34  ;;  %v2718_v34 = vld [vmem:[%s3926_s7 + $0x20] ss:$8 sps:$4 sm:$0xff]   ;;  %v2752_v35 = vrot.slane %v4005_v24, 9  ;;  %3018 = vmatprep.mubr.msk.bf16.mxu1 %vm3998_vm12, %v3017_v31  ;;  %vm400_vm15 = vcmp.ge.f32.partialorder %v384_v63, 0.0  ;;  %v416_v10 = vmul.f32 0.01, %v384_v63 }
  0xa5   : > { %3090 = vmatpush3.bf16.msra.mxu1 %v3382_v36  ;;  %3051 = vmatprep.subr.bf16.mxu0 %v3383_v38  ;;  %v971_v36 = vrot.slane %v4007_v25, 5  ;;  %v2753_v38 = vrot.slane %v4009_v26, 9  ;;  %v359_v47 = vmul.f32 %v3966_v51, %v336_v32  ;;  %v360_v48 = vmul.f32 %v3966_v51, %v337_v33 }
  0xa6   : > { %3091 = vmatprep.subr.bf16.mxu1 %v3384_v39  ;;  %v3392_v39 = vld [vmem:[#allocation6 + $0x1c8] sm:$0xff]   ;;  %v723_v49 = vunpack.c.l.bf16 %v2718_v34  ;;  %v2765_v50 = vrot.slane %v4009_v26, 10  ;;  %v725_v55 = vunpack.c.h.bf16 %v2718_v34  ;;  %v432_v18 = vsel %vm400_vm15, %v384_v63, %v416_v10  ;;  %v3402_v34 = vld [vmem:[#allocation6 + $0x198] sm:$0xff]  }
  0xa7   : > { %v4031_v57 = vsel %vm3944_vm2, %v2752_v35, %v971_v36  ;;  %v382_v58 = vadd.f32 %v3968_v52, %v359_v47  ;;  %v519_v27 = vsel %vm477_vm6, %v432_v18, 0.0 }
  0xa8   : > { %3052 = vmatpush3.bf16.msra.mxu0 %v3385_v40  ;;  %v975_v40 = vrot.slane %v4013_v30, 5  ;;  %v748_v2 = vmul.f32 %v3966_v51, %v725_v55  ;;  %v2930_v32 = vpack.c.bf16 %v519_v27, %v519_v27 }
  0xa9   : > { %3092 = vmatpush3.bf16.msra.mxu1 %v3386_v42  ;;  %3117 = vmatprep.subr.bf16.mxu0 %v3387_v54  ;;  %v2764_v42 = vrot.slane %v4005_v24, 10  ;;  %v362_v54 = vmul.f32 %v3966_v51, %v339_v45  ;;  %vm398_vm13 = vcmp.ge.f32.partialorder %v382_v58, 0.0  ;;  %v414_v6 = vmul.f32 0.01, %v382_v58  ;;  %v325_v45 = vld [vmem:[%s3926_s7 + $0x24] sm:$0x3] }
  0xaa   : > { %3157 = vmatprep.subr.bf16.mxu1 %v3388_v59  ;;  %v383_v59 = vadd.f32 %v3968_v52, %v360_v48  ;;  %v771_v16 = vadd.f32 %v3968_v52, %v748_v2  ;;  %v2693_v47 = vrot.slane %v2930_v32, 9  ;;  %v341_v10 = vunpack.c.l.bf16 %v325_v45 }
  0xab   : > { %2092 = vmatmul.mubr.bf16.vlgmr.msra.gmra.mrb[0].mxu0 %v3940_v1  ;;  %v385_v0 = vadd.f32 %v3968_v52, %v362_v54  ;;  %v4040_v12 = vsel %vm398_vm13, %v382_v58, %v414_v6  ;;  %v3404_v54 = vld [vmem:[#allocation6 + $0x1e0] sm:$0xff]   ;;  %v2705_v6 = vrot.slane %v2930_v32, 10  ;;  %v3409_v32 = vld [vmem:[#allocation6 + $0x128] sm:$0xff]  }
  0xac   : > { %3118 = vmatpush3.bf16.msra.mxu0 %v3389_v61  ;;  %2157 = vmatmul.mubr.bf16.vlgmr.msra.gmra.mrb[0].mxu1 %v3987_v15  ;;  %v746_v61 = vmul.f32 %v3966_v51, %v723_v49  ;;  %vm399_vm14 = vcmp.ge.f32.partialorder %v383_v59, 0.0  ;;  %v415_v8 = vmul.f32 0.01, %v383_v59  ;;  %vm787_vm4 = vcmp.ge.f32.partialorder %v771_v16, 0.0 }
  0xad   : > { %3119 = vmatprep.subr.bf16.mxu0 %v3391_v5  ;;  %3158 = vmatpush3.bf16.msra.mxu1 %v3390_v21  ;;  %v1023_v5 = vrot.slane %v4007_v25, 6  ;;  %vm401_vm0 = vcmp.ge.f32.partialorder %v385_v0, 0.0  ;;  %v517_v21 = vsel %vm477_vm6, %v4040_v12, 0.0 }
  0xae   : > { %3159 = vmatprep.subr.bf16.mxu1 %v3392_v39  ;;  %v431_v13 = vsel %vm399_vm14, %v383_v59, %v415_v8  ;;  %v769_v14 = vadd.f32 %v3968_v52, %v746_v61  ;;  %v3405_v61 = vld [vmem:[#allocation6 + $0x120] sm:$0xff]  }
  0xaf   : > { %v518_v22 = vsel %vm496_vm11, %v431_v13, 0.0  ;;  %v342_v13 = vunpack.c.h.bf16 %v324_v44 }
  0xb0   : > { %3120 = vmatpush3.bf16.msra.mxu0 %v3393_v11  ;;  %v417_v11 = vmul.f32 0.01, %v385_v0  ;;  %v2929_v31 = vpack.c.bf16 %v518_v22, %v518_v22  ;;  %vm785_vm1 = vcmp.ge.f32.partialorder %v769_v14, 0.0  ;;  %v801_v39 = vmul.f32 0.01, %v769_v14 }
  0xb1   : > { %3121 = vmatprep.subr.bf16.mxu0 %v3395_v29  ;;  %3160 = vmatpush3.bf16.msra.mxu1 %v3394_v43  ;;  %v2928_v29 = vpack.c.bf16 %v517_v21, %v517_v21  ;;  %v803_v43 = vmul.f32 0.01, %v771_v16  ;;  %v364_v22 = vmul.f32 %v3966_v51, %v341_v10 }
  0xb2   : > { %3161 = vmatprep.subr.bf16.mxu1 %v3396_v56  ;;  %v433_v19 = vsel %vm401_vm0, %v385_v0, %v417_v11  ;;  %v602_v36 = vrot.slane %v2929_v31, 5  ;;  %v817_v56 = vsel %vm785_vm1, %v769_v14, %v801_v39  ;;  %v657_v59 = vrot.slane %v2929_v31, 6  ;;  %v3406_v11 = vld [vmem:[#allocation6 + $0x1a0] sm:$0xff]   ;;  %v3410_v39 = vld [vmem:[#allocation6 + $0x1a8] sm:$0xff]  }
  0xb3   : > { %v520_v28 = vsel %vm496_vm11, %v433_v19, 0.0  ;;  %v2692_v35 = vrot.slane %v2928_v29, 9  ;;  %v2704_v49 = vrot.slane %v2928_v29, 10  ;;  %v819_v58 = vsel %vm787_vm4, %v771_v16, %v803_v43 }
  0xb4   : > { %3122 = vmatpush3.bf16.msra.mxu0 %v3397_v46  ;;  %v2931_v33 = vpack.c.bf16 %v520_v28, %v520_v28  ;;  %v4061_v46 = vsel %vm3944_vm2, %v2753_v38, %v975_v40  ;;  %v3020_v63 = vpack.c.bf16 %v819_v58, %v817_v56  ;;  %v3008_v38 = vpack.c.bf16 %v432_v18, %v4040_v12  ;;  %v2722_v40 = vld [vmem:[%s3926_s7 + $0x30] ss:$8 sps:$4 sm:$0xff]   ;;  %v3407_v12 = vld [vmem:[#allocation6 + $0x168] sm:$0xff]  }
  0xb5   : > { %3123 = vmatprep.subr.bf16.mxu0 %v3399_v62  ;;  %3162 = vmatpush3.bf16.msra.mxu1 %v3398_v4  ;;  %v603_v55 = vsel %vm3944_vm2, %v2692_v35, %v602_v36  ;;  %v2760_v0 = vcombine.low %v4031_v57, %v4061_v46  ;;  %v658_v4 = vsel %vm3956_vm5, %v2704_v49, %v657_v59  ;;  %v343_v14 = vunpack.c.l.bf16 %v327_v53  ;;  %v3411_v59 = vld [vmem:[#allocation6 + $0x170] sm:$0xff]  }
  0xb6   : > { %3163 = vmatprep.subr.bf16.mxu1 %v3400_v9  ;;  %v606_v48 = vrot.slane %v2931_v33, 5  ;;  %3021 = vmatprep.mubr.msk.bf16.mxu1 %vm3998_vm12, %v3020_v63  ;;  %v661_v8 = vrot.slane %v2931_v33, 6  ;;  %v340_v9 = vunpack.c.l.bf16 %v324_v44  ;;  %v727_v16 = vunpack.c.l.bf16 %v2722_v40 }
  0xb7   : > { %v897_v18 = vsel %vm477_vm6, %v817_v56, 0.0  ;;  %v365_v28 = vmul.f32 %v3966_v51, %v342_v13  ;;  %v366_v29 = vmul.f32 %v3966_v51, %v343_v14  ;;  %v4091_v33 = vsel %vm477_vm6, %v819_v58, 0.0  ;;  %v3414_v14 = vld [vmem:[#allocation6 + $0x1b0] sm:$0xff]  }
  0xb8   : > { %3124 = vmatpush3.bf16.msra.mxu0 %v3401_v17  ;;  %v607_v62 = vsel %vm3944_vm2, %v2693_v47, %v606_v48  ;;  %v729_v17 = vunpack.c.h.bf16 %v2722_v40  ;;  %v662_v19 = vsel %vm3956_vm5, %v2705_v6, %v661_v8  ;;  %v363_v21 = vmul.f32 %v3966_v51, %v340_v9  ;;  %v328_v40 = vld [vmem:[%s3926_s7 + $0x30] ss:$8 sps:$4 sm:$0xff]  }
  0xb9   : > { %3125 = vmatprep.subr.bf16.mxu0 %v3403_v23  ;;  %3164 = vmatpush3.bf16.msra.mxu1 %v3402_v34  ;;  %v2699_v2 = vcombine.low %v603_v55, %v607_v62  ;;  %v3408_v23 = vld [vmem:[#allocation6 + $0x1e8] sm:$0xff]   ;;  %v2711_v27 = vcombine.low %v658_v4, %v662_v19  ;;  %v750_v31 = vmul.f32 %v3966_v51, %v727_v16  ;;  %v1027_v47 = vrot.slane %v4013_v30, 6  ;;  %v3413_v4 = vld [vmem:[#allocation6 + $0x130] sm:$0xff]  }
  0xba   : > { %3165 = vmatprep.subr.bf16.mxu1 %v3404_v54  ;;  %v386_v34 = vadd.f32 %v3968_v52, %v363_v21  ;;  %v387_v35 = vadd.f32 %v3968_v52, %v364_v22  ;;  %v752_v36 = vmul.f32 %v3966_v51, %v729_v17  ;;  %v388_v43 = vadd.f32 %v3968_v52, %v365_v28  ;;  %v329_v22 = vld [vmem:[%s3926_s7 + $0x34] sm:$0x3] }
  0xbb   : > { %2099 = vmatprep.mubr.bf16.mxu0 %v2699_v2  ;;  %2165 = vmatmul.mubr.bf16.gmra.mrb[4].mxu1 %v2711_v27  ;;  %v389_v44 = vadd.f32 %v3968_v52, %v366_v29  ;;  %v773_v45 = vadd.f32 %v3968_v52, %v750_v31  ;;  %v3412_v2 = vld [vmem:[#allocation6 + $0x1f0] sm:$0xff]   ;;  %v4113_v16 = vpack.c.bf16 %v897_v18, %v897_v18 }
  0xbc   : > { %3126 = vmatpush3.bf16.msra.mxu0 %v3405_v61  ;;  %vm402_vm7 = vcmp.ge.f32.partialorder %v386_v34, 0.0  ;;  %vm403_vm8 = vcmp.ge.f32.partialorder %v387_v35, 0.0  ;;  %v418_v48 = vmul.f32 0.01, %v386_v34  ;;  %v419_v49 = vmul.f32 0.01, %v387_v35 }
  0xbd   : > { %3009 = vmatmul.mubr.msk.bf16.gmra.mrb[4].mxu0 %vm3998_vm12, %v3008_v38  ;;  %3166 = vmatpush3.bf16.msra.mxu1 %v3406_v11  ;;  %vm404_vm9 = vcmp.ge.f32.partialorder %v388_v43, 0.0  ;;  %vm405_vm10 = vcmp.ge.f32.partialorder %v389_v44, 0.0  ;;  %v420_v53 = vmul.f32 0.01, %v388_v43  ;;  %v421_v54 = vmul.f32 0.01, %v389_v44 }
  0xbe   : > { %3127 = vmatprep.subr.bf16.mxu0 %v3407_v12  ;;  %3167 = vmatprep.subr.bf16.mxu1 %v3408_v23  ;;  %v4100_v55 = vsel %vm402_vm7, %v386_v34, %v418_v48  ;;  %v435_v56 = vsel %vm403_vm8, %v387_v35, %v419_v49  ;;  %v775_v58 = vadd.f32 %v3968_v52, %v752_v36  ;;  %vm789_vm13 = vcmp.ge.f32.partialorder %v773_v45, 0.0  ;;  %v331_v23 = vld [vmem:[%s3926_s7 + $0x3c] sm:$0x3] }
  0xbf   : > { %v436_v61 = vsel %vm404_vm9, %v388_v43, %v420_v53  ;;  %v437_v62 = vsel %vm405_vm10, %v389_v44, %v421_v54  ;;  %v521_v63 = vsel %vm477_vm6, %v4100_v55, 0.0  ;;  %v522_v38 = vsel %vm496_vm11, %v435_v56, 0.0  ;;  %v3415_v34 = vld [vmem:[#allocation6 + $0x178] sm:$0xff]  }
  0xc0   : > { %3128 = vmatpush3.bf16.msra.mxu0 %v3409_v32  ;;  %v523_v6 = vsel %vm477_vm6, %v436_v61, 0.0  ;;  %v524_v8 = vsel %vm496_vm11, %v437_v62, 0.0  ;;  %v2932_v9 = vpack.c.bf16 %v521_v63, %v521_v63  ;;  %v2933_v10 = vpack.c.bf16 %v522_v38, %v522_v38  ;;  %v2726_v32 = vld [vmem:[%s3926_s7 + $0x40] ss:$8 sps:$4 sm:$0xff]   ;;  %v3416_v49 = vld [vmem:[#allocation6 + $0x1f8] sm:$0xff]  }
  0xc1   : > { %3168 = vmatpush3.bf16.msra.mxu1 %v3410_v39  ;;  %3129 = vmatprep.subr.bf16.mxu0 %v3411_v59  ;;  %v2934_v11 = vpack.c.bf16 %v523_v6, %v523_v6  ;;  %v2935_v12 = vpack.c.bf16 %v524_v8, %v524_v8  ;;  %vm791_vm14 = vcmp.ge.f32.partialorder %v775_v58, 0.0  ;;  %v805_v13 = vmul.f32 0.01, %v773_v45  ;;  %v3418_v38 = vld [vmem:[#allocation6 + $0x1b8] sm:$0xff]   ;;  %v4151_v8 = vld [vmem:[#allocation6 + $0x200] sm:$0xff]  }
  0xc2   : > { %3169 = vmatprep.subr.bf16.mxu1 %v3412_v2  ;;  %v2694_v17 = vrot.slane %v2932_v9, 9  ;;  %v610_v19 = vrot.slane %v2933_v10, 5  ;;  %v807_v21 = vmul.f32 0.01, %v775_v58  ;;  %v2706_v31 = vrot.slane %v2932_v9, 10 }
  0xc3   : > { %v2695_v27 = vrot.slane %v2934_v11, 9  ;;  %v614_v28 = vrot.slane %v2935_v12, 5  ;;  %v821_v29 = vsel %vm789_vm13, %v773_v45, %v805_v13  ;;  %v665_v18 = vrot.slane %v2933_v10, 6 }
  0xc4   : > { %3130 = vmatpush3.bf16.msra.mxu0 %v3413_v4  ;;  %v611_v35 = vsel %vm3944_vm2, %v2694_v17, %v610_v19  ;;  %v823_v36 = vsel %vm791_vm14, %v775_v58, %v807_v21  ;;  %v344_v39 = vunpack.c.l.bf16 %v328_v40  ;;  %v4126_v44 = vsel %vm477_vm6, %v821_v29, 0.0  ;;  %v3417_v58 = vld [vmem:[#allocation6 + $0x138] sm:$0xff]  }
  0xc5   : > { %3170 = vmatpush3.bf16.msra.mxu1 %v3414_v14  ;;  %v615_v43 = vsel %vm3944_vm2, %v2695_v27, %v614_v28  ;;  %v3023_v48 = vpack.c.bf16 %v823_v36, %v821_v29  ;;  %v3011_v45 = vpack.c.bf16 %v436_v61, %v4100_v55  ;;  %3131 = vmatprep.subr.bf16.mxu0 %v3415_v34  ;;  %v2707_v56 = vrot.slane %v2934_v11, 10 }
  0xc6   : > { %v2700_v53 = vcombine.low %v611_v35, %v615_v43  ;;  %v666_v54 = vsel %vm3956_vm5, %v2706_v31, %v665_v18  ;;  %v4137_v59 = vsel %vm3956_vm5, %v2764_v42, %v1023_v5  ;;  %v669_v55 = vrot.slane %v2935_v12, 6  ;;  %3171 = vmatprep.subr.bf16.mxu1 %v3416_v49 }
  0xc7   : > { %3024 = vmatprep.mubr.msk.bf16.mxu1 %vm3998_vm12, %v3023_v48  ;;  %v345_v61 = vunpack.c.l.bf16 %v329_v22  ;;  %v346_v62 = vunpack.c.h.bf16 %v328_v40  ;;  %v347_v63 = vunpack.c.l.bf16 %v331_v23  ;;  %v903_v2 = vsel %vm477_vm6, %v823_v36, 0.0 }
  0xc8   : > { %2107 = vmatprep.mubr.bf16.mxu0 %v2700_v53  ;;  %v367_v25 = vmul.f32 %v3966_v51, %v344_v39  ;;  %v731_v24 = vunpack.c.l.bf16 %v2726_v32  ;;  %v733_v4 = vunpack.c.h.bf16 %v2726_v32  ;;  %3132 = vmatpush3.bf16.msra.mxu0 %v3417_v58  ;;  %v670_v42 = vsel %vm3956_vm5, %v2707_v56, %v669_v55 }
  0xc9   : > { %3012 = vmatmul.mubr.msk.bf16.gmra.mrb[8].mxu0 %vm3998_vm12, %v3011_v45  ;;  %v368_v5 = vmul.f32 %v3966_v51, %v345_v61  ;;  %v369_v40 = vmul.f32 %v3966_v51, %v346_v62  ;;  %v370_v6 = vmul.f32 %v3966_v51, %v347_v63  ;;  %v2712_v9 = vcombine.low %v666_v54, %v670_v42  ;;  %v2776_v61 = vld [vmem:[%s3926_s7 + $0x20] ss:$8 sps:$4 sm:$0xff]   ;;  %v2777_v62 = vld [vmem:[%s3926_s7 + $0x24] sm:$0x3] }
  0xca   : > { %v390_v10 = vadd.f32 %v3968_v52, %v367_v25  ;;  %v754_v11 = vmul.f32 %v3966_v51, %v731_v24  ;;  %v756_v12 = vmul.f32 %v3966_v51, %v733_v4  ;;  %3172 = vmatpush3.bf16.msra.mxu1 %v3418_v38  ;;  %v4165_v19 = vsel %vm3956_vm5, %v2765_v50, %v1027_v47  ;;  %v2719_v4 = vld [vmem:[%s3926_s7 + $0x24] sm:$0x3] }
  0xcb   : > { %v391_v13 = vadd.f32 %v3968_v52, %v368_v5  ;;  %v392_v14 = vadd.f32 %v3968_v52, %v369_v40  ;;  %v393_v17 = vadd.f32 %v3968_v52, %v370_v6  ;;  %3209 = vmatprep.subr.bf16.mxu0 %v4151_v8  ;;  %2173 = vmatmul.mubr.bf16.gmra.mrb[8].mxu1 %v2712_v9 }
  0xcc   : > { %vm406_vm15 = vcmp.ge.f32.partialorder %v390_v10, 0.0  ;;  %v422_v21 = vmul.f32 0.01, %v390_v10  ;;  %v777_v22 = vadd.f32 %v3968_v52, %v754_v11  ;;  %v779_v23 = vadd.f32 %v3968_v52, %v756_v12  ;;  %3233 = vmatprep.subr.bf16.mxu1 %v4151_v8 }
  0xcd   : > { %vm407_vm0 = vcmp.ge.f32.partialorder %v391_v13, 0.0  ;;  %vm408_vm1 = vcmp.ge.f32.partialorder %v392_v14, 0.0  ;;  %vm409_vm4 = vcmp.ge.f32.partialorder %v393_v17, 0.0  ;;  %v423_v30 = vmul.f32 0.01, %v391_v13 }
  0xce   : > { %v424_v26 = vmul.f32 0.01, %v392_v14  ;;  %v425_v27 = vmul.f32 0.01, %v393_v17  ;;  %v438_v28 = vsel %vm406_vm15, %v390_v10, %v422_v21  ;;  %vm793_vm7 = vcmp.ge.f32.partialorder %v777_v22, 0.0 }
  0xcf   : > { %v439_v50 = vsel %vm407_vm0, %v391_v13, %v423_v30  ;;  %v525_v47 = vsel %vm477_vm6, %v438_v28, 0.0  ;;  %vm795_vm8 = vcmp.ge.f32.partialorder %v779_v23, 0.0  ;;  %v809_v29 = vmul.f32 0.01, %v777_v22 }
  0xd0   : > { %v440_v31 = vsel %vm408_vm1, %v392_v14, %v424_v26  ;;  %v441_v32 = vsel %vm409_vm4, %v393_v17, %v425_v27  ;;  %v526_v34 = vsel %vm496_vm11, %v439_v50, 0.0  ;;  %v2936_v35 = vpack.c.bf16 %v525_v47, %v525_v47  ;;  %v2721_v14 = vld [vmem:[%s3926_s7 + $0x2c] sm:$0x3] }
  0xd1   : > { %v527_v36 = vsel %vm477_vm6, %v440_v31, 0.0  ;;  %v528_v18 = vsel %vm496_vm11, %v441_v32, 0.0  ;;  %v2937_v39 = vpack.c.bf16 %v526_v34, %v526_v34  ;;  %v811_v43 = vmul.f32 0.01, %v779_v23 }
  0xd2   : > { %v2938_v48 = vpack.c.bf16 %v527_v36, %v527_v36  ;;  %v2939_v45 = vpack.c.bf16 %v528_v18, %v528_v18  ;;  %v2696_v49 = vrot.slane %v2936_v35, 9  ;;  %v4180_v53 = vsel %vm793_vm7, %v777_v22, %v809_v29 }
  0xd3   : > { %v4184_v54 = vpack.c.bf16 %v4091_v33, %v4091_v33  ;;  %v4188_v56 = vpack.c.bf16 %v4126_v44, %v4126_v44  ;;  %v618_v58 = vrot.slane %v2937_v39, 5  ;;  %v4191_v55 = vsel %vm795_vm8, %v779_v23, %v811_v43  ;;  %v2779_v33 = vld [vmem:[%s3926_s7 + $0x2c] sm:$0x3] }
  0xd4   : > { %v4195_v63 = vpack.c.bf16 %v903_v2, %v903_v2  ;;  %v2697_v38 = vrot.slane %v2938_v48, 9  ;;  %v622_v25 = vrot.slane %v2939_v45, 5  ;;  %v2772_v24 = vcombine.low %v4137_v59, %v4165_v19 }
  0xd5   : > { %v619_v44 = vsel %vm3944_vm2, %v2696_v49, %v618_v58  ;;  %v3026_v42 = vpack.c.bf16 %v4191_v55, %v4180_v53  ;;  %v3014_v5 = vpack.c.bf16 %v440_v31, %v438_v28  ;;  %v2708_v40 = vrot.slane %v2936_v35, 10  ;;  %v4218_v28 = vld [vmem:[%s3926_s7 + $0x30] ss:$8 sps:$4 sm:$0xff]  }
  0xd6   : > { %v623_v2 = vsel %vm3944_vm2, %v2697_v38, %v622_v25  ;;  %v673_v6 = vrot.slane %v2937_v39, 6  ;;  %v2709_v9 = vrot.slane %v2938_v48, 10  ;;  %v677_v10 = vrot.slane %v2939_v45, 6 }
  0xd7   : > { %v2701_v11 = vcombine.low %v619_v44, %v623_v2  ;;  %3027 = vmatprep.mubr.msk.bf16.mxu1 %vm3998_vm12, %v3026_v42  ;;  %v1093_v59 = vunpack.c.l.bf16 %v2776_v61  ;;  %v1094_v12 = vunpack.c.l.bf16 %v2777_v62  ;;  %v1095_v13 = vunpack.c.h.bf16 %v2776_v61  ;;  %v4236_v44 = vld [vmem:[#allocation6 + $0x208] sm:$0xff]  }
  0xd8   : > { %v674_v17 = vsel %vm3956_vm5, %v2708_v40, %v673_v6  ;;  %v678_v19 = vsel %vm3956_vm5, %v2709_v9, %v677_v10  ;;  %v1096_v21 = vunpack.c.l.bf16 %v2779_v33  ;;  %v724_v22 = vunpack.c.l.bf16 %v2719_v4  ;;  %v2781_v6 = vld [vmem:[%s3926_s7 + $0x34] sm:$0x3] }
  0xd9   : > { %2115 = vmatprep.mubr.bf16.mxu0 %v2701_v11  ;;  %v2713_v23 = vcombine.low %v674_v17, %v678_v19  ;;  %v1116_v30 = vmul.f32 %v3966_v51, %v1093_v59  ;;  %v1117_v26 = vmul.f32 %v3966_v51, %v1094_v12  ;;  %v1118_v27 = vmul.f32 %v3966_v51, %v1095_v13  ;;  %v2783_v19 = vld [vmem:[%s3926_s7 + $0x3c] sm:$0x3] }
  0xda   : > { %3015 = vmatmul.mubr.msk.bf16.gmra.mrb[12].mxu0 %vm3998_vm12, %v3014_v5  ;;  %v1119_v50 = vmul.f32 %v3966_v51, %v1096_v21  ;;  %v726_v47 = vunpack.c.l.bf16 %v2721_v14  ;;  %v747_v29 = vmul.f32 %v3966_v51, %v724_v22  ;;  %v2766_v31 = vrot.slane %v4113_v16, 10 }
  0xdb   : > { %2181 = vmatmul.mubr.bf16.gmra.mrb[12].mxu1 %v2713_v23  ;;  %2221 = vmatprep.mubr.bf16.mxu0 %v2772_v24  ;;  %v1139_v32 = vadd.f32 %v3968_v52, %v1116_v30  ;;  %v1140_v34 = vadd.f32 %v3968_v52, %v1117_v26  ;;  %v1141_v35 = vadd.f32 %v3968_v52, %v1118_v27  ;;  %v2767_v36 = vrot.slane %v4184_v54, 10 }
  0xdc   : > { %v1142_v18 = vadd.f32 %v3968_v52, %v1119_v50  ;;  %v749_v39 = vmul.f32 %v3966_v51, %v726_v47  ;;  %v770_v43 = vadd.f32 %v3968_v52, %v747_v29  ;;  %v1097_v48 = vunpack.c.l.bf16 %v4218_v28 }
  0xdd   : > { %vm1155_vm9 = vcmp.ge.f32.partialorder %v1139_v32, 0.0  ;;  %vm1156_vm10 = vcmp.ge.f32.partialorder %v1140_v34, 0.0  ;;  %vm1157_vm13 = vcmp.ge.f32.partialorder %v1141_v35, 0.0  ;;  %v1171_v45 = vmul.f32 0.01, %v1139_v32 }
  0xde   : > { %vm1158_vm14 = vcmp.ge.f32.partialorder %v1142_v18, 0.0  ;;  %v1172_v49 = vmul.f32 0.01, %v1140_v34  ;;  %v1173_v58 = vmul.f32 0.01, %v1141_v35  ;;  %v772_v61 = vadd.f32 %v3968_v52, %v749_v39 }
  0xdf   : > { %v1174_v62 = vmul.f32 0.01, %v1142_v18  ;;  %v1187_v38 = vsel %vm1155_vm9, %v1139_v32, %v1171_v45  ;;  %vm786_vm15 = vcmp.ge.f32.partialorder %v770_v43, 0.0  ;;  %v802_v25 = vmul.f32 0.01, %v770_v43 }
  0xe0   : > { %v1188_v24 = vsel %vm1156_vm10, %v1140_v34, %v1172_v49  ;;  %v1189_v33 = vsel %vm1157_vm13, %v1141_v35, %v1173_v58  ;;  %v1267_v4 = vsel %vm477_vm6, %v1187_v38, 0.0  ;;  %vm788_vm0 = vcmp.ge.f32.partialorder %v772_v61, 0.0 }
  0xe1   : > { %v1190_v42 = vsel %vm1158_vm14, %v1142_v18, %v1174_v62  ;;  %v1268_v5 = vsel %vm496_vm11, %v1188_v24, 0.0  ;;  %v1269_v40 = vsel %vm477_vm6, %v1189_v33, 0.0  ;;  %v4242_v2 = vpack.c.bf16 %v1267_v4, %v1267_v4 }
  0xe2   : > { %v1270_v9 = vsel %vm496_vm11, %v1190_v42, 0.0  ;;  %v4247_v10 = vpack.c.bf16 %v1268_v5, %v1268_v5  ;;  %v4249_v11 = vpack.c.bf16 %v1269_v40, %v1269_v40  ;;  %v3029_v59 = vpack.c.bf16 %v1189_v33, %v1187_v38  ;;  %2222 = vmatmul.mubr.bf16.vlgmr.msra.gmra.mrb[16].mxu0 %v2760_v0  ;;  %v4265_v0 = vld [vmem:[#allocation6 + $0x210] sm:$0xff]   ;;  %v4305_v42 = vld [vmem:[#allocation6 + $0x220] sm:$0xff]  }
  0xe3   : > { %v4254_v12 = vpack.c.bf16 %v1270_v9, %v1270_v9  ;;  %v2814_v13 = vrot.slane %v4242_v2, 9  ;;  %3210 = vmatpush3.bf16.msra.mxu0 %v4151_v8  ;;  %v804_v14 = vmul.f32 0.01, %v772_v61  ;;  %v818_v17 = vsel %vm786_vm15, %v770_v43, %v802_v25 }
  0xe4   : > { %v1345_v21 = vrot.slane %v4247_v10, 5  ;;  %v2815_v22 = vrot.slane %v4249_v11, 9  ;;  %3211 = vmatprep.subr.bf16.mxu0 %v4236_v44  ;;  %v898_v57 = vsel %vm496_vm11, %v818_v17, 0.0  ;;  %v1098_v46 = vunpack.c.l.bf16 %v2781_v6 }
  0xe5   : > { %v1349_v23 = vrot.slane %v4254_v12, 5  ;;  %v820_v30 = vsel %vm788_vm0, %v772_v61, %v804_v14  ;;  %v2949_v26 = vpack.c.bf16 %v898_v57, %v898_v57  ;;  %v1099_v27 = vunpack.c.h.bf16 %v4218_v28 }
  0xe6   : > { %v1346_v50 = vsel %vm3944_vm2, %v2814_v13, %v1345_v21  ;;  %v900_v47 = vsel %vm496_vm11, %v820_v30, 0.0  ;;  %v1100_v29 = vunpack.c.l.bf16 %v2783_v19  ;;  %v1120_v32 = vmul.f32 %v3966_v51, %v1097_v48  ;;  %v4285_v48 = vld [vmem:[#allocation6 + $0x218] sm:$0xff]  }
  0xe7   : > { %v1350_v34 = vsel %vm3944_vm2, %v2815_v22, %v1349_v23  ;;  %3212 = vmatpush3.bf16.msra.mxu0 %v4236_v44  ;;  %v4278_v35 = vpack.c.bf16 %v900_v47, %v900_v47  ;;  %v1031_v18 = vrot.slane %v2949_v26, 6  ;;  %v1121_v39 = vmul.f32 %v3966_v51, %v1098_v46  ;;  %v4339_v46 = vld [vmem:[#allocation6 + $0x228] sm:$0xff]  }
  0xe8   : > { %v2822_v28 = vcombine.low %v1346_v50, %v1350_v34  ;;  %v1122_v43 = vmul.f32 %v3966_v51, %v1099_v27  ;;  %v1123_v45 = vmul.f32 %v3966_v51, %v1100_v29  ;;  %v1143_v49 = vadd.f32 %v3968_v52, %v1120_v32  ;;  %3213 = vmatprep.subr.bf16.mxu0 %v4265_v0  ;;  %v2725_v27 = vld [vmem:[%s3926_s7 + $0x3c] sm:$0x3]  ;;  %v2784_v34 = vld [vmem:[%s3926_s7 + $0x40] ss:$8 sps:$4 sm:$0xff]  }
  0xe9   : > { %v1032_v58 = vsel %vm3956_vm5, %v2766_v31, %v1031_v18  ;;  %v1035_v61 = vrot.slane %v4278_v35, 6  ;;  %v1144_v62 = vadd.f32 %v3968_v52, %v1121_v39  ;;  %v2754_v38 = vrot.slane %v4113_v16, 9 }
  0xea   : > { %2286 = vmatprep.mubr.bf16.mxu1 %v2822_v28  ;;  %v1145_v51 = vadd.f32 %v3968_v52, %v1122_v43  ;;  %v1146_v25 = vadd.f32 %v3968_v52, %v1123_v45  ;;  %vm1159_vm1 = vcmp.ge.f32.partialorder %v1143_v49, 0.0  ;;  %v1175_v24 = vmul.f32 0.01, %v1143_v49 }
  0xeb   : > { %3030 = vmatmul.mubr.msk.bf16.vlgmr.msra.gmra.mrb[16].mxu1 %vm3998_vm12, %v3029_v59  ;;  %v1036_v31 = vsel %vm3956_vm5, %v2767_v36, %v1035_v61  ;;  %vm1160_vm4 = vcmp.ge.f32.partialorder %v1144_v62, 0.0  ;;  %v1176_v33 = vmul.f32 0.01, %v1144_v62  ;;  %v979_v4 = vrot.slane %v2949_v26, 5  ;;  %3214 = vmatpush3.bf16.msra.mxu0 %v4265_v0  ;;  %v2723_v26 = vld [vmem:[%s3926_s7 + $0x34] sm:$0x3] }
  0xec   : > { %3241 = vmatpush3.bf16.msra.mxu1 %v4151_v8  ;;  %v2773_v16 = vcombine.low %v1032_v58, %v1036_v31  ;;  %vm1161_vm7 = vcmp.ge.f32.partialorder %v1145_v51, 0.0  ;;  %vm1162_vm8 = vcmp.ge.f32.partialorder %v1146_v25, 0.0  ;;  %v1177_v52 = vmul.f32 0.01, %v1145_v51  ;;  %3215 = vmatprep.subr.bf16.mxu0 %v4285_v48 }
  0xed   : > { %v905_v5 = vsel %vm477_vm6, %v4180_v53, 0.0  ;;  %3234 = vmatprep.subr.bf16.mxu1 %v4236_v44  ;;  %v1178_v36 = vmul.f32 0.01, %v1146_v25  ;;  %v4312_v40 = vsel %vm1159_vm1, %v1143_v49, %v1175_v24  ;;  %v1192_v6 = vsel %vm1160_vm4, %v1144_v62, %v1176_v33 }
  0xee   : > { %2229 = vmatprep.mubr.bf16.mxu0 %v2773_v16  ;;  %v4314_v8 = vsel %vm1161_vm7, %v1145_v51, %v1177_v52  ;;  %v1271_v9 = vsel %vm477_vm6, %v4312_v40, 0.0  ;;  %v1272_v59 = vsel %vm496_vm11, %v1192_v6, 0.0  ;;  %v2755_v13 = vrot.slane %v4184_v54, 9  ;;  %v4379_v16 = vld [vmem:[%s3926_s7 + $0x44] sm:$0x3]  ;;  %v4381_v52 = vld [vmem:[#allocation6 + $0x230] sm:$0xff]  }
  0xef   : > { %v1194_v53 = vsel %vm1162_vm8, %v1146_v25, %v1178_v36  ;;  %v1273_v14 = vsel %vm477_vm6, %v4314_v8, 0.0  ;;  %v4325_v17 = vpack.c.bf16 %v1271_v9, %v1271_v9  ;;  %v4327_v19 = vpack.c.bf16 %v1272_v59, %v1272_v59  ;;  %3216 = vmatpush3.bf16.msra.mxu0 %v4285_v48 }
  0xf0   : > { %3242 = vmatpush3.bf16.msra.mxu1 %v4236_v44  ;;  %v1274_v21 = vsel %vm496_vm11, %v1194_v53, 0.0  ;;  %v4333_v54 = vpack.c.bf16 %v1273_v14, %v1273_v14  ;;  %v980_v22 = vsel %vm3944_vm2, %v2754_v38, %v979_v4  ;;  %v983_v57 = vrot.slane %v4278_v35, 5  ;;  %3217 = vmatprep.subr.bf16.mxu0 %v4305_v42  ;;  %v2785_v35 = vld [vmem:[%s3926_s7 + $0x44] sm:$0x3]  ;;  %v4395_v14 = vld [vmem:[#allocation6 + $0x238] sm:$0xff]  }
  0xf1   : > { %v4341_v23 = vpack.c.bf16 %v1274_v21, %v1274_v21  ;;  %v2816_v44 = vrot.slane %v4325_v17, 9  ;;  %v1353_v30 = vrot.slane %v4327_v19, 5  ;;  %3235 = vmatprep.subr.bf16.mxu1 %v4265_v0  ;;  %v4351_v50 = vsel %vm477_vm6, %v4191_v55, 0.0  ;;  %v2787_v55 = vld [vmem:[%s3926_s7 + $0x4c] sm:$0x3] }
  0xf2   : > { %v4353_v47 = vpack.c.bf16 %v905_v5, %v905_v5  ;;  %v2817_v29 = vrot.slane %v4333_v54, 9  ;;  %v984_v32 = vsel %vm3944_vm2, %v2755_v13, %v983_v57  ;;  %v3032_v43 = vpack.c.bf16 %v4314_v8, %v4312_v40  ;;  %v4389_v8 = vld [vmem:[#allocation9] ss:$0 sm:$0xff] }
  0xf3   : > { %v1354_v18 = vsel %vm3944_vm2, %v2816_v44, %v1353_v30  ;;  %v1357_v39 = vrot.slane %v4341_v23, 5  ;;  %v2761_v28 = vcombine.low %v980_v22, %v984_v32  ;;  %3218 = vmatpush3.bf16.msra.mxu0 %v4305_v42  ;;  %v728_v45 = vunpack.c.l.bf16 %v2723_v26 }
  0xf4   : > { %3243 = vmatpush3.bf16.msra.mxu1 %v4265_v0  ;;  %v730_v49 = vunpack.c.l.bf16 %v2725_v27  ;;  %v2768_v58 = vrot.slane %v4188_v56, 10  ;;  %v2769_v61 = vrot.slane %v4195_v63, 10  ;;  %3219 = vmatprep.subr.bf16.mxu0 %v4339_v46  ;;  %v1101_v38 = vunpack.c.l.bf16 %v2784_v34  ;;  %v4374_v0 = vld [vmem:[#allocation8] ss:$0 sm:$0xff] }
  0xf5   : > { %v1358_v62 = vsel %vm3944_vm2, %v2817_v29, %v1357_v39  ;;  %2230 = vmatmul.mubr.bf16.gmra.mrb[20].mxu0 %v2761_v28  ;;  %3236 = vmatprep.subr.bf16.mxu1 %v4285_v48  ;;  %v1102_v51 = vunpack.c.l.bf16 %v2785_v35  ;;  %v1103_v25 = vunpack.c.h.bf16 %v2784_v34  ;;  %v751_v31 = vmul.f32 %v4374_v0, %v728_v45  ;;  %v2729_v35 = vld [vmem:[%s3926_s7 + $0x4c] sm:$0x3] }
  0xf6   : > { %v2823_v24 = vcombine.low %v1354_v18, %v1358_v62  ;;  %v753_v33 = vmul.f32 %v4374_v0, %v730_v49  ;;  %v1104_v4 = vunpack.c.l.bf16 %v2787_v55  ;;  %v1124_v5 = vmul.f32 %v4374_v0, %v1101_v38 }
  0xf7   : > { %v1125_v36 = vmul.f32 %v4374_v0, %v1102_v51  ;;  %v1126_v40 = vmul.f32 %v4374_v0, %v1103_v25  ;;  %v2756_v6 = vrot.slane %v4188_v56, 9  ;;  %3220 = vmatpush3.bf16.msra.mxu0 %v4339_v46  ;;  %v774_v9 = vadd.f32 %v4389_v8, %v751_v31 }
  0xf8   : > { %2294 = vmatprep.mubr.bf16.mxu1 %v2823_v24  ;;  %3244 = vmatpush3.bf16.msra.mxu1 %v4285_v48  ;;  %v776_v59 = vadd.f32 %v4389_v8, %v753_v33  ;;  %v1127_v13 = vmul.f32 %v4374_v0, %v1104_v4  ;;  %v2757_v53 = vrot.slane %v4195_v63, 9  ;;  %v1147_v21 = vadd.f32 %v4389_v8, %v1124_v5 }
  0xf9   : > { %3033 = vmatmul.mubr.msk.bf16.gmra.mrb[20].mxu1 %vm3998_vm12, %v3032_v43  ;;  %v1148_v22 = vadd.f32 %v4389_v8, %v1125_v36  ;;  %v1149_v48 = vadd.f32 %v4389_v8, %v1126_v40  ;;  %3237 = vmatprep.subr.bf16.mxu1 %v4305_v42  ;;  %v732_v57 = vunpack.c.l.bf16 %v4379_v16  ;;  %vm790_vm9 = vcmp.ge.f32.partialorder %v774_v9, 0.0 }
  0xfa   : > { %vm792_vm10 = vcmp.ge.f32.partialorder %v776_v59, 0.0  ;;  %v806_v44 = vmul.f32 0.01, %v774_v9  ;;  %v808_v30 = vmul.f32 0.01, %v776_v59  ;;  %3221 = vmatprep.subr.bf16.mxu0 %v4381_v52  ;;  %v1150_v26 = vadd.f32 %v4389_v8, %v1127_v13 }
  0xfb   : > { %vm1163_vm13 = vcmp.ge.f32.partialorder %v1147_v21, 0.0  ;;  %vm1164_vm14 = vcmp.ge.f32.partialorder %v1148_v22, 0.0  ;;  %vm1165_vm15 = vcmp.ge.f32.partialorder %v1149_v48, 0.0  ;;  %3222 = vmatpush3.bf16.msra.mxu0 %v4381_v52  ;;  %v1179_v32 = vmul.f32 0.01, %v1147_v21 }
  0xfc   : > { %v822_v27 = vsel %vm790_vm9, %v774_v9, %v806_v44  ;;  %v824_v29 = vsel %vm792_vm10, %v776_v59, %v808_v30  ;;  %v1180_v34 = vmul.f32 0.01, %v1148_v22  ;;  %3245 = vmatpush3.bf16.msra.mxu1 %v4305_v42  ;;  %3223 = vmatprep.subr.bf16.mxu0 %v4395_v14  ;;  %vm1166_vm0 = vcmp.ge.f32.partialorder %v1150_v26, 0.0 }
  0xfd   : > { %v902_v18 = vsel %vm496_vm11, %v822_v27, 0.0  ;;  %v904_v39 = vsel %vm496_vm11, %v824_v29, 0.0  ;;  %v1181_v28 = vmul.f32 0.01, %v1149_v48  ;;  %3238 = vmatprep.subr.bf16.mxu1 %v4339_v46  ;;  %v1182_v45 = vmul.f32 0.01, %v1150_v26 }
  0xfe   : > { %v2953_v43 = vpack.c.bf16 %v902_v18, %v902_v18  ;;  %v2955_v55 = vpack.c.bf16 %v904_v39, %v904_v39  ;;  %v1195_v49 = vsel %vm1163_vm13, %v1147_v21, %v1179_v32  ;;  %v1196_v42 = vsel %vm1164_vm14, %v1148_v22, %v1180_v34 }
  0xff   : > { %v1197_v62 = vsel %vm1165_vm15, %v1149_v48, %v1181_v28  ;;  %v1275_v38 = vsel %vm477_vm6, %v1195_v49, 0.0  ;;  %v734_v51 = vunpack.c.l.bf16 %v2729_v35  ;;  %3224 = vmatpush3.bf16.msra.mxu0 %v4395_v14  ;;  %v1198_v31 = vsel %vm1166_vm0, %v1150_v26, %v1182_v45 }
 0x100   : > { %v1039_v25 = vrot.slane %v2953_v43, 6  ;;  %v1043_v24 = vrot.slane %v2955_v55, 6  ;;  %v1276_v33 = vsel %vm496_vm11, %v1196_v42, 0.0  ;;  %3246 = vmatpush3.bf16.msra.mxu1 %v4339_v46  ;;  %v1277_v4 = vsel %vm477_vm6, %v1197_v62, 0.0 }
 0x101   : > { %v1278_v16 = vsel %vm496_vm11, %v1198_v31, 0.0  ;;  %v2971_v5 = vpack.c.bf16 %v1275_v38, %v1275_v38  ;;  %v2972_v36 = vpack.c.bf16 %v1276_v33, %v1276_v33  ;;  %3239 = vmatprep.subr.bf16.mxu1 %v4381_v52  ;;  %v2973_v9 = vpack.c.bf16 %v1277_v4, %v1277_v4 }
 0x102   : > { %v1040_v40 = vsel %vm3956_vm5, %v2768_v58, %v1039_v25  ;;  %v1044_v46 = vsel %vm3956_vm5, %v2769_v61, %v1043_v24  ;;  %v2974_v41 = vpack.c.bf16 %v1278_v16, %v1278_v16  ;;  %v987_v22 = vrot.slane %v2953_v43, 5 }
 0x103   : > { %v2774_v59 = vcombine.low %v1040_v40, %v1044_v46  ;;  %v2818_v13 = vrot.slane %v2971_v5, 9  ;;  %v1361_v21 = vrot.slane %v2972_v36, 5  ;;  %v2958_v48 = vpack.c.bf16 %v4351_v50, %v4351_v50 }
 0x104   : > { %v2819_v44 = vrot.slane %v2973_v9, 9  ;;  %v1365_v30 = vrot.slane %v2974_v41, 5  ;;  %v991_v26 = vrot.slane %v2955_v55, 5  ;;  %3247 = vmatpush3.bf16.msra.mxu1 %v4381_v52  ;;  %v988_v61 = vsel %vm3944_vm2, %v2756_v6, %v987_v22 }
 0x105   : > { %2237 = vmatprep.mubr.bf16.mxu0 %v2774_v59  ;;  %v1362_v58 = vsel %vm3944_vm2, %v2818_v13, %v1361_v21  ;;  %v755_v27 = vmul.f32 %v4374_v0, %v732_v57  ;;  %v757_v29 = vmul.f32 %v4374_v0, %v734_v51  ;;  %v3035_v32 = vpack.c.bf16 %v1197_v62, %v1195_v49 }
 0x106   : > { %v1366_v50 = vsel %vm3944_vm2, %v2819_v44, %v1365_v30  ;;  %v992_v52 = vsel %vm3944_vm2, %v2757_v53, %v991_v26  ;;  %3240 = vmatprep.subr.bf16.mxu1 %v4395_v14  ;;  %v2770_v57 = vrot.slane %v4353_v47, 10  ;;  %v2771_v0 = vrot.slane %v2958_v48, 10 }
 0x107   : > { %v2824_v34 = vcombine.low %v1362_v58, %v1366_v50  ;;  %v2762_v56 = vcombine.low %v988_v61, %v992_v52  ;;  %v778_v35 = vadd.f32 %v4389_v8, %v755_v27  ;;  %v780_v6 = vadd.f32 %v4389_v8, %v757_v29 }
 0x108   : > { %3248 = vmatpush3.bf16.msra.mxu1 %v4395_v14  ;;  %v2826_v18 = vrot.slane %v4242_v2, 10  ;;  %v1397_v39 = vrot.slane %v4247_v10, 6  ;;  %v2827_v8 = vrot.slane %v4249_v11, 10  ;;  %v1401_v28 = vrot.slane %v4254_v12, 6 }
 0x109   : > { %2302 = vmatprep.mubr.bf16.mxu1 %v2824_v34  ;;  %2238 = vmatmul.mubr.bf16.gmra.mrb[24].mxu0 %v2762_v56  ;;  %vm794_vm6 = vcmp.ge.f32.partialorder %v778_v35, 0.0  ;;  %vm796_vm1 = vcmp.ge.f32.partialorder %v780_v6, 0.0  ;;  %v810_v63 = vmul.f32 0.01, %v778_v35  ;;  %v812_v53 = vmul.f32 0.01, %v780_v6 }
 0x10a   : > { %3036 = vmatmul.mubr.msk.bf16.gmra.mrb[24].mxu1 %vm3998_vm12, %v3035_v32  ;;  %v2830_v43 = vrot.slane %v2971_v5, 10  ;;  %v1413_v2 = vrot.slane %v2972_v36, 6  ;;  %v2831_v45 = vrot.slane %v2973_v9, 10  ;;  %v2758_v42 = vrot.slane %v4353_v47, 9 }
 0x10b   : > { %v826_v55 = vsel %vm794_vm6, %v778_v35, %v810_v63  ;;  %v828_v14 = vsel %vm796_vm1, %v780_v6, %v812_v53  ;;  %2310 = vmatprep.mubr.bf16.mxu1 %v3952_v7  ;;  %v1417_v10 = vrot.slane %v2974_v41, 6  ;;  %v2759_v38 = vrot.slane %v2958_v48, 9 }
 0x10c   : > { %v906_v49 = vsel %vm496_vm11, %v826_v55, 0.0  ;;  %v908_v20 = vsel %vm496_vm11, %v828_v14, 0.0  ;;  %v1414_v12 = vsel %vm3956_vm5, %v2830_v43, %v1413_v2  ;;  %v1398_v7 = vsel %vm3956_vm5, %v2826_v18, %v1397_v39 }
 0x10d   : > { %v2957_v62 = vpack.c.bf16 %v906_v49, %v906_v49  ;;  %v2959_v11 = vpack.c.bf16 %v908_v20, %v908_v20  ;;  %v1402_v51 = vsel %vm3956_vm5, %v2827_v8, %v1401_v28  ;;  %v1418_v25 = vsel %vm3956_vm5, %v2831_v45, %v1417_v10 }
 0x10e   : > { %v2828_v33 = vrot.slane %v4325_v17, 10  ;;  %v1405_v4 = vrot.slane %v4327_v19, 6  ;;  %v2829_v16 = vrot.slane %v4333_v54, 10  ;;  %v2836_v5 = vcombine.low %v1414_v12, %v1418_v25 }
 0x10f   : > { %v1047_v60 = vrot.slane %v2957_v62, 6  ;;  %v1051_v24 = vrot.slane %v2959_v11, 6  ;;  %v995_v31 = vrot.slane %v2957_v62, 5  ;;  %v999_v47 = vrot.slane %v2959_v11, 5 }
 0x110   : > { %v1409_v41 = vrot.slane %v4341_v23, 6  ;;  %v2834_v19 = vcombine.low %v1398_v7, %v1402_v51  ;;  %v1406_v54 = vsel %vm3956_vm5, %v2828_v33, %v1405_v4 }
 0x111   : > { %v1048_v36 = vsel %vm3956_vm5, %v2770_v57, %v1047_v60  ;;  %v1052_v40 = vsel %vm3956_vm5, %v2771_v0, %v1051_v24  ;;  %v996_v46 = vsel %vm3944_vm2, %v2758_v42, %v995_v31  ;;  %v1000_v9 = vsel %vm3944_vm2, %v2759_v38, %v999_v47 }
 0x112   : > { %v2775_v17 = vcombine.low %v1048_v36, %v1052_v40  ;;  %v2763_v59 = vcombine.low %v996_v46, %v1000_v9  ;;  %2311 = vmatmul.mubr.bf16.gmra.mrb[28].mxu1 %v3940_v1  ;;  %v1410_v13 = vsel %vm3956_vm5, %v2829_v16, %v1409_v41 }
 0x113   : > { %3229 = vmatprep.mubr.bf16.mxu1 %v2836_v5  ;;  %v2835_v21 = vcombine.low %v1406_v54, %v1410_v13 }
 0x114   : > { %2245 = vmatprep.mubr.bf16.mxu0 %v2775_v17 }
 0x115   : > { %2246 = vmatmul.mubr.bf16.gmra.mrb[28].mxu0 %v2763_v59 }
 0x116   : > { %3225 = vmatprep.mubr.bf16.mxu0 %v2834_v19 }
 0x11a   : > { %3230 = vmatmul.mubr.bf16.vlgmr.msra.gmra.mrb[32].mxu1 %v3987_v15 }
 0x11d   : > { %3226 = vmatmul.mubr.bf16.vlgmr.msra.gmra.mrb[32].mxu0 %v2835_v21 }
 0x17e   : > { %v3053_v3 = vpop.f32.mrb[0].mxu0 }
 0x17f   : > { %v3054_v23 = vpop.f32.mrb[1].mxu0  ;;  %v3093_v30 = vpop.f32.mrb[0].mxu1 }
 0x180   : > { %v3055_v22 = vadd.f32 %v3054_v23, %v3053_v3  ;;  %v3056_v48 = vpop.f32.mrb[2].mxu0  ;;  %v3094_v26 = vpop.f32.mrb[1].mxu1 }
 0x181   : > { %v3057_v1 = vpop.f32.mrb[3].mxu0  ;;  %v3095_v58 = vadd.f32 %v3094_v26, %v3093_v30  ;;  %v3096_v61 = vpop.f32.mrb[2].mxu1 }
 0x182   : > { %v3058_v44 = vadd.f32 %v3057_v1, %v3056_v48  ;;  %v3097_v27 = vpop.f32.mrb[3].mxu1 }
 0x183   : > { %v2159_v29 = vadd.f32 %v3095_v58, %v3055_v22  ;;  %v3098_v50 = vadd.f32 %v3097_v27, %v3096_v61 }
 0x185   : > { %v2162_v52 = vadd.f32 %v3098_v50, %v3058_v44 }
 0x18e   : > { %v3099_v15 = vpop.f32.mrb[4].mxu1 }
 0x18f   : > { %v3100_v6 = vpop.f32.mrb[5].mxu1 }
 0x190   : > { %v3059_v37 = vpop.f32.mrb[4].mxu0  ;;  %v3101_v0 = vadd.f32 %v3100_v6, %v3099_v15  ;;  %v3102_v18 = vpop.f32.mrb[6].mxu1 }
 0x191   : > { %v3060_v32 = vpop.f32.mrb[5].mxu0  ;;  %v3103_v63 = vpop.f32.mrb[7].mxu1 }
 0x192   : > { %v3061_v34 = vadd.f32 %v3060_v32, %v3059_v37  ;;  %v3062_v56 = vpop.f32.mrb[6].mxu0  ;;  %v3104_v39 = vadd.f32 %v3103_v63, %v3102_v18 }
 0x193   : > { %v3063_v35 = vpop.f32.mrb[7].mxu0 }
 0x194   : > { %v3064_v57 = vadd.f32 %v3063_v35, %v3062_v56  ;;  %v2167_v53 = vadd.f32 %v3101_v0, %v3061_v34 }
 0x196   : > { %v2170_v8 = vadd.f32 %v3104_v39, %v3064_v57 }
 0x19c   : > { %v3065_v28 = vpop.f32.mrb[8].mxu0 }
 0x19d   : > { %v3066_v43 = vpop.f32.mrb[9].mxu0 }
 0x19e   : > { %v3067_v55 = vadd.f32 %v3066_v43, %v3065_v28  ;;  %v3068_v14 = vpop.f32.mrb[10].mxu0  ;;  %v3105_v2 = vpop.f32.mrb[8].mxu1 }
 0x19f   : > { %v3069_v45 = vpop.f32.mrb[11].mxu0  ;;  %v3106_v49 = vpop.f32.mrb[9].mxu1 }
 0x1a0   : > { %v3070_v20 = vadd.f32 %v3069_v45, %v3068_v14  ;;  %v3107_v42 = vadd.f32 %v3106_v49, %v3105_v2  ;;  %v3108_v10 = vpop.f32.mrb[10].mxu1 }
 0x1a1   : > { %v3109_v62 = vpop.f32.mrb[11].mxu1 }
 0x1a2   : > { %v2175_v11 = vadd.f32 %v3107_v42, %v3067_v55  ;;  %v3110_v38 = vadd.f32 %v3109_v62, %v3108_v10 }
 0x1a4   : > { %v2178_v12 = vadd.f32 %v3110_v38, %v3070_v20 }
 0x1ad   : > { %v3071_v7 = vpop.f32.mrb[12].mxu0 }
 0x1ae   : > { %v3111_v51 = vpop.f32.mrb[12].mxu1  ;;  %v3072_v25 = vpop.f32.mrb[13].mxu0 }
 0x1af   : > { %v3073_v60 = vadd.f32 %v3072_v25, %v3071_v7  ;;  %v3112_v24 = vpop.f32.mrb[13].mxu1  ;;  %v3074_v31 = vpop.f32.mrb[14].mxu0 }
 0x1b0   : > { %v3113_v47 = vadd.f32 %v3112_v24, %v3111_v51  ;;  %v3114_v33 = vpop.f32.mrb[14].mxu1  ;;  %v3075_v4 = vpop.f32.mrb[15].mxu0 }
 0x1b1   : > { %v3076_v16 = vadd.f32 %v3075_v4, %v3074_v31  ;;  %v3115_v5 = vpop.f32.mrb[15].mxu1 }
 0x1b2   : > { %v2183_v36 = vadd.f32 %v3113_v47, %v3073_v60  ;;  %v3116_v40 = vadd.f32 %v3115_v5, %v3114_v33 }
 0x1b4   : > { %v4497_v46 = vadd.f32 %v3116_v40, %v3076_v16 }
 0x1b5   : > { %v3133_v9 = vpop.f32.mrb[16].mxu0 }
 0x1b6   : > { %v3134_v41 = vpop.f32.mrb[17].mxu0 }
 0x1b7   : > { %v3135_v17 = vadd.f32 %v3134_v41, %v3133_v9  ;;  %v3136_v59 = vpop.f32.mrb[18].mxu0 }
 0x1b8   : > { %v3137_v19 = vpop.f32.mrb[19].mxu0 }
 0x1b9   : > { %v2224_v54 = vadd.f32 %v3135_v17, %v2159_v29  ;;  %v3138_v13 = vadd.f32 %v3137_v19, %v3136_v59 }
 0x1bb   : > { %v2227_v21 = vadd.f32 %v3138_v13, %v2162_v52 }
 0x1be   : > { %v3173_v3 = vpop.f32.mrb[16].mxu1 }
 0x1bf   : > { %v3174_v23 = vpop.f32.mrb[17].mxu1 }
 0x1c0   : > { %v3175_v22 = vadd.f32 %v3174_v23, %v3173_v3  ;;  %v3176_v48 = vpop.f32.mrb[18].mxu1 }
 0x1c1   : > { %v3177_v1 = vpop.f32.mrb[19].mxu1 }
 0x1c2   : > { %v3178_v44 = vadd.f32 %v3177_v1, %v3176_v48  ;;  %v4499_v30 = vadd.f32 %v3175_v22, %v2224_v54 }
 0x1c4   : > { %v4501_v26 = vadd.f32 %v3178_v44, %v2227_v21 }
 0x1c8   : > { %v3139_v58 = vpop.f32.mrb[20].mxu0 }
 0x1c9   : > { %v3140_v61 = vpop.f32.mrb[21].mxu0 }
 0x1ca   : > { %v3141_v27 = vadd.f32 %v3140_v61, %v3139_v58  ;;  %v3142_v50 = vpop.f32.mrb[22].mxu0 }
 0x1cb   : > { %v3143_v37 = vpop.f32.mrb[23].mxu0 }
 0x1cc   : > { %v2232_v32 = vadd.f32 %v3141_v27, %v2167_v53  ;;  %v3179_v34 = vpop.f32.mrb[20].mxu1  ;;  %v3144_v29 = vadd.f32 %v3143_v37, %v3142_v50 }
 0x1cd   : > { %v3180_v56 = vpop.f32.mrb[21].mxu1 }
 0x1ce   : > { %v2235_v52 = vadd.f32 %v3144_v29, %v2170_v8  ;;  %v3181_v15 = vadd.f32 %v3180_v56, %v3179_v34  ;;  %v3182_v35 = vpop.f32.mrb[22].mxu1 }
 0x1cf   : > { %v3183_v6 = vpop.f32.mrb[23].mxu1 }
 0x1d0   : > { %v3184_v57 = vadd.f32 %v3183_v6, %v3182_v35  ;;  %v2297_v0 = vadd.f32 %v3181_v15, %v2232_v32 }
 0x1d2   : > { %v2300_v18 = vadd.f32 %v3184_v57, %v2235_v52 }
 0x1dc   : > { %v3145_v63 = vpop.f32.mrb[24].mxu0 }
 0x1dd   : > { %v3146_v39 = vpop.f32.mrb[25].mxu0  ;;  %v3185_v28 = vpop.f32.mrb[24].mxu1 }
 0x1de   : > { %v3147_v43 = vadd.f32 %v3146_v39, %v3145_v63  ;;  %v3148_v55 = vpop.f32.mrb[26].mxu0  ;;  %v3186_v14 = vpop.f32.mrb[25].mxu1 }
 0x1df   : > { %v3149_v2 = vpop.f32.mrb[27].mxu0  ;;  %v3187_v45 = vadd.f32 %v3186_v14, %v3185_v28  ;;  %v3188_v49 = vpop.f32.mrb[26].mxu1 }
 0x1e0   : > { %v2240_v53 = vadd.f32 %v3147_v43, %v2175_v11  ;;  %v3150_v20 = vadd.f32 %v3149_v2, %v3148_v55  ;;  %v3189_v42 = vpop.f32.mrb[27].mxu1 }
 0x1e1   : > { %v3190_v10 = vadd.f32 %v3189_v42, %v3188_v49 }
 0x1e2   : > { %v2243_v8 = vadd.f32 %v3150_v20, %v2178_v12  ;;  %v2305_v62 = vadd.f32 %v3187_v45, %v2240_v53 }
 0x1e4   : > { %v2308_v38 = vadd.f32 %v3190_v10, %v2243_v8 }
 0x1e5   : > { %v3191_v7 = vpop.f32.mrb[28].mxu1 }
 0x1e6   : > { %v3192_v51 = vpop.f32.mrb[29].mxu1 }
 0x1e7   : > { %v3193_v25 = vadd.f32 %v3192_v51, %v3191_v7  ;;  %v3194_v60 = vpop.f32.mrb[30].mxu1 }
 0x1e8   : > { %v3151_v24 = vpop.f32.mrb[28].mxu0  ;;  %v3195_v31 = vpop.f32.mrb[31].mxu1 }
 0x1e9   : > { %v3152_v47 = vpop.f32.mrb[29].mxu0  ;;  %v3196_v33 = vadd.f32 %v3195_v31, %v3194_v60 }
 0x1ea   : > { %v3153_v4 = vadd.f32 %v3152_v47, %v3151_v24  ;;  %v3154_v16 = vpop.f32.mrb[30].mxu0 }
 0x1eb   : > { %v3155_v5 = vpop.f32.mrb[31].mxu0 }
 0x1ec   : > { %v2248_v40 = vadd.f32 %v3153_v4, %v2183_v36  ;;  %v3156_v11 = vadd.f32 %v3155_v5, %v3154_v16 }
 0x1ed   : > { %v3231_v9 = vpop.f32.mrb[32].mxu1 }
 0x1ee   : > { %v2251_v12 = vadd.f32 %v3156_v11, %v4497_v46  ;;  %v2313_v41 = vadd.f32 %v3193_v25, %v2248_v40  ;;  %v2369_v17 = vpop.f32.mrb[33].mxu1 }
 0x1ef   : > { %v4505_v59 = vadd.f32 %v2369_v17, %v2305_v62  ;;  %v3232_v19 = vpop.f32.mrb[34].mxu1 }
 0x1f0   : > { %v3227_v54 = vpop.f32.mrb[32].mxu0  ;;  %v4507_v13 = vadd.f32 %v3231_v9, %v2313_v41  ;;  %v2316_v21 = vadd.f32 %v3196_v33, %v2251_v12  ;;  %v2372_v3 = vpop.f32.mrb[35].mxu1 }
 0x1f1   : > { %v2362_v23 = vadd.f32 %v3227_v54, %v2297_v0  ;;  %v2353_v22 = vpop.f32.mrb[33].mxu0  ;;  %v2373_v36 = vadd.f32 %v2372_v3, %v2308_v38 }
 0x1f2   : > { %v2354_v48 = vadd.f32 %v2353_v22, %v4499_v30  ;;  %v3228_v1 = vpop.f32.mrb[34].mxu0  ;;  %v4510_v46 = vadd.f32 %v3232_v19, %v2316_v21 }
 0x1f3   : > { %v2365_v44 = vadd.f32 %v3228_v1, %v2300_v18  ;;  %v2356_v58 = vpop.f32.mrb[35].mxu0  ;;  %v2997_v61 = vpack.c.bf16 %v2373_v36, %v4505_v59  ;;  %v2439_v56 = vmul.f32 %v2362_v23, %v2362_v23 }
 0x1f4   : > { %v3002_v27 = vpack.c.bf16 %v4510_v46, %v4507_v13  ;;  %v2357_v50 = vadd.f32 %v2356_v58, %v4501_v26  ;;  %v2437_v30 = vmul.f32 %v2354_v48, %v2354_v48 }
 0x1f5   : > { %v2992_v37 = vpack.c.bf16 %v2365_v44, %v2362_v23  ;;  %3005 = vst [vmem:[%s302_s28 + $0x10] sm:$0xff] %v2997_v61  }
 0x1f6   : > { %3006 = vst [vmem:[%s302_s28 + $0x18] sm:$0xff] %v3002_v27   ;;  %v2987_v32 = vpack.c.bf16 %v2357_v50, %v2354_v48  ;;  %v2424_v34 = vadd.f32 %v2357_v50, %v2354_v48  ;;  %v2438_v29 = vmul.f32 %v2357_v50, %v2357_v50 }
 0x1f7   : > { %3004 = vst [vmem:[%s302_s28 + $0x8] sm:$0xff] %v2992_v37  }
 0x1f8   : > { %2988 = vst [vmem:[%s302_s28] sm:$0xff] %v2987_v32   ;;  %v2425_v52 = vadd.f32 %v2424_v34, %v2362_v23  ;;  %v2445_v26 = vadd.f32 %v2438_v29, %v2437_v30 }
 0x1f9   : > { %3556 = shalt.err (!%p3553_p0)
}
 0x1fa   : > { %s3557_s17 = scalar_lea.hbm %s4522_s18, 512  ;;  %s3561_s7 = scalar_lea.hbm %s4616_s4, 1024 }
 0x1fb   : > { %p3558_p4 = scmp.ne.s32.totalorder %s4522_s18, %s3557_s17  ;;  %p3562_p12 = scmp.lt.u32.totalorder %s4522_s18, %s4616_s4 }
 0x1fc   : > { %p3563_p1 = scmp.lt.u32.totalorder %s3561_s7, %s3557_s17  ;;  %p3565_p13 = scmp.lt.u32.totalorder %s3557_s17, %s4522_s18 }
 0x1fd   : > { %p3559_p2 = pnand %p3558_p4, %p3863_p10 }
 0x1fe   : > { %p3564_p11 = por %p3563_p1, %p3562_p12 }
 0x1ff   : > { %p3560_p8 = pneg %p3559_p2 }
 0x200   : > { %p3566_p6 = por %p3565_p13, %p3564_p11 }
 0x202   : > { %p3567_p3 = pnand %p3566_p6, %p3560_p8 }
 0x204   : > { %3570 = shalt.err (!%p3567_p3)
}
 0x205   : > { %s3675_s13 = smov 64   ;;  %s3676_s6 = smov 4   ;;  %v2440_v15 = vmul.f32 %v2365_v44, %v2365_v44  ;;  %v2446_v35 = vadd.f32 %v2445_v26, %v2439_v56  ;;  %v2426_v6 = vadd.f32 %v2425_v52, %v2365_v44  ;;  %v2441_v57 = vmul.f32 %v4505_v59, %v4505_v59 }
 0x206   : > { %3266 = dma.vmem_to_hbm [thread:$0]  (%p3863_p10), %s4514_s30, 512, %s4522_s18, %s2464_s29, %s3675_s13, %s3675_s13, %s3676_s6   ;;  %v2442_v39 = vmul.f32 %v2373_v36, %v2373_v36  ;;  %v2443_v43 = vmul.f32 %v4507_v13, %v4507_v13  ;;  %v2444_v2 = vmul.f32 %v4510_v46, %v4510_v46  ;;  %vm2458_vm2 = vcmask 1040384  }
 0x207   : > { %v2427_v0 = vadd.f32 %v2426_v6, %v4505_v59  ;;  %v2447_v18 = vadd.f32 %v2446_v35, %v2440_v15  ;;  %s2667_s30 = sshll.u32 %s3922_s24, 3  ;;  %s2922_s14 = sshll.u32 %s3657_s21, 7 }
 0x208   : > { %s309_s18 = scalar_lea.vmem [#allocation12], %s2667_s30  ;;  %s4562_s10 = scalar_lea.hbm %s4617_s5, %s2922_s14 }
 0x209   : > { %v2428_v63 = vadd.f32 %v2427_v0, %v2373_v36  ;;  %v2448_v28 = vadd.f32 %v2447_v18, %v2441_v57  ;;  %s2501_s29 = sshll.u32 %s309_s18, 4  ;;  %s2469_s11 = scalar_lea.sflag [#allocation13], %s3922_s24  ;;  %s4564_s29 = int_to_ptr.vmem [resolvable:$true] %s2501_s29 }
 0x20a   : > { %s3571_s21 = scalar_lea.vmem %s4564_s29, 128  ;;  %s3677_s17 = smov [#allocation12]  }
 0x20b   : > { %v2429_v55 = vadd.f32 %v2428_v63, %v4507_v13  ;;  %v2449_v14 = vadd.f32 %v2448_v28, %v2442_v39  ;;  %p3572_p5 = scmp.ne.s32.totalorder %s4564_s29, %s3571_s21  ;;  %s3575_s25 = sshll.u32 %s3677_s17, 4  ;;  %s3576_s25 = int_to_ptr.vmem [resolvable:$false] %s3575_s25 }
 0x20c   : > { %s3577_s9 = scalar_lea.vmem %s3576_s25, 256  ;;  %p3578_p0 = scmp.lt.s32.totalorder %s4564_s29, %s3576_s25 }
 0x20d   : > { %v2430_v45 = vadd.f32 %v2429_v55, %v4510_v46  ;;  %v2450_v49 = vadd.f32 %v2449_v14, %v2443_v43  ;;  %p3573_p7 = pnand %p3572_p5, %p3863_p10  ;;  %p3579_p4 = scmp.lt.s32.totalorder %s3577_s9, %s3571_s21 }
 0x20f   : > { %v2431_v53 = vrot.slane %v2430_v45, 4  ;;  %v2451_v20 = vadd.f32 %v2450_v49, %v2444_v2  ;;  %p3574_p9 = pneg %p3573_p7  ;;  %p3580_p2 = por %p3579_p4, %p3578_p0 }
 0x211   : > { %v2432_v42 = vadd.f32 %v2431_v53, %v2430_v45  ;;  %v2452_v10 = vrot.slane %v2451_v20, 4  ;;  %p3581_p8 = pnand %p3580_p2, %p3574_p9 }
 0x213   : > { %v2433_v8 = vrot.slane %v2432_v42, 2  ;;  %v2453_v62 = vadd.f32 %v2452_v10, %v2451_v20 }
 0x215   : > { %v2434_v38 = vadd.f32 %v2433_v8, %v2432_v42  ;;  %v2454_v7 = vrot.slane %v2453_v62, 2 }
 0x217   : > { %v2435_v51 = vrot.slane %v2434_v38, 1  ;;  %v2455_v25 = vadd.f32 %v2454_v7, %v2453_v62 }
 0x219   : > { %v2456_v60 = vrot.slane %v2455_v25, 1  ;;  %v2436_v24 = vadd.f32 %v2435_v51, %v2434_v38 }
 0x21b   : > { %v2457_v31 = vadd.f32 %v2456_v60, %v2455_v25 }
 0x21d   : > { %v2459_v47 = vsel %vm2458_vm2, %v2436_v24, %v2457_v31 }
 0x21e   : > { %v2461_v33 = vsel %vm644_vm3, %v2459_v47, 0.0 }
 0x21f   : > { %2462 = vst [vmem:[%s309_s18] sm:$0xff] %v2461_v33 }
 0x220   : > { %3584 = shalt.err (!%p3581_p8)
}
 0x221   : > { %s3585_s24 = scalar_lea.hbm %s4562_s10, 128  ;;  %s3589_s28 = scalar_lea.hbm %s4617_s5, 256 }
 0x222   : > { %p3586_p12 = scmp.ne.s32.totalorder %s4562_s10, %s3585_s24  ;;  %p3590_p13 = scmp.lt.u32.totalorder %s4562_s10, %s4617_s5 }
 0x223   : > { %p3591_p6 = scmp.lt.u32.totalorder %s3589_s28, %s3585_s24  ;;  %p3593_p5 = scmp.lt.u32.totalorder %s3585_s24, %s4562_s10 }
 0x224   : > { %p3587_p1 = pnand %p3586_p12, %p3863_p10 }
 0x225   : > { %p3592_p3 = por %p3591_p6, %p3590_p13 }
 0x226   : > { %p3588_p11 = pneg %p3587_p1 }
 0x227   : > { %p3594_p7 = por %p3593_p5, %p3592_p3 }
 0x229   : > { %p3595_p9 = pnand %p3594_p7, %p3588_p11 }
 0x22b   : > { %3598 = shalt.err (!%p3595_p9)
}
 0x22c   : > { %3267 = dma.vmem_to_hbm [thread:$0]  (%p3863_p10), %s4564_s29, 128, %s4562_s10, %s2469_s11  }
 0x22d PF: > { %s4647_s30 = sld [smem:[#allocation19_spill]]  ;;  %s4648_s14 = sld [smem:[#allocation20_spill]] }
 0x22e   : > { %p4650_p4 = scmp.ge.s32.totalorder %s3665_s23, 2 }
 0x233   : > { %s2513_s18 = sand.u32 1, %s4647_s30   ;;  %p4649_p0 = scmp.ne.s32.totalorder %s4648_s14, 0 }
 0x234   : > { %s2514_s16 = scalar_lea.sflag [#allocation5], %s2513_s18 }
 0x235   : > { %p3285_p2 = pnand %p4650_p4, %p4649_p0 }
 0x237   : > { %3636 = dma.done.wait (!%p3285_p2), %s2514_s16, 512  }
 0x238   : > { %3638 = vsyncadd (!%p3285_p2), %s2514_s16, 4294966784  ;;  %s2523_s12 = scalar_lea.sflag [#allocation13], %s2513_s18 }
 0x239   : > { %3640 = dma.done.wait (!%p3285_p2), %s2523_s12, 128  }
 0x23a   : > { %3642 = vsyncadd (!%p3285_p2), %s2523_s12, 4294967168  ;;  %s27_s23 = sadd.s32 1, %s3665_s23   ;;  %s4651_s18 = smov %s3649_s19 }
 0x23b   : > { %p24_p8 = scmp.ge.s32.totalorder %s27_s23, 4   ;;  %s4652_s19 = smov %s3653_s20 }
 0x23c   : > { %s4653_s20 = smov %s3879_s27  ;;  %s4654_s21 = smov %s3661_s22 }
 0x23d   : > { %s4655_s22 = smov %s4657_s15  ;;  %26 = sbr.rel (!%p24_p8) target bundleno = 10 (0xa), region = 113 }
 0x244   :  { %2528 = vsyncpa [#allocation4], 1 }
 0x245   :  { %2530 = vsyncpa [#allocation4 + $0x1], 1 }
 0x246   :  { %2531 = vsyncpa [#allocation7], 1 }
 0x247   :  { %2532 = vsyncpa [#allocation10], 1 }
 0x248   :  { %2533 = vsyncpa [#allocation5], 1 }
 0x249   :  { %2535 = vsyncpa [#allocation5 + $0x1], 1 }
 0x24a   :  { %2536 = vsyncpa [#allocation13], 1 }
 0x24b   :  { %2538 = vsyncpa [#allocation13 + $0x1], 1 }

</bundles_post_ra>
